<compile_context>
chip_gen: v6e
topology: v6e:2x2x1
jax: 0.10.0
libtpu: 0.0.40
codegen_flags: <defaults>
</compile_context>

<pallas_src>
import functools
import numpy as np
import jax
import jax.numpy as jnp
from jax.experimental import pallas as pl
from jax.experimental.pallas import tpu as pltpu

HIDDEN = 32
NUM_HEADS = 4
NUM_LAYERS = 2
ATOM_NAMES = ['atom_type', 'chiral_tag', 'degree', 'explicit_valence', 'formal_charge',
              'hybridization', 'implicit_valence', 'is_aromatic', 'total_numHs']
BOND_NAMES = ['edge_type', 'bond_dir', 'is_in_ring']
ATOM_VOCAB = 16
BOND_VOCAB = 8

# ---- packed bias-slab row indices (rows of a [n_rows, 4H] slab) --------------------
_R_BQKV, _R_BO, _R_BFF1, _R_BFF2 = 0, 1, 2, 3
_R_LN1G, _R_LN1B, _R_LN2G, _R_LN2B = 4, 5, 6, 7
_R_BE, _R_LNEG, _R_LNEB, _R_BEB = 8, 9, 10, 11
_N_BIAS_ROWS = 12


def _layer_norm(x, g, b, eps=1e-5):
    mu = jnp.mean(x, axis=-1, keepdims=True)
    var = jnp.mean((x - mu) ** 2, axis=-1, keepdims=True)
    return (x - mu) * jax.lax.rsqrt(var + eps) * g + b


# ======================================================================================
# Fused kernel: all layers, one graph per grid step.
# ======================================================================================
def gt_fused_kernel(n_ref, e_ref, mask_ref, wmat_ref, wff2_ref, bias_ref, n_out_ref, *,
                    num_layers, num_heads, no_edge_update):
    N, H = n_ref.shape[1], n_ref.shape[2]
    dh = H // num_heads
    scale = 1.0 / float(np.sqrt(dh))

    n = n_ref[0]                      # [N, H]      node features, resident across layers
    e2 = e_ref[0]                     # [N*N, H]    flat pairwise edge features, resident
    mask = mask_ref[0]                # [1, N]      1.0 = valid node
    neg = (1.0 - mask) * (-1e9)       # [1, N]      additive mask for padded keys

    for l in range(num_layers):       # static unroll: layers fused inside one kernel
        wmat = wmat_ref[l]            # [H, 11H + nh]  packed projection weights
        wff2 = wff2_ref[l]            # [4H, H]
        bias = bias_ref[l]            # [12, 4H]       packed biases / LN params

        # static column slices of the packed matrix slab
        wqkv = wmat[:, 0:3 * H]
        wo_full = wmat[:, 3 * H:4 * H]
        w_ff1 = wmat[:, 4 * H:8 * H]
        w_er = wmat[:, 8 * H:9 * H]
        w_ec = wmat[:, 9 * H:10 * H]
        w_ee = wmat[:, 10 * H:11 * H]
        we_bias_t = wmat[:, 11 * H:11 * H + num_heads]

        bqkv = bias[_R_BQKV:_R_BQKV + 1, 0:3 * H]
        bo = bias[_R_BO:_R_BO + 1, 0:H]
        b_ff1 = bias[_R_BFF1:_R_BFF1 + 1, 0:4 * H]
        b_ff2 = bias[_R_BFF2:_R_BFF2 + 1, 0:H]
        ln1_g = bias[_R_LN1G:_R_LN1G + 1, 0:H]
        ln1_b = bias[_R_LN1B:_R_LN1B + 1, 0:H]
        ln2_g = bias[_R_LN2G:_R_LN2G + 1, 0:H]
        ln2_b = bias[_R_LN2B:_R_LN2B + 1, 0:H]
        b_e = bias[_R_BE:_R_BE + 1, 0:H]
        lne_g = bias[_R_LNEG:_R_LNEG + 1, 0:H]
        lne_b = bias[_R_LNEB:_R_LNEB + 1, 0:H]
        be_bias = bias[_R_BEB:_R_BEB + 1, 0:num_heads]

        n_in = n

        # --- fused QKV projection: one [N,H]@[H,3H] MXU op for all heads
        qkv = jnp.dot(n_in, wqkv, preferred_element_type=jnp.float32) + bqkv
        q, k, v = qkv[:, 0:H], qkv[:, H:2 * H], qkv[:, 2 * H:3 * H]

        # --- edge-feature bias for all heads in ONE MXU op (was 4x XLU lane-reduce)
        eb_all = jnp.dot(e2, we_bias_t, preferred_element_type=jnp.float32) + be_bias
        eb3 = eb_all.reshape(N, N, num_heads)          # sublane-group split: layout no-op

        # --- per-head scores / softmax / AV (tiny [N,N] matmuls)
        oh_list = []
        for h in range(num_heads):
            qh = q[:, h * dh:(h + 1) * dh]
            kh = k[:, h * dh:(h + 1) * dh]
            vh = v[:, h * dh:(h + 1) * dh]
            s = jnp.dot(qh, kh.T, preferred_element_type=jnp.float32) * scale
            s = s + eb3[:, :, h] + neg
            m = jnp.max(s, axis=-1, keepdims=True)
            p = jnp.exp(s - m)
            denom = jnp.sum(p, axis=-1, keepdims=True)
            a = p * pl.reciprocal(denom, approx=True)          # EUP divide (free slot)
            oh_list.append(jnp.dot(a, vh, preferred_element_type=jnp.float32))
        attn_cat = jnp.concatenate(oh_list, axis=-1)           # [N, H]
        attn_out = jnp.dot(attn_cat, wo_full, preferred_element_type=jnp.float32) + bo

        # --- node update: residual + LN + FFN + LN
        x1 = _layer_norm(n_in + attn_out, ln1_g, ln1_b)
        ff = jnp.maximum(jnp.dot(x1, w_ff1, preferred_element_type=jnp.float32) + b_ff1, 0.0)
        ff = jnp.dot(ff, wff2, preferred_element_type=jnp.float32) + b_ff2
        n = _layer_norm(x1 + ff, ln2_g, ln2_b)

        # --- edge update (dead after the last layer: the module returns only n_tensors)
        if (not no_edge_update) and (l + 1 < num_layers):
            er = jnp.dot(n_in, w_er, preferred_element_type=jnp.float32)   # [N, H] source
            ec = jnp.dot(n_in, w_ec, preferred_element_type=jnp.float32)   # [N, H] target
            ee = jnp.dot(e2, w_ee, preferred_element_type=jnp.float32)     # [N*N, H]
            er_full = jnp.broadcast_to(er[:, None, :], (N, N, H)).reshape(N * N, H)
            ec_full = jnp.broadcast_to(ec[None, :, :], (N, N, H)).reshape(N * N, H)
            e_mix = ee + er_full + ec_full + b_e
            # LayerNorm over the true H groups (flat view keeps H as the minor axis)
            e2 = _layer_norm(e2 + e_mix, lne_g, lne_b)

    n_out_ref[0] = n


# ======================================================================================
# Weight packing: 24 per-layer arrays -> 3 stacked slabs.
# ======================================================================================
def pack_layer_params(layer_params, hidden, num_heads):
    fh = 4 * hidden
    wmats, wff2s, biases = [], [], []
    for p in layer_params:
        wq = jnp.concatenate([p["wq"][h] for h in range(num_heads)], axis=1)      # [H, H]
        wk = jnp.concatenate([p["wk"][h] for h in range(num_heads)], axis=1)
        wv = jnp.concatenate([p["wv"][h] for h in range(num_heads)], axis=1)
        wqkv = jnp.concatenate([wq, wk, wv], axis=1)                              # [H, 3H]
        wo_full = jnp.concatenate([p["wo"][h] for h in range(num_heads)], axis=0)  # [H, H]
        wmat = jnp.concatenate(
            [wqkv, wo_full, p["w_ff1"], p["w_er"], p["w_ec"], p["w_ee"], p["we_bias"].T],
            axis=1)                                                               # [H, 11H+nh]
        wmats.append(wmat)
        wff2s.append(p["w_ff2"])

        def row(vec):
            v = jnp.ravel(vec).astype(jnp.float32)
            return jnp.pad(v, (0, fh - v.shape[0]))

        bqkv = jnp.concatenate(
            [jnp.ravel(p["bq"]), jnp.ravel(p["bk"]), jnp.ravel(p["bv"])])          # [3H]
        rows = [None] * _N_BIAS_ROWS
        rows[_R_BQKV] = bqkv
        rows[_R_BO] = p["bo"]
        rows[_R_BFF1] = p["b_ff1"]
        rows[_R_BFF2] = p["b_ff2"]
        rows[_R_LN1G], rows[_R_LN1B] = p["ln1_g"], p["ln1_b"]
        rows[_R_LN2G], rows[_R_LN2B] = p["ln2_g"], p["ln2_b"]
        rows[_R_BE] = p["b_e"]
        rows[_R_LNEG], rows[_R_LNEB] = p["lne_g"], p["lne_b"]
        rows[_R_BEB] = p["be_bias"]
        biases.append(jnp.stack([row(r) for r in rows], axis=0))                  # [12, 4H]
    return (jnp.stack(wmats).astype(jnp.float32),
            jnp.stack(wff2s).astype(jnp.float32),
            jnp.stack(biases).astype(jnp.float32))


# ======================================================================================
# Wrapper: single pallas_call for the whole stack + batch.
# ======================================================================================
def graph_transformer_forward(n, e, mask, layer_params, *, num_heads, no_edge_update=False):
    B, N, H = n.shape
    L = len(layer_params)
    e_flat = e.reshape(B, N * N, H)     # flat pairwise view; no in-kernel load reshape
    wmat, wff2, bias = pack_layer_params(layer_params, H, num_heads)

    kernel = functools.partial(gt_fused_kernel, num_layers=L, num_heads=num_heads,
                               no_edge_update=no_edge_update)
    fn = pl.pallas_call(
        kernel,
        grid=(B,),
        in_specs=[
            pl.BlockSpec((1, N, H), lambda b: (b, 0, 0)),
            pl.BlockSpec((1, N * N, H), lambda b: (b, 0, 0)),
            pl.BlockSpec((1, 1, N), lambda b: (b, 0, 0)),
            pl.BlockSpec(wmat.shape, lambda b: (0, 0, 0)),   # constant -> fetched once
            pl.BlockSpec(wff2.shape, lambda b: (0, 0, 0)),
            pl.BlockSpec(bias.shape, lambda b: (0, 0, 0)),
        ],
        out_specs=pl.BlockSpec((1, N, H), lambda b: (b, 0, 0)),
        out_shape=jax.ShapeDtypeStruct((B, N, H), jnp.float32),
        compiler_params=pltpu.CompilerParams(dimension_semantics=("parallel",)),
    )
    return fn(n, e_flat, mask, wmat, wff2, bias)   # module returns n_tensors only


# ======================================================================================
# Parameter init (same synthetic parameterization as before) and preprocessing glue.
# ======================================================================================
def init_layer_params(key, hidden, num_heads):
    dh = hidden // num_heads
    ks = iter(jax.random.split(key, 16))

    def rnd(shape, scale=0.1):
        return (jax.random.normal(next(ks), shape) * scale).astype(jnp.float32)

    return {
        "wq": rnd((num_heads, hidden, dh)), "bq": jnp.zeros((num_heads, dh), jnp.float32),
        "wk": rnd((num_heads, hidden, dh)), "bk": jnp.zeros((num_heads, dh), jnp.float32),
        "wv": rnd((num_heads, hidden, dh)), "bv": jnp.zeros((num_heads, dh), jnp.float32),
        "wo": rnd((num_heads, dh, hidden)), "bo": jnp.zeros((1, hidden), jnp.float32),
        "we_bias": rnd((num_heads, hidden)), "be_bias": jnp.zeros((num_heads,), jnp.float32),
        "ln1_g": jnp.ones((1, hidden), jnp.float32), "ln1_b": jnp.zeros((1, hidden), jnp.float32),
        "w_ff1": rnd((hidden, 4 * hidden)), "b_ff1": jnp.zeros((1, 4 * hidden), jnp.float32),
        "w_ff2": rnd((4 * hidden, hidden)), "b_ff2": jnp.zeros((1, hidden), jnp.float32),
        "ln2_g": jnp.ones((1, hidden), jnp.float32), "ln2_b": jnp.zeros((1, hidden), jnp.float32),
        "w_er": rnd((hidden, hidden)), "w_ec": rnd((hidden, hidden)),
        "w_ee": rnd((hidden, hidden)), "b_e": jnp.zeros((1, hidden), jnp.float32),
        "lne_g": jnp.ones((1, hidden), jnp.float32), "lne_b": jnp.zeros((1, hidden), jnp.float32),
    }


def build_inputs(key):
    """Plain-JAX glue reproducing the embedding + dense-collate preprocessing."""
    hidden = HIDDEN
    n_num = [5, 3]                      # nodes per graph (data.num_graphs == 2)
    B = len(n_num)
    total = sum(n_num)
    offsets = np.concatenate([[0], np.cumsum(n_num)[:-1]]).tolist()
    n_pad = int(np.ceil(max(n_num) / 8) * 8)   # collate pad_to_multiple=8 -> 8

    keys = iter(jax.random.split(key, 64))

    atom_tables = {name: jax.random.normal(next(keys), (ATOM_VOCAB, hidden)) * 0.1
                   for name in ATOM_NAMES}
    bond_tables = {name: jax.random.normal(next(keys), (BOND_VOCAB, hidden)) * 0.1
                   for name in BOND_NAMES}
    mass_centers = jnp.linspace(0.0, 20.0, 16)
    mass_gamma = 0.5
    w_mass = jax.random.normal(next(keys), (16, hidden)) * 0.1
    len_centers = jnp.linspace(0.0, 5.0, 20)
    len_gamma = 10.0
    w_len = jax.random.normal(next(keys), (20, hidden)) * 0.1

    atom_feats = {name: jax.random.randint(next(keys), (total,), 0, ATOM_VOCAB)
                  for name in ATOM_NAMES}
    mass = jax.random.uniform(next(keys), (total,), minval=1.0, maxval=20.0)
    pos = jax.random.normal(next(keys), (total, 3))
    edge_list = [(0, 1), (1, 0), (1, 2), (2, 1), (2, 3), (3, 2), (3, 4), (4, 3),
                 (5, 6), (6, 5), (6, 7), (7, 6)]
    E = len(edge_list)
    bond_feats = {name: jax.random.randint(next(keys), (E,), 0, BOND_VOCAB)
                  for name in BOND_NAMES}

    n_tensors = jnp.zeros((total, hidden), jnp.float32)
    for name in ATOM_NAMES:
        n_tensors = n_tensors + atom_tables[name][atom_feats[name]]
    mass_rbf = jnp.exp(-mass_gamma * (mass[:, None] - mass_centers[None, :]) ** 2)
    n_tensors = n_tensors + mass_rbf @ w_mass

    e_emb = jnp.zeros((E, hidden), jnp.float32)
    for name in BOND_NAMES:
        e_emb = e_emb + bond_tables[name][bond_feats[name]]

    n_dense = jnp.zeros((B, n_pad, hidden), jnp.float32)
    e_dense = jnp.zeros((B, n_pad, n_pad, hidden), jnp.float32)
    mask = jnp.zeros((B, 1, n_pad), jnp.float32)
    for b in range(B):
        nb = n_num[b]
        off = offsets[b]
        n_dense = n_dense.at[b, :nb].set(n_tensors[off:off + nb])
        p_b = pos[off:off + nb]
        d = jnp.sqrt(jnp.sum((p_b[:, None, :] - p_b[None, :, :]) ** 2, axis=-1) + 1e-12)
        d_rbf = jnp.exp(-len_gamma * (d[..., None] - len_centers) ** 2)
        e_blk = jnp.einsum('ijk,kh->ijh', d_rbf, w_len)
        e_dense = e_dense.at[b, :nb, :nb].set(e_blk)
        mask = mask.at[b, 0, :nb].set(1.0)
    for idx, (i, j) in enumerate(edge_list):
        b = 0 if i < n_num[0] else 1
        off = offsets[b]
        e_dense = e_dense.at[b, i - off, j - off].add(e_emb[idx])

    return n_dense, e_dense, mask


if __name__ == "__main__":
    key = jax.random.PRNGKey(0)
    k_data, k_params = jax.random.split(key)
    n, e, mask = build_inputs(k_data)
    layer_params = [init_layer_params(k, HIDDEN, NUM_HEADS)
                    for k in jax.random.split(k_params, NUM_LAYERS)]
    out = graph_transformer_forward(n, e, mask, layer_params,
                                    num_heads=NUM_HEADS, no_edge_update=False)
    out = jax.block_until_ready(out)
    assert out.shape == (2, 8, HIDDEN), out.shape
    assert bool(jnp.all(jnp.isfinite(out)))
    print("KERNEL_OK")
</pallas_src>

<mosaic_0001>
module attributes {stable_mosaic.version = 11 : i64} {
  func.func @gt_fused_kernel(%arg0: i32, %arg1: memref<1x8x32xf32, #tpu.memory_space<vmem>>, %arg2: memref<1x64x32xf32, #tpu.memory_space<vmem>>, %arg3: memref<1x1x8xf32, #tpu.memory_space<vmem>>, %arg4: memref<2x32x356xf32, #tpu.memory_space<vmem>>, %arg5: memref<2x128x32xf32, #tpu.memory_space<vmem>>, %arg6: memref<2x12x128xf32, #tpu.memory_space<vmem>>, %arg7: memref<1x8x32xf32, #tpu.memory_space<vmem>>) attributes {dimension_semantics = [#tpu.dimension_semantics<parallel>], iteration_bounds = array<i64: 2>, scalar_prefetch = 0 : i64, scratch_operands = 0 : i64, tpu.core_type = #tpu.core_type<tc>, window_params = [{transform_indices = @transform_0, window_bounds = array<i64: 1, 8, 32>}, {transform_indices = @transform_1, window_bounds = array<i64: 1, 64, 32>}, {transform_indices = @transform_2, window_bounds = array<i64: 1, 1, 8>}, {pipeline_mode = #tpu.pipeline_mode<synchronous>, transform_indices = @transform_3, window_bounds = array<i64: 2, 32, 356>}, {pipeline_mode = #tpu.pipeline_mode<synchronous>, transform_indices = @transform_4, window_bounds = array<i64: 2, 128, 32>}, {pipeline_mode = #tpu.pipeline_mode<synchronous>, transform_indices = @transform_5, window_bounds = array<i64: 2, 12, 128>}, {transform_indices = @transform_6, window_bounds = array<i64: 1, 8, 32>}]} {
    %c0 = arith.constant 0 : index
    %c0_0 = arith.constant 0 : index
    %c0_1 = arith.constant 0 : index
    %0 = vector.load %arg1[%c0, %c0_0, %c0_1] : memref<1x8x32xf32, #tpu.memory_space<vmem>>, vector<1x8x32xf32>
    %1 = vector.shape_cast %0 : vector<1x8x32xf32> to vector<8x32xf32>
    %c0_2 = arith.constant 0 : index
    %c0_3 = arith.constant 0 : index
    %c0_4 = arith.constant 0 : index
    %2 = vector.load %arg2[%c0_2, %c0_3, %c0_4] : memref<1x64x32xf32, #tpu.memory_space<vmem>>, vector<1x64x32xf32>
    %3 = vector.shape_cast %2 : vector<1x64x32xf32> to vector<64x32xf32>
    %c0_5 = arith.constant 0 : index
    %c0_6 = arith.constant 0 : index
    %c0_7 = arith.constant 0 : index
    %4 = vector.load %arg3[%c0_5, %c0_6, %c0_7] : memref<1x1x8xf32, #tpu.memory_space<vmem>>, vector<1x1x8xf32>
    %5 = vector.shape_cast %4 : vector<1x1x8xf32> to vector<1x8xf32>
    %cst = arith.constant 1.000000e+00 : f32
    %6 = vector.broadcast %cst : f32 to vector<1x8xf32>
    %7 = arith.subf %6, %5 : vector<1x8xf32>
    %cst_8 = arith.constant -1.000000e+09 : f32
    %8 = vector.broadcast %cst_8 : f32 to vector<1x8xf32>
    %9 = arith.mulf %7, %8 : vector<1x8xf32>
    %c0_9 = arith.constant 0 : index
    %c0_10 = arith.constant 0 : index
    %c0_11 = arith.constant 0 : index
    %10 = vector.load %arg4[%c0_9, %c0_10, %c0_11] : memref<2x32x356xf32, #tpu.memory_space<vmem>>, vector<1x32x356xf32>
    %11 = vector.shape_cast %10 : vector<1x32x356xf32> to vector<32x356xf32>
    %c0_12 = arith.constant 0 : index
    %c0_13 = arith.constant 0 : index
    %c0_14 = arith.constant 0 : index
    %12 = vector.load %arg5[%c0_12, %c0_13, %c0_14] : memref<2x128x32xf32, #tpu.memory_space<vmem>>, vector<1x128x32xf32>
    %13 = vector.shape_cast %12 : vector<1x128x32xf32> to vector<128x32xf32>
    %c0_15 = arith.constant 0 : index
    %c0_16 = arith.constant 0 : index
    %c0_17 = arith.constant 0 : index
    %14 = vector.load %arg6[%c0_15, %c0_16, %c0_17] : memref<2x12x128xf32, #tpu.memory_space<vmem>>, vector<1x12x128xf32>
    %15 = vector.shape_cast %14 : vector<1x12x128xf32> to vector<12x128xf32>
    %16 = vector.extract_strided_slice %11 {offsets = [0, 0], sizes = [32, 96], strides = [1, 1]} : vector<32x356xf32> to vector<32x96xf32>
    %17 = vector.extract_strided_slice %11 {offsets = [0, 96], sizes = [32, 32], strides = [1, 1]} : vector<32x356xf32> to vector<32x32xf32>
    %18 = vector.extract_strided_slice %11 {offsets = [0, 128], sizes = [32, 128], strides = [1, 1]} : vector<32x356xf32> to vector<32x128xf32>
    %19 = vector.extract_strided_slice %11 {offsets = [0, 256], sizes = [32, 32], strides = [1, 1]} : vector<32x356xf32> to vector<32x32xf32>
    %20 = vector.extract_strided_slice %11 {offsets = [0, 288], sizes = [32, 32], strides = [1, 1]} : vector<32x356xf32> to vector<32x32xf32>
    %21 = vector.extract_strided_slice %11 {offsets = [0, 320], sizes = [32, 32], strides = [1, 1]} : vector<32x356xf32> to vector<32x32xf32>
    %22 = vector.extract_strided_slice %11 {offsets = [0, 352], sizes = [32, 4], strides = [1, 1]} : vector<32x356xf32> to vector<32x4xf32>
    %23 = vector.extract_strided_slice %15 {offsets = [0, 0], sizes = [1, 96], strides = [1, 1]} : vector<12x128xf32> to vector<1x96xf32>
    %24 = vector.extract_strided_slice %15 {offsets = [1, 0], sizes = [1, 32], strides = [1, 1]} : vector<12x128xf32> to vector<1x32xf32>
    %25 = vector.extract_strided_slice %15 {offsets = [2, 0], sizes = [1, 128], strides = [1, 1]} : vector<12x128xf32> to vector<1x128xf32>
    %26 = vector.extract_strided_slice %15 {offsets = [3, 0], sizes = [1, 32], strides = [1, 1]} : vector<12x128xf32> to vector<1x32xf32>
    %27 = vector.extract_strided_slice %15 {offsets = [4, 0], sizes = [1, 32], strides = [1, 1]} : vector<12x128xf32> to vector<1x32xf32>
    %28 = vector.extract_strided_slice %15 {offsets = [5, 0], sizes = [1, 32], strides = [1, 1]} : vector<12x128xf32> to vector<1x32xf32>
    %29 = vector.extract_strided_slice %15 {offsets = [6, 0], sizes = [1, 32], strides = [1, 1]} : vector<12x128xf32> to vector<1x32xf32>
    %30 = vector.extract_strided_slice %15 {offsets = [7, 0], sizes = [1, 32], strides = [1, 1]} : vector<12x128xf32> to vector<1x32xf32>
    %31 = vector.extract_strided_slice %15 {offsets = [8, 0], sizes = [1, 32], strides = [1, 1]} : vector<12x128xf32> to vector<1x32xf32>
    %32 = vector.extract_strided_slice %15 {offsets = [9, 0], sizes = [1, 32], strides = [1, 1]} : vector<12x128xf32> to vector<1x32xf32>
    %33 = vector.extract_strided_slice %15 {offsets = [10, 0], sizes = [1, 32], strides = [1, 1]} : vector<12x128xf32> to vector<1x32xf32>
    %34 = vector.extract_strided_slice %15 {offsets = [11, 0], sizes = [1, 4], strides = [1, 1]} : vector<12x128xf32> to vector<1x4xf32>
    %cst_18 = arith.constant dense<0.000000e+00> : vector<8x96xf32>
    %35 = tpu.matmul %1, %16, %cst_18 {dimension_numbers = #tpu.dot_dimension_numbers<[1], [0], [0], [1], [0, 0, 1, 1], [], []>} : vector<8x32xf32>, vector<32x96xf32>, vector<8x96xf32> -> vector<8x96xf32>
    %36 = vector.broadcast %23 : vector<1x96xf32> to vector<8x96xf32>
    %37 = arith.addf %35, %36 : vector<8x96xf32>
    %38 = vector.extract_strided_slice %37 {offsets = [0, 0], sizes = [8, 32], strides = [1, 1]} : vector<8x96xf32> to vector<8x32xf32>
    %39 = vector.extract_strided_slice %37 {offsets = [0, 32], sizes = [8, 32], strides = [1, 1]} : vector<8x96xf32> to vector<8x32xf32>
    %40 = vector.extract_strided_slice %37 {offsets = [0, 64], sizes = [8, 32], strides = [1, 1]} : vector<8x96xf32> to vector<8x32xf32>
    %cst_19 = arith.constant dense<0.000000e+00> : vector<64x4xf32>
    %41 = tpu.matmul %3, %22, %cst_19 {dimension_numbers = #tpu.dot_dimension_numbers<[1], [0], [0], [1], [0, 0, 1, 1], [], []>} : vector<64x32xf32>, vector<32x4xf32>, vector<64x4xf32> -> vector<64x4xf32>
    %42 = vector.broadcast %34 : vector<1x4xf32> to vector<64x4xf32>
    %43 = arith.addf %41, %42 : vector<64x4xf32>
    %44 = vector.shape_cast %43 : vector<64x4xf32> to vector<8x8x4xf32>
    %45 = vector.extract_strided_slice %38 {offsets = [0, 0], sizes = [8, 8], strides = [1, 1]} : vector<8x32xf32> to vector<8x8xf32>
    %46 = vector.extract_strided_slice %39 {offsets = [0, 0], sizes = [8, 8], strides = [1, 1]} : vector<8x32xf32> to vector<8x8xf32>
    %47 = vector.extract_strided_slice %40 {offsets = [0, 0], sizes = [8, 8], strides = [1, 1]} : vector<8x32xf32> to vector<8x8xf32>
    %48 = tpu.transpose %46, [1, 0] : vector<8x8xf32> -> vector<8x8xf32>
    %cst_20 = arith.constant dense<0.000000e+00> : vector<8x8xf32>
    %49 = tpu.matmul %45, %48, %cst_20 {dimension_numbers = #tpu.dot_dimension_numbers<[1], [0], [0], [1], [0, 0, 1, 1], [], []>} : vector<8x8xf32>, vector<8x8xf32>, vector<8x8xf32> -> vector<8x8xf32>
    %cst_21 = arith.constant 0.353553385 : f32
    %50 = vector.broadcast %cst_21 : f32 to vector<8x8xf32>
    %51 = arith.mulf %49, %50 : vector<8x8xf32>
    %52 = vector.extract_strided_slice %44 {offsets = [0, 0, 0], sizes = [8, 8, 1], strides = [1, 1, 1]} : vector<8x8x4xf32> to vector<8x8x1xf32>
    %53 = vector.shape_cast %52 : vector<8x8x1xf32> to vector<8x8xf32>
    %54 = arith.addf %51, %53 : vector<8x8xf32>
    %55 = vector.broadcast %9 : vector<1x8xf32> to vector<8x8xf32>
    %56 = arith.addf %54, %55 : vector<8x8xf32>
    %cst_22 = arith.constant dense<0xFF800000> : vector<8xf32>
    %57 = vector.multi_reduction <maximumf>, %56, %cst_22 [1] : vector<8x8xf32> to vector<8xf32>
    %58 = vector.shape_cast %57 : vector<8xf32> to vector<8x1xf32>
    %59 = vector.broadcast %58 : vector<8x1xf32> to vector<8x8xf32>
    %60 = arith.subf %56, %59 : vector<8x8xf32>
    %61 = math.exp %60 : vector<8x8xf32>
    %cst_23 = arith.constant dense<0.000000e+00> : vector<8xf32>
    %62 = vector.multi_reduction <add>, %61, %cst_23 [1] : vector<8x8xf32> to vector<8xf32>
    %63 = vector.shape_cast %62 : vector<8xf32> to vector<8x1xf32>
    %64 = tpu.reciprocal %63 {approx = true} : vector<8x1xf32> -> vector<8x1xf32>
    %65 = vector.broadcast %64 : vector<8x1xf32> to vector<8x8xf32>
    %66 = arith.mulf %61, %65 : vector<8x8xf32>
    %cst_24 = arith.constant dense<0.000000e+00> : vector<8x8xf32>
    %67 = tpu.matmul %66, %47, %cst_24 {dimension_numbers = #tpu.dot_dimension_numbers<[1], [0], [0], [1], [0, 0, 1, 1], [], []>} : vector<8x8xf32>, vector<8x8xf32>, vector<8x8xf32> -> vector<8x8xf32>
    %68 = vector.extract_strided_slice %38 {offsets = [0, 8], sizes = [8, 8], strides = [1, 1]} : vector<8x32xf32> to vector<8x8xf32>
    %69 = vector.extract_strided_slice %39 {offsets = [0, 8], sizes = [8, 8], strides = [1, 1]} : vector<8x32xf32> to vector<8x8xf32>
    %70 = vector.extract_strided_slice %40 {offsets = [0, 8], sizes = [8, 8], strides = [1, 1]} : vector<8x32xf32> to vector<8x8xf32>
    %71 = tpu.transpose %69, [1, 0] : vector<8x8xf32> -> vector<8x8xf32>
    %cst_25 = arith.constant dense<0.000000e+00> : vector<8x8xf32>
    %72 = tpu.matmul %68, %71, %cst_25 {dimension_numbers = #tpu.dot_dimension_numbers<[1], [0], [0], [1], [0, 0, 1, 1], [], []>} : vector<8x8xf32>, vector<8x8xf32>, vector<8x8xf32> -> vector<8x8xf32>
    %cst_26 = arith.constant 0.353553385 : f32
    %73 = vector.broadcast %cst_26 : f32 to vector<8x8xf32>
    %74 = arith.mulf %72, %73 : vector<8x8xf32>
    %75 = vector.extract_strided_slice %44 {offsets = [0, 0, 1], sizes = [8, 8, 1], strides = [1, 1, 1]} : vector<8x8x4xf32> to vector<8x8x1xf32>
    %76 = vector.shape_cast %75 : vector<8x8x1xf32> to vector<8x8xf32>
    %77 = arith.addf %74, %76 : vector<8x8xf32>
    %78 = vector.broadcast %9 : vector<1x8xf32> to vector<8x8xf32>
    %79 = arith.addf %77, %78 : vector<8x8xf32>
    %cst_27 = arith.constant dense<0xFF800000> : vector<8xf32>
    %80 = vector.multi_reduction <maximumf>, %79, %cst_27 [1] : vector<8x8xf32> to vector<8xf32>
    %81 = vector.shape_cast %80 : vector<8xf32> to vector<8x1xf32>
    %82 = vector.broadcast %81 : vector<8x1xf32> to vector<8x8xf32>
    %83 = arith.subf %79, %82 : vector<8x8xf32>
    %84 = math.exp %83 : vector<8x8xf32>
    %cst_28 = arith.constant dense<0.000000e+00> : vector<8xf32>
    %85 = vector.multi_reduction <add>, %84, %cst_28 [1] : vector<8x8xf32> to vector<8xf32>
    %86 = vector.shape_cast %85 : vector<8xf32> to vector<8x1xf32>
    %87 = tpu.reciprocal %86 {approx = true} : vector<8x1xf32> -> vector<8x1xf32>
    %88 = vector.broadcast %87 : vector<8x1xf32> to vector<8x8xf32>
    %89 = arith.mulf %84, %88 : vector<8x8xf32>
    %cst_29 = arith.constant dense<0.000000e+00> : vector<8x8xf32>
    %90 = tpu.matmul %89, %70, %cst_29 {dimension_numbers = #tpu.dot_dimension_numbers<[1], [0], [0], [1], [0, 0, 1, 1], [], []>} : vector<8x8xf32>, vector<8x8xf32>, vector<8x8xf32> -> vector<8x8xf32>
    %91 = vector.extract_strided_slice %38 {offsets = [0, 16], sizes = [8, 8], strides = [1, 1]} : vector<8x32xf32> to vector<8x8xf32>
    %92 = vector.extract_strided_slice %39 {offsets = [0, 16], sizes = [8, 8], strides = [1, 1]} : vector<8x32xf32> to vector<8x8xf32>
    %93 = vector.extract_strided_slice %40 {offsets = [0, 16], sizes = [8, 8], strides = [1, 1]} : vector<8x32xf32> to vector<8x8xf32>
    %94 = tpu.transpose %92, [1, 0] : vector<8x8xf32> -> vector<8x8xf32>
    %cst_30 = arith.constant dense<0.000000e+00> : vector<8x8xf32>
    %95 = tpu.matmul %91, %94, %cst_30 {dimension_numbers = #tpu.dot_dimension_numbers<[1], [0], [0], [1], [0, 0, 1, 1], [], []>} : vector<8x8xf32>, vector<8x8xf32>, vector<8x8xf32> -> vector<8x8xf32>
    %cst_31 = arith.constant 0.353553385 : f32
    %96 = vector.broadcast %cst_31 : f32 to vector<8x8xf32>
    %97 = arith.mulf %95, %96 : vector<8x8xf32>
    %98 = vector.extract_strided_slice %44 {offsets = [0, 0, 2], sizes = [8, 8, 1], strides = [1, 1, 1]} : vector<8x8x4xf32> to vector<8x8x1xf32>
    %99 = vector.shape_cast %98 : vector<8x8x1xf32> to vector<8x8xf32>
    %100 = arith.addf %97, %99 : vector<8x8xf32>
    %101 = vector.broadcast %9 : vector<1x8xf32> to vector<8x8xf32>
    %102 = arith.addf %100, %101 : vector<8x8xf32>
    %cst_32 = arith.constant dense<0xFF800000> : vector<8xf32>
    %103 = vector.multi_reduction <maximumf>, %102, %cst_32 [1] : vector<8x8xf32> to vector<8xf32>
    %104 = vector.shape_cast %103 : vector<8xf32> to vector<8x1xf32>
    %105 = vector.broadcast %104 : vector<8x1xf32> to vector<8x8xf32>
    %106 = arith.subf %102, %105 : vector<8x8xf32>
    %107 = math.exp %106 : vector<8x8xf32>
    %cst_33 = arith.constant dense<0.000000e+00> : vector<8xf32>
    %108 = vector.multi_reduction <add>, %107, %cst_33 [1] : vector<8x8xf32> to vector<8xf32>
    %109 = vector.shape_cast %108 : vector<8xf32> to vector<8x1xf32>
    %110 = tpu.reciprocal %109 {approx = true} : vector<8x1xf32> -> vector<8x1xf32>
    %111 = vector.broadcast %110 : vector<8x1xf32> to vector<8x8xf32>
    %112 = arith.mulf %107, %111 : vector<8x8xf32>
    %cst_34 = arith.constant dense<0.000000e+00> : vector<8x8xf32>
    %113 = tpu.matmul %112, %93, %cst_34 {dimension_numbers = #tpu.dot_dimension_numbers<[1], [0], [0], [1], [0, 0, 1, 1], [], []>} : vector<8x8xf32>, vector<8x8xf32>, vector<8x8xf32> -> vector<8x8xf32>
    %114 = vector.extract_strided_slice %38 {offsets = [0, 24], sizes = [8, 8], strides = [1, 1]} : vector<8x32xf32> to vector<8x8xf32>
    %115 = vector.extract_strided_slice %39 {offsets = [0, 24], sizes = [8, 8], strides = [1, 1]} : vector<8x32xf32> to vector<8x8xf32>
    %116 = vector.extract_strided_slice %40 {offsets = [0, 24], sizes = [8, 8], strides = [1, 1]} : vector<8x32xf32> to vector<8x8xf32>
    %117 = tpu.transpose %115, [1, 0] : vector<8x8xf32> -> vector<8x8xf32>
    %cst_35 = arith.constant dense<0.000000e+00> : vector<8x8xf32>
    %118 = tpu.matmul %114, %117, %cst_35 {dimension_numbers = #tpu.dot_dimension_numbers<[1], [0], [0], [1], [0, 0, 1, 1], [], []>} : vector<8x8xf32>, vector<8x8xf32>, vector<8x8xf32> -> vector<8x8xf32>
    %cst_36 = arith.constant 0.353553385 : f32
    %119 = vector.broadcast %cst_36 : f32 to vector<8x8xf32>
    %120 = arith.mulf %118, %119 : vector<8x8xf32>
    %121 = vector.extract_strided_slice %44 {offsets = [0, 0, 3], sizes = [8, 8, 1], strides = [1, 1, 1]} : vector<8x8x4xf32> to vector<8x8x1xf32>
    %122 = vector.shape_cast %121 : vector<8x8x1xf32> to vector<8x8xf32>
    %123 = arith.addf %120, %122 : vector<8x8xf32>
    %124 = vector.broadcast %9 : vector<1x8xf32> to vector<8x8xf32>
    %125 = arith.addf %123, %124 : vector<8x8xf32>
    %cst_37 = arith.constant dense<0xFF800000> : vector<8xf32>
    %126 = vector.multi_reduction <maximumf>, %125, %cst_37 [1] : vector<8x8xf32> to vector<8xf32>
    %127 = vector.shape_cast %126 : vector<8xf32> to vector<8x1xf32>
    %128 = vector.broadcast %127 : vector<8x1xf32> to vector<8x8xf32>
    %129 = arith.subf %125, %128 : vector<8x8xf32>
    %130 = math.exp %129 : vector<8x8xf32>
    %cst_38 = arith.constant dense<0.000000e+00> : vector<8xf32>
    %131 = vector.multi_reduction <add>, %130, %cst_38 [1] : vector<8x8xf32> to vector<8xf32>
    %132 = vector.shape_cast %131 : vector<8xf32> to vector<8x1xf32>
    %133 = tpu.reciprocal %132 {approx = true} : vector<8x1xf32> -> vector<8x1xf32>
    %134 = vector.broadcast %133 : vector<8x1xf32> to vector<8x8xf32>
    %135 = arith.mulf %130, %134 : vector<8x8xf32>
    %cst_39 = arith.constant dense<0.000000e+00> : vector<8x8xf32>
    %136 = tpu.matmul %135, %116, %cst_39 {dimension_numbers = #tpu.dot_dimension_numbers<[1], [0], [0], [1], [0, 0, 1, 1], [], []>} : vector<8x8xf32>, vector<8x8xf32>, vector<8x8xf32> -> vector<8x8xf32>
    %137 = tpu.concatenate %67, %90, %113, %136 in 1 : vector<8x8xf32>, vector<8x8xf32>, vector<8x8xf32>, vector<8x8xf32> -> vector<8x32xf32>
    %cst_40 = arith.constant dense<0.000000e+00> : vector<8x32xf32>
    %138 = tpu.matmul %137, %17, %cst_40 {dimension_numbers = #tpu.dot_dimension_numbers<[1], [0], [0], [1], [0, 0, 1, 1], [], []>} : vector<8x32xf32>, vector<32x32xf32>, vector<8x32xf32> -> vector<8x32xf32>
    %139 = vector.broadcast %24 : vector<1x32xf32> to vector<8x32xf32>
    %140 = arith.addf %138, %139 : vector<8x32xf32>
    %141 = arith.addf %1, %140 : vector<8x32xf32>
    %cst_41 = arith.constant dense<0.000000e+00> : vector<8xf32>
    %142 = vector.multi_reduction <add>, %141, %cst_41 [1] : vector<8x32xf32> to vector<8xf32>
    %143 = vector.shape_cast %142 : vector<8xf32> to vector<8x1xf32>
    %cst_42 = arith.constant 3.200000e+01 : f32
    %144 = vector.broadcast %cst_42 : f32 to vector<8x1xf32>
    %145 = arith.divf %143, %144 : vector<8x1xf32>
    %146 = vector.broadcast %145 : vector<8x1xf32> to vector<8x32xf32>
    %147 = arith.subf %141, %146 : vector<8x32xf32>
    %148 = arith.mulf %147, %147 : vector<8x32xf32>
    %cst_43 = arith.constant dense<0.000000e+00> : vector<8xf32>
    %149 = vector.multi_reduction <add>, %148, %cst_43 [1] : vector<8x32xf32> to vector<8xf32>
    %150 = vector.shape_cast %149 : vector<8xf32> to vector<8x1xf32>
    %cst_44 = arith.constant 3.200000e+01 : f32
    %151 = vector.broadcast %cst_44 : f32 to vector<8x1xf32>
    %152 = arith.divf %150, %151 : vector<8x1xf32>
    %153 = vector.broadcast %145 : vector<8x1xf32> to vector<8x32xf32>
    %154 = arith.subf %141, %153 : vector<8x32xf32>
    %cst_45 = arith.constant 9.99999974E-6 : f32
    %155 = vector.broadcast %cst_45 : f32 to vector<8x1xf32>
    %156 = arith.addf %152, %155 : vector<8x1xf32>
    %157 = math.rsqrt %156 : vector<8x1xf32>
    %158 = vector.broadcast %157 : vector<8x1xf32> to vector<8x32xf32>
    %159 = arith.mulf %154, %158 : vector<8x32xf32>
    %160 = vector.broadcast %27 : vector<1x32xf32> to vector<8x32xf32>
    %161 = arith.mulf %159, %160 : vector<8x32xf32>
    %162 = vector.broadcast %28 : vector<1x32xf32> to vector<8x32xf32>
    %163 = arith.addf %161, %162 : vector<8x32xf32>
    %cst_46 = arith.constant dense<0.000000e+00> : vector<8x128xf32>
    %164 = tpu.matmul %163, %18, %cst_46 {dimension_numbers = #tpu.dot_dimension_numbers<[1], [0], [0], [1], [0, 0, 1, 1], [], []>} : vector<8x32xf32>, vector<32x128xf32>, vector<8x128xf32> -> vector<8x128xf32>
    %165 = vector.broadcast %25 : vector<1x128xf32> to vector<8x128xf32>
    %166 = arith.addf %164, %165 : vector<8x128xf32>
    %cst_47 = arith.constant 0.000000e+00 : f32
    %167 = vector.broadcast %cst_47 : f32 to vector<8x128xf32>
    %168 = arith.maximumf %166, %167 : vector<8x128xf32>
    %cst_48 = arith.constant dense<0.000000e+00> : vector<8x32xf32>
    %169 = tpu.matmul %168, %13, %cst_48 {dimension_numbers = #tpu.dot_dimension_numbers<[1], [0], [0], [1], [0, 0, 1, 1], [], []>} : vector<8x128xf32>, vector<128x32xf32>, vector<8x32xf32> -> vector<8x32xf32>
    %170 = vector.broadcast %26 : vector<1x32xf32> to vector<8x32xf32>
    %171 = arith.addf %169, %170 : vector<8x32xf32>
    %172 = arith.addf %163, %171 : vector<8x32xf32>
    %cst_49 = arith.constant dense<0.000000e+00> : vector<8xf32>
    %173 = vector.multi_reduction <add>, %172, %cst_49 [1] : vector<8x32xf32> to vector<8xf32>
    %174 = vector.shape_cast %173 : vector<8xf32> to vector<8x1xf32>
    %cst_50 = arith.constant 3.200000e+01 : f32
    %175 = vector.broadcast %cst_50 : f32 to vector<8x1xf32>
    %176 = arith.divf %174, %175 : vector<8x1xf32>
    %177 = vector.broadcast %176 : vector<8x1xf32> to vector<8x32xf32>
    %178 = arith.subf %172, %177 : vector<8x32xf32>
    %179 = arith.mulf %178, %178 : vector<8x32xf32>
    %cst_51 = arith.constant dense<0.000000e+00> : vector<8xf32>
    %180 = vector.multi_reduction <add>, %179, %cst_51 [1] : vector<8x32xf32> to vector<8xf32>
    %181 = vector.shape_cast %180 : vector<8xf32> to vector<8x1xf32>
    %cst_52 = arith.constant 3.200000e+01 : f32
    %182 = vector.broadcast %cst_52 : f32 to vector<8x1xf32>
    %183 = arith.divf %181, %182 : vector<8x1xf32>
    %184 = vector.broadcast %176 : vector<8x1xf32> to vector<8x32xf32>
    %185 = arith.subf %172, %184 : vector<8x32xf32>
    %cst_53 = arith.constant 9.99999974E-6 : f32
    %186 = vector.broadcast %cst_53 : f32 to vector<8x1xf32>
    %187 = arith.addf %183, %186 : vector<8x1xf32>
    %188 = math.rsqrt %187 : vector<8x1xf32>
    %189 = vector.broadcast %188 : vector<8x1xf32> to vector<8x32xf32>
    %190 = arith.mulf %185, %189 : vector<8x32xf32>
    %191 = vector.broadcast %29 : vector<1x32xf32> to vector<8x32xf32>
    %192 = arith.mulf %190, %191 : vector<8x32xf32>
    %193 = vector.broadcast %30 : vector<1x32xf32> to vector<8x32xf32>
    %194 = arith.addf %192, %193 : vector<8x32xf32>
    %cst_54 = arith.constant dense<0.000000e+00> : vector<8x32xf32>
    %195 = tpu.matmul %1, %19, %cst_54 {dimension_numbers = #tpu.dot_dimension_numbers<[1], [0], [0], [1], [0, 0, 1, 1], [], []>} : vector<8x32xf32>, vector<32x32xf32>, vector<8x32xf32> -> vector<8x32xf32>
    %cst_55 = arith.constant dense<0.000000e+00> : vector<8x32xf32>
    %196 = tpu.matmul %1, %20, %cst_55 {dimension_numbers = #tpu.dot_dimension_numbers<[1], [0], [0], [1], [0, 0, 1, 1], [], []>} : vector<8x32xf32>, vector<32x32xf32>, vector<8x32xf32> -> vector<8x32xf32>
    %cst_56 = arith.constant dense<0.000000e+00> : vector<64x32xf32>
    %197 = tpu.matmul %3, %21, %cst_56 {dimension_numbers = #tpu.dot_dimension_numbers<[1], [0], [0], [1], [0, 0, 1, 1], [], []>} : vector<64x32xf32>, vector<32x32xf32>, vector<64x32xf32> -> vector<64x32xf32>
    %198 = vector.shape_cast %195 : vector<8x32xf32> to vector<8x1x32xf32>
    %199 = vector.shape_cast %198 : vector<8x1x32xf32> to vector<8x1x32xf32>
    %200 = vector.broadcast %199 : vector<8x1x32xf32> to vector<8x8x32xf32>
    %201 = vector.shape_cast %200 : vector<8x8x32xf32> to vector<64x32xf32>
    %202 = vector.shape_cast %196 : vector<8x32xf32> to vector<1x8x32xf32>
    %203 = vector.shape_cast %202 : vector<1x8x32xf32> to vector<1x8x32xf32>
    %204 = vector.broadcast %203 : vector<1x8x32xf32> to vector<8x8x32xf32>
    %205 = vector.shape_cast %204 : vector<8x8x32xf32> to vector<64x32xf32>
    %206 = arith.addf %197, %201 : vector<64x32xf32>
    %207 = arith.addf %206, %205 : vector<64x32xf32>
    %208 = vector.broadcast %31 : vector<1x32xf32> to vector<64x32xf32>
    %209 = arith.addf %207, %208 : vector<64x32xf32>
    %210 = arith.addf %3, %209 : vector<64x32xf32>
    %cst_57 = arith.constant dense<0.000000e+00> : vector<64xf32>
    %211 = vector.multi_reduction <add>, %210, %cst_57 [1] : vector<64x32xf32> to vector<64xf32>
    %212 = vector.shape_cast %211 : vector<64xf32> to vector<64x1xf32>
    %cst_58 = arith.constant 3.200000e+01 : f32
    %213 = vector.broadcast %cst_58 : f32 to vector<64x1xf32>
    %214 = arith.divf %212, %213 : vector<64x1xf32>
    %215 = vector.broadcast %214 : vector<64x1xf32> to vector<64x32xf32>
    %216 = arith.subf %210, %215 : vector<64x32xf32>
    %217 = arith.mulf %216, %216 : vector<64x32xf32>
    %cst_59 = arith.constant dense<0.000000e+00> : vector<64xf32>
    %218 = vector.multi_reduction <add>, %217, %cst_59 [1] : vector<64x32xf32> to vector<64xf32>
    %219 = vector.shape_cast %218 : vector<64xf32> to vector<64x1xf32>
    %cst_60 = arith.constant 3.200000e+01 : f32
    %220 = vector.broadcast %cst_60 : f32 to vector<64x1xf32>
    %221 = arith.divf %219, %220 : vector<64x1xf32>
    %222 = vector.broadcast %214 : vector<64x1xf32> to vector<64x32xf32>
    %223 = arith.subf %210, %222 : vector<64x32xf32>
    %cst_61 = arith.constant 9.99999974E-6 : f32
    %224 = vector.broadcast %cst_61 : f32 to vector<64x1xf32>
    %225 = arith.addf %221, %224 : vector<64x1xf32>
    %226 = math.rsqrt %225 : vector<64x1xf32>
    %227 = vector.broadcast %226 : vector<64x1xf32> to vector<64x32xf32>
    %228 = arith.mulf %223, %227 : vector<64x32xf32>
    %229 = vector.broadcast %32 : vector<1x32xf32> to vector<64x32xf32>
    %230 = arith.mulf %228, %229 : vector<64x32xf32>
    %231 = vector.broadcast %33 : vector<1x32xf32> to vector<64x32xf32>
    %232 = arith.addf %230, %231 : vector<64x32xf32>
    %c1 = arith.constant 1 : index
    %c0_62 = arith.constant 0 : index
    %c0_63 = arith.constant 0 : index
    %233 = vector.load %arg4[%c1, %c0_62, %c0_63] : memref<2x32x356xf32, #tpu.memory_space<vmem>>, vector<1x32x356xf32>
    %234 = vector.shape_cast %233 : vector<1x32x356xf32> to vector<32x356xf32>
    %c1_64 = arith.constant 1 : index
    %c0_65 = arith.constant 0 : index
    %c0_66 = arith.constant 0 : index
    %235 = vector.load %arg5[%c1_64, %c0_65, %c0_66] : memref<2x128x32xf32, #tpu.memory_space<vmem>>, vector<1x128x32xf32>
    %236 = vector.shape_cast %235 : vector<1x128x32xf32> to vector<128x32xf32>
    %c1_67 = arith.constant 1 : index
    %c0_68 = arith.constant 0 : index
    %c0_69 = arith.constant 0 : index
    %237 = vector.load %arg6[%c1_67, %c0_68, %c0_69] : memref<2x12x128xf32, #tpu.memory_space<vmem>>, vector<1x12x128xf32>
    %238 = vector.shape_cast %237 : vector<1x12x128xf32> to vector<12x128xf32>
    %239 = vector.extract_strided_slice %234 {offsets = [0, 0], sizes = [32, 96], strides = [1, 1]} : vector<32x356xf32> to vector<32x96xf32>
    %240 = vector.extract_strided_slice %234 {offsets = [0, 96], sizes = [32, 32], strides = [1, 1]} : vector<32x356xf32> to vector<32x32xf32>
    %241 = vector.extract_strided_slice %234 {offsets = [0, 128], sizes = [32, 128], strides = [1, 1]} : vector<32x356xf32> to vector<32x128xf32>
    %242 = vector.extract_strided_slice %234 {offsets = [0, 352], sizes = [32, 4], strides = [1, 1]} : vector<32x356xf32> to vector<32x4xf32>
    %243 = vector.extract_strided_slice %238 {offsets = [0, 0], sizes = [1, 96], strides = [1, 1]} : vector<12x128xf32> to vector<1x96xf32>
    %244 = vector.extract_strided_slice %238 {offsets = [1, 0], sizes = [1, 32], strides = [1, 1]} : vector<12x128xf32> to vector<1x32xf32>
    %245 = vector.extract_strided_slice %238 {offsets = [2, 0], sizes = [1, 128], strides = [1, 1]} : vector<12x128xf32> to vector<1x128xf32>
    %246 = vector.extract_strided_slice %238 {offsets = [3, 0], sizes = [1, 32], strides = [1, 1]} : vector<12x128xf32> to vector<1x32xf32>
    %247 = vector.extract_strided_slice %238 {offsets = [4, 0], sizes = [1, 32], strides = [1, 1]} : vector<12x128xf32> to vector<1x32xf32>
    %248 = vector.extract_strided_slice %238 {offsets = [5, 0], sizes = [1, 32], strides = [1, 1]} : vector<12x128xf32> to vector<1x32xf32>
    %249 = vector.extract_strided_slice %238 {offsets = [6, 0], sizes = [1, 32], strides = [1, 1]} : vector<12x128xf32> to vector<1x32xf32>
    %250 = vector.extract_strided_slice %238 {offsets = [7, 0], sizes = [1, 32], strides = [1, 1]} : vector<12x128xf32> to vector<1x32xf32>
    %251 = vector.extract_strided_slice %238 {offsets = [11, 0], sizes = [1, 4], strides = [1, 1]} : vector<12x128xf32> to vector<1x4xf32>
    %cst_70 = arith.constant dense<0.000000e+00> : vector<8x96xf32>
    %252 = tpu.matmul %194, %239, %cst_70 {dimension_numbers = #tpu.dot_dimension_numbers<[1], [0], [0], [1], [0, 0, 1, 1], [], []>} : vector<8x32xf32>, vector<32x96xf32>, vector<8x96xf32> -> vector<8x96xf32>
    %253 = vector.broadcast %243 : vector<1x96xf32> to vector<8x96xf32>
    %254 = arith.addf %252, %253 : vector<8x96xf32>
    %255 = vector.extract_strided_slice %254 {offsets = [0, 0], sizes = [8, 32], strides = [1, 1]} : vector<8x96xf32> to vector<8x32xf32>
    %256 = vector.extract_strided_slice %254 {offsets = [0, 32], sizes = [8, 32], strides = [1, 1]} : vector<8x96xf32> to vector<8x32xf32>
    %257 = vector.extract_strided_slice %254 {offsets = [0, 64], sizes = [8, 32], strides = [1, 1]} : vector<8x96xf32> to vector<8x32xf32>
    %cst_71 = arith.constant dense<0.000000e+00> : vector<64x4xf32>
    %258 = tpu.matmul %232, %242, %cst_71 {dimension_numbers = #tpu.dot_dimension_numbers<[1], [0], [0], [1], [0, 0, 1, 1], [], []>} : vector<64x32xf32>, vector<32x4xf32>, vector<64x4xf32> -> vector<64x4xf32>
    %259 = vector.broadcast %251 : vector<1x4xf32> to vector<64x4xf32>
    %260 = arith.addf %258, %259 : vector<64x4xf32>
    %261 = vector.shape_cast %260 : vector<64x4xf32> to vector<8x8x4xf32>
    %262 = vector.extract_strided_slice %255 {offsets = [0, 0], sizes = [8, 8], strides = [1, 1]} : vector<8x32xf32> to vector<8x8xf32>
    %263 = vector.extract_strided_slice %256 {offsets = [0, 0], sizes = [8, 8], strides = [1, 1]} : vector<8x32xf32> to vector<8x8xf32>
    %264 = vector.extract_strided_slice %257 {offsets = [0, 0], sizes = [8, 8], strides = [1, 1]} : vector<8x32xf32> to vector<8x8xf32>
    %265 = tpu.transpose %263, [1, 0] : vector<8x8xf32> -> vector<8x8xf32>
    %cst_72 = arith.constant dense<0.000000e+00> : vector<8x8xf32>
    %266 = tpu.matmul %262, %265, %cst_72 {dimension_numbers = #tpu.dot_dimension_numbers<[1], [0], [0], [1], [0, 0, 1, 1], [], []>} : vector<8x8xf32>, vector<8x8xf32>, vector<8x8xf32> -> vector<8x8xf32>
    %cst_73 = arith.constant 0.353553385 : f32
    %267 = vector.broadcast %cst_73 : f32 to vector<8x8xf32>
    %268 = arith.mulf %266, %267 : vector<8x8xf32>
    %269 = vector.extract_strided_slice %261 {offsets = [0, 0, 0], sizes = [8, 8, 1], strides = [1, 1, 1]} : vector<8x8x4xf32> to vector<8x8x1xf32>
    %270 = vector.shape_cast %269 : vector<8x8x1xf32> to vector<8x8xf32>
    %271 = arith.addf %268, %270 : vector<8x8xf32>
    %272 = vector.broadcast %9 : vector<1x8xf32> to vector<8x8xf32>
    %273 = arith.addf %271, %272 : vector<8x8xf32>
    %cst_74 = arith.constant dense<0xFF800000> : vector<8xf32>
    %274 = vector.multi_reduction <maximumf>, %273, %cst_74 [1] : vector<8x8xf32> to vector<8xf32>
    %275 = vector.shape_cast %274 : vector<8xf32> to vector<8x1xf32>
    %276 = vector.broadcast %275 : vector<8x1xf32> to vector<8x8xf32>
    %277 = arith.subf %273, %276 : vector<8x8xf32>
    %278 = math.exp %277 : vector<8x8xf32>
    %cst_75 = arith.constant dense<0.000000e+00> : vector<8xf32>
    %279 = vector.multi_reduction <add>, %278, %cst_75 [1] : vector<8x8xf32> to vector<8xf32>
    %280 = vector.shape_cast %279 : vector<8xf32> to vector<8x1xf32>
    %281 = tpu.reciprocal %280 {approx = true} : vector<8x1xf32> -> vector<8x1xf32>
    %282 = vector.broadcast %281 : vector<8x1xf32> to vector<8x8xf32>
    %283 = arith.mulf %278, %282 : vector<8x8xf32>
    %cst_76 = arith.constant dense<0.000000e+00> : vector<8x8xf32>
    %284 = tpu.matmul %283, %264, %cst_76 {dimension_numbers = #tpu.dot_dimension_numbers<[1], [0], [0], [1], [0, 0, 1, 1], [], []>} : vector<8x8xf32>, vector<8x8xf32>, vector<8x8xf32> -> vector<8x8xf32>
    %285 = vector.extract_strided_slice %255 {offsets = [0, 8], sizes = [8, 8], strides = [1, 1]} : vector<8x32xf32> to vector<8x8xf32>
    %286 = vector.extract_strided_slice %256 {offsets = [0, 8], sizes = [8, 8], strides = [1, 1]} : vector<8x32xf32> to vector<8x8xf32>
    %287 = vector.extract_strided_slice %257 {offsets = [0, 8], sizes = [8, 8], strides = [1, 1]} : vector<8x32xf32> to vector<8x8xf32>
    %288 = tpu.transpose %286, [1, 0] : vector<8x8xf32> -> vector<8x8xf32>
    %cst_77 = arith.constant dense<0.000000e+00> : vector<8x8xf32>
    %289 = tpu.matmul %285, %288, %cst_77 {dimension_numbers = #tpu.dot_dimension_numbers<[1], [0], [0], [1], [0, 0, 1, 1], [], []>} : vector<8x8xf32>, vector<8x8xf32>, vector<8x8xf32> -> vector<8x8xf32>
    %cst_78 = arith.constant 0.353553385 : f32
    %290 = vector.broadcast %cst_78 : f32 to vector<8x8xf32>
    %291 = arith.mulf %289, %290 : vector<8x8xf32>
    %292 = vector.extract_strided_slice %261 {offsets = [0, 0, 1], sizes = [8, 8, 1], strides = [1, 1, 1]} : vector<8x8x4xf32> to vector<8x8x1xf32>
    %293 = vector.shape_cast %292 : vector<8x8x1xf32> to vector<8x8xf32>
    %294 = arith.addf %291, %293 : vector<8x8xf32>
    %295 = vector.broadcast %9 : vector<1x8xf32> to vector<8x8xf32>
    %296 = arith.addf %294, %295 : vector<8x8xf32>
    %cst_79 = arith.constant dense<0xFF800000> : vector<8xf32>
    %297 = vector.multi_reduction <maximumf>, %296, %cst_79 [1] : vector<8x8xf32> to vector<8xf32>
    %298 = vector.shape_cast %297 : vector<8xf32> to vector<8x1xf32>
    %299 = vector.broadcast %298 : vector<8x1xf32> to vector<8x8xf32>
    %300 = arith.subf %296, %299 : vector<8x8xf32>
    %301 = math.exp %300 : vector<8x8xf32>
    %cst_80 = arith.constant dense<0.000000e+00> : vector<8xf32>
    %302 = vector.multi_reduction <add>, %301, %cst_80 [1] : vector<8x8xf32> to vector<8xf32>
    %303 = vector.shape_cast %302 : vector<8xf32> to vector<8x1xf32>
    %304 = tpu.reciprocal %303 {approx = true} : vector<8x1xf32> -> vector<8x1xf32>
    %305 = vector.broadcast %304 : vector<8x1xf32> to vector<8x8xf32>
    %306 = arith.mulf %301, %305 : vector<8x8xf32>
    %cst_81 = arith.constant dense<0.000000e+00> : vector<8x8xf32>
    %307 = tpu.matmul %306, %287, %cst_81 {dimension_numbers = #tpu.dot_dimension_numbers<[1], [0], [0], [1], [0, 0, 1, 1], [], []>} : vector<8x8xf32>, vector<8x8xf32>, vector<8x8xf32> -> vector<8x8xf32>
    %308 = vector.extract_strided_slice %255 {offsets = [0, 16], sizes = [8, 8], strides = [1, 1]} : vector<8x32xf32> to vector<8x8xf32>
    %309 = vector.extract_strided_slice %256 {offsets = [0, 16], sizes = [8, 8], strides = [1, 1]} : vector<8x32xf32> to vector<8x8xf32>
    %310 = vector.extract_strided_slice %257 {offsets = [0, 16], sizes = [8, 8], strides = [1, 1]} : vector<8x32xf32> to vector<8x8xf32>
    %311 = tpu.transpose %309, [1, 0] : vector<8x8xf32> -> vector<8x8xf32>
    %cst_82 = arith.constant dense<0.000000e+00> : vector<8x8xf32>
    %312 = tpu.matmul %308, %311, %cst_82 {dimension_numbers = #tpu.dot_dimension_numbers<[1], [0], [0], [1], [0, 0, 1, 1], [], []>} : vector<8x8xf32>, vector<8x8xf32>, vector<8x8xf32> -> vector<8x8xf32>
    %cst_83 = arith.constant 0.353553385 : f32
    %313 = vector.broadcast %cst_83 : f32 to vector<8x8xf32>
    %314 = arith.mulf %312, %313 : vector<8x8xf32>
    %315 = vector.extract_strided_slice %261 {offsets = [0, 0, 2], sizes = [8, 8, 1], strides = [1, 1, 1]} : vector<8x8x4xf32> to vector<8x8x1xf32>
    %316 = vector.shape_cast %315 : vector<8x8x1xf32> to vector<8x8xf32>
    %317 = arith.addf %314, %316 : vector<8x8xf32>
    %318 = vector.broadcast %9 : vector<1x8xf32> to vector<8x8xf32>
    %319 = arith.addf %317, %318 : vector<8x8xf32>
    %cst_84 = arith.constant dense<0xFF800000> : vector<8xf32>
    %320 = vector.multi_reduction <maximumf>, %319, %cst_84 [1] : vector<8x8xf32> to vector<8xf32>
    %321 = vector.shape_cast %320 : vector<8xf32> to vector<8x1xf32>
    %322 = vector.broadcast %321 : vector<8x1xf32> to vector<8x8xf32>
    %323 = arith.subf %319, %322 : vector<8x8xf32>
    %324 = math.exp %323 : vector<8x8xf32>
    %cst_85 = arith.constant dense<0.000000e+00> : vector<8xf32>
    %325 = vector.multi_reduction <add>, %324, %cst_85 [1] : vector<8x8xf32> to vector<8xf32>
    %326 = vector.shape_cast %325 : vector<8xf32> to vector<8x1xf32>
    %327 = tpu.reciprocal %326 {approx = true} : vector<8x1xf32> -> vector<8x1xf32>
    %328 = vector.broadcast %327 : vector<8x1xf32> to vector<8x8xf32>
    %329 = arith.mulf %324, %328 : vector<8x8xf32>
    %cst_86 = arith.constant dense<0.000000e+00> : vector<8x8xf32>
    %330 = tpu.matmul %329, %310, %cst_86 {dimension_numbers = #tpu.dot_dimension_numbers<[1], [0], [0], [1], [0, 0, 1, 1], [], []>} : vector<8x8xf32>, vector<8x8xf32>, vector<8x8xf32> -> vector<8x8xf32>
    %331 = vector.extract_strided_slice %255 {offsets = [0, 24], sizes = [8, 8], strides = [1, 1]} : vector<8x32xf32> to vector<8x8xf32>
    %332 = vector.extract_strided_slice %256 {offsets = [0, 24], sizes = [8, 8], strides = [1, 1]} : vector<8x32xf32> to vector<8x8xf32>
    %333 = vector.extract_strided_slice %257 {offsets = [0, 24], sizes = [8, 8], strides = [1, 1]} : vector<8x32xf32> to vector<8x8xf32>
    %334 = tpu.transpose %332, [1, 0] : vector<8x8xf32> -> vector<8x8xf32>
    %cst_87 = arith.constant dense<0.000000e+00> : vector<8x8xf32>
    %335 = tpu.matmul %331, %334, %cst_87 {dimension_numbers = #tpu.dot_dimension_numbers<[1], [0], [0], [1], [0, 0, 1, 1], [], []>} : vector<8x8xf32>, vector<8x8xf32>, vector<8x8xf32> -> vector<8x8xf32>
    %cst_88 = arith.constant 0.353553385 : f32
    %336 = vector.broadcast %cst_88 : f32 to vector<8x8xf32>
    %337 = arith.mulf %335, %336 : vector<8x8xf32>
    %338 = vector.extract_strided_slice %261 {offsets = [0, 0, 3], sizes = [8, 8, 1], strides = [1, 1, 1]} : vector<8x8x4xf32> to vector<8x8x1xf32>
    %339 = vector.shape_cast %338 : vector<8x8x1xf32> to vector<8x8xf32>
    %340 = arith.addf %337, %339 : vector<8x8xf32>
    %341 = vector.broadcast %9 : vector<1x8xf32> to vector<8x8xf32>
    %342 = arith.addf %340, %341 : vector<8x8xf32>
    %cst_89 = arith.constant dense<0xFF800000> : vector<8xf32>
    %343 = vector.multi_reduction <maximumf>, %342, %cst_89 [1] : vector<8x8xf32> to vector<8xf32>
    %344 = vector.shape_cast %343 : vector<8xf32> to vector<8x1xf32>
    %345 = vector.broadcast %344 : vector<8x1xf32> to vector<8x8xf32>
    %346 = arith.subf %342, %345 : vector<8x8xf32>
    %347 = math.exp %346 : vector<8x8xf32>
    %cst_90 = arith.constant dense<0.000000e+00> : vector<8xf32>
    %348 = vector.multi_reduction <add>, %347, %cst_90 [1] : vector<8x8xf32> to vector<8xf32>
    %349 = vector.shape_cast %348 : vector<8xf32> to vector<8x1xf32>
    %350 = tpu.reciprocal %349 {approx = true} : vector<8x1xf32> -> vector<8x1xf32>
    %351 = vector.broadcast %350 : vector<8x1xf32> to vector<8x8xf32>
    %352 = arith.mulf %347, %351 : vector<8x8xf32>
    %cst_91 = arith.constant dense<0.000000e+00> : vector<8x8xf32>
    %353 = tpu.matmul %352, %333, %cst_91 {dimension_numbers = #tpu.dot_dimension_numbers<[1], [0], [0], [1], [0, 0, 1, 1], [], []>} : vector<8x8xf32>, vector<8x8xf32>, vector<8x8xf32> -> vector<8x8xf32>
    %354 = tpu.concatenate %284, %307, %330, %353 in 1 : vector<8x8xf32>, vector<8x8xf32>, vector<8x8xf32>, vector<8x8xf32> -> vector<8x32xf32>
    %cst_92 = arith.constant dense<0.000000e+00> : vector<8x32xf32>
    %355 = tpu.matmul %354, %240, %cst_92 {dimension_numbers = #tpu.dot_dimension_numbers<[1], [0], [0], [1], [0, 0, 1, 1], [], []>} : vector<8x32xf32>, vector<32x32xf32>, vector<8x32xf32> -> vector<8x32xf32>
    %356 = vector.broadcast %244 : vector<1x32xf32> to vector<8x32xf32>
    %357 = arith.addf %355, %356 : vector<8x32xf32>
    %358 = arith.addf %194, %357 : vector<8x32xf32>
    %cst_93 = arith.constant dense<0.000000e+00> : vector<8xf32>
    %359 = vector.multi_reduction <add>, %358, %cst_93 [1] : vector<8x32xf32> to vector<8xf32>
    %360 = vector.shape_cast %359 : vector<8xf32> to vector<8x1xf32>
    %cst_94 = arith.constant 3.200000e+01 : f32
    %361 = vector.broadcast %cst_94 : f32 to vector<8x1xf32>
    %362 = arith.divf %360, %361 : vector<8x1xf32>
    %363 = vector.broadcast %362 : vector<8x1xf32> to vector<8x32xf32>
    %364 = arith.subf %358, %363 : vector<8x32xf32>
    %365 = arith.mulf %364, %364 : vector<8x32xf32>
    %cst_95 = arith.constant dense<0.000000e+00> : vector<8xf32>
    %366 = vector.multi_reduction <add>, %365, %cst_95 [1] : vector<8x32xf32> to vector<8xf32>
    %367 = vector.shape_cast %366 : vector<8xf32> to vector<8x1xf32>
    %cst_96 = arith.constant 3.200000e+01 : f32
    %368 = vector.broadcast %cst_96 : f32 to vector<8x1xf32>
    %369 = arith.divf %367, %368 : vector<8x1xf32>
    %370 = vector.broadcast %362 : vector<8x1xf32> to vector<8x32xf32>
    %371 = arith.subf %358, %370 : vector<8x32xf32>
    %cst_97 = arith.constant 9.99999974E-6 : f32
    %372 = vector.broadcast %cst_97 : f32 to vector<8x1xf32>
    %373 = arith.addf %369, %372 : vector<8x1xf32>
    %374 = math.rsqrt %373 : vector<8x1xf32>
    %375 = vector.broadcast %374 : vector<8x1xf32> to vector<8x32xf32>
    %376 = arith.mulf %371, %375 : vector<8x32xf32>
    %377 = vector.broadcast %247 : vector<1x32xf32> to vector<8x32xf32>
    %378 = arith.mulf %376, %377 : vector<8x32xf32>
    %379 = vector.broadcast %248 : vector<1x32xf32> to vector<8x32xf32>
    %380 = arith.addf %378, %379 : vector<8x32xf32>
    %cst_98 = arith.constant dense<0.000000e+00> : vector<8x128xf32>
    %381 = tpu.matmul %380, %241, %cst_98 {dimension_numbers = #tpu.dot_dimension_numbers<[1], [0], [0], [1], [0, 0, 1, 1], [], []>} : vector<8x32xf32>, vector<32x128xf32>, vector<8x128xf32> -> vector<8x128xf32>
    %382 = vector.broadcast %245 : vector<1x128xf32> to vector<8x128xf32>
    %383 = arith.addf %381, %382 : vector<8x128xf32>
    %cst_99 = arith.constant 0.000000e+00 : f32
    %384 = vector.broadcast %cst_99 : f32 to vector<8x128xf32>
    %385 = arith.maximumf %383, %384 : vector<8x128xf32>
    %cst_100 = arith.constant dense<0.000000e+00> : vector<8x32xf32>
    %386 = tpu.matmul %385, %236, %cst_100 {dimension_numbers = #tpu.dot_dimension_numbers<[1], [0], [0], [1], [0, 0, 1, 1], [], []>} : vector<8x128xf32>, vector<128x32xf32>, vector<8x32xf32> -> vector<8x32xf32>
    %387 = vector.broadcast %246 : vector<1x32xf32> to vector<8x32xf32>
    %388 = arith.addf %386, %387 : vector<8x32xf32>
    %389 = arith.addf %380, %388 : vector<8x32xf32>
    %cst_101 = arith.constant dense<0.000000e+00> : vector<8xf32>
    %390 = vector.multi_reduction <add>, %389, %cst_101 [1] : vector<8x32xf32> to vector<8xf32>
    %391 = vector.shape_cast %390 : vector<8xf32> to vector<8x1xf32>
    %cst_102 = arith.constant 3.200000e+01 : f32
    %392 = vector.broadcast %cst_102 : f32 to vector<8x1xf32>
    %393 = arith.divf %391, %392 : vector<8x1xf32>
    %394 = vector.broadcast %393 : vector<8x1xf32> to vector<8x32xf32>
    %395 = arith.subf %389, %394 : vector<8x32xf32>
    %396 = arith.mulf %395, %395 : vector<8x32xf32>
    %cst_103 = arith.constant dense<0.000000e+00> : vector<8xf32>
    %397 = vector.multi_reduction <add>, %396, %cst_103 [1] : vector<8x32xf32> to vector<8xf32>
    %398 = vector.shape_cast %397 : vector<8xf32> to vector<8x1xf32>
    %cst_104 = arith.constant 3.200000e+01 : f32
    %399 = vector.broadcast %cst_104 : f32 to vector<8x1xf32>
    %400 = arith.divf %398, %399 : vector<8x1xf32>
    %401 = vector.broadcast %393 : vector<8x1xf32> to vector<8x32xf32>
    %402 = arith.subf %389, %401 : vector<8x32xf32>
    %cst_105 = arith.constant 9.99999974E-6 : f32
    %403 = vector.broadcast %cst_105 : f32 to vector<8x1xf32>
    %404 = arith.addf %400, %403 : vector<8x1xf32>
    %405 = math.rsqrt %404 : vector<8x1xf32>
    %406 = vector.broadcast %405 : vector<8x1xf32> to vector<8x32xf32>
    %407 = arith.mulf %402, %406 : vector<8x32xf32>
    %408 = vector.broadcast %249 : vector<1x32xf32> to vector<8x32xf32>
    %409 = arith.mulf %407, %408 : vector<8x32xf32>
    %410 = vector.broadcast %250 : vector<1x32xf32> to vector<8x32xf32>
    %411 = arith.addf %409, %410 : vector<8x32xf32>
    %c0_106 = arith.constant 0 : index
    %c0_107 = arith.constant 0 : index
    %c0_108 = arith.constant 0 : index
    %412 = vector.load %arg7[%c0_106, %c0_107, %c0_108] : memref<1x8x32xf32, #tpu.memory_space<vmem>>, vector<1x8x32xf32>
    %413 = vector.shape_cast %412 : vector<1x8x32xf32> to vector<8x32xf32>
    %414 = vector.shape_cast %411 : vector<8x32xf32> to vector<1x8x32xf32>
    tpu.vector_store %arg7[%c0_106, %c0_107, %c0_108], %414 {strides = array<i32>} : memref<1x8x32xf32, #tpu.memory_space<vmem>>, vector<1x8x32xf32>,
    return
  }
  func.func @transform_0(%arg0: i32) -> (i32, i32, i32) {
    %c0_i32 = arith.constant 0 : i32
    %c0_i32_0 = arith.constant 0 : i32
    %c0_i32_1 = arith.constant 0 : i32
    return %arg0, %c0_i32, %c0_i32_0 : i32, i32, i32
  }
  func.func @transform_1(%arg0: i32) -> (i32, i32, i32) {
    %c0_i32 = arith.constant 0 : i32
    %c0_i32_0 = arith.constant 0 : i32
    %c0_i32_1 = arith.constant 0 : i32
    return %arg0, %c0_i32, %c0_i32_0 : i32, i32, i32
  }
  func.func @transform_2(%arg0: i32) -> (i32, i32, i32) {
    %c0_i32 = arith.constant 0 : i32
    %c0_i32_0 = arith.constant 0 : i32
    %c0_i32_1 = arith.constant 0 : i32
    return %arg0, %c0_i32, %c0_i32_0 : i32, i32, i32
  }
  func.func @transform_3(%arg0: i32) -> (i32, i32, i32) {
    %c0_i32 = arith.constant 0 : i32
    %c0_i32_0 = arith.constant 0 : i32
    %c0_i32_1 = arith.constant 0 : i32
    %c0_i32_2 = arith.constant 0 : i32
    return %c0_i32, %c0_i32_0, %c0_i32_1 : i32, i32, i32
  }
  func.func @transform_4(%arg0: i32) -> (i32, i32, i32) {
    %c0_i32 = arith.constant 0 : i32
    %c0_i32_0 = arith.constant 0 : i32
    %c0_i32_1 = arith.constant 0 : i32
    %c0_i32_2 = arith.constant 0 : i32
    return %c0_i32, %c0_i32_0, %c0_i32_1 : i32, i32, i32
  }
  func.func @transform_5(%arg0: i32) -> (i32, i32, i32) {
    %c0_i32 = arith.constant 0 : i32
    %c0_i32_0 = arith.constant 0 : i32
    %c0_i32_1 = arith.constant 0 : i32
    %c0_i32_2 = arith.constant 0 : i32
    return %c0_i32, %c0_i32_0, %c0_i32_1 : i32, i32, i32
  }
  func.func @transform_6(%arg0: i32) -> (i32, i32, i32) {
    %c0_i32 = arith.constant 0 : i32
    %c0_i32_0 = arith.constant 0 : i32
    %c0_i32_1 = arith.constant 0 : i32
    return %arg0, %c0_i32, %c0_i32_0 : i32, i32, i32
  }
}

</mosaic_0001>

<bundles_post_ra>
// kernel: tpu_custom_call.1
= control target key start
LH: loop header
LB: loop body
LE: loop exit
PB: predicated region body
PF: predicated region fallthrough
CT: control target
= control target key end

     0   :  { %11 = vsyncpa [#allocation3], 0  ;;  %s5925_s0 = inlined_call_operand.vmem [shape: f32[2,8,32], index: 0, kind: input, shape index: {}]   ;;  %s5926_s1 = inlined_call_operand.vmem [shape: f32[2,64,32], index: 1, kind: input, shape index: {}]   ;;  %s5927_s2 = inlined_call_operand.vmem [shape: f32[2,1,8], index: 2, kind: input, shape index: {}]   ;;  %s5928_s3 = inlined_call_operand.vmem [shape: f32[2,32,356], index: 3, kind: input, shape index: {}]   ;;  %s5929_s4 = inlined_call_operand.vmem [shape: f32[2,128,32], index: 4, kind: input, shape index: {}]   ;;  %s5930_s5 = inlined_call_operand.vmem [shape: f32[2,12,128], index: 5, kind: input, shape index: {}]   ;;  %s5931_s6 = inlined_call_operand.hbm [shape: f32[2,8,32], index: 6, kind: output, shape index: {}]  }
   0x1   :  { %13 = vsyncpa [#allocation3 + $0x1], 0  ;;  %s4737_s21 = smov 0   ;;  %s4739_s22 = smov 0  }
   0x2   :  { %s4741_s23 = smov 0   ;;  %s4743_s24 = smov 0  }
   0x3 LB: > { %s4758_s25 = sadd.s32 4294967295, %s4677_s24   ;;  %s3924_s26 = sadd.s32 4294967294, %s4677_s24   ;;  %s4677_s24 = sphi %s4743_s24, %s5957_s24   ;;  %s4673_s23 = sphi %s4741_s23, %s5956_s23   ;;  %s4669_s22 = sphi %s4739_s22, %s5955_s22   ;;  %s4665_s21 = sphi %s4737_s21, %s5954_s21  }
   0x4   : > { %s4762_s27 = sadd.s32 1, %s4677_s24   ;;  %s167_s28 = sadd.s32 1, %s4673_s23 }
   0x5   : > { %s164_s29 = ssub.s32 %s4677_s24, %s4762_s27  ;;  %p177_p0 = scmp.ne.s32.totalorder %s4673_s23, %s4669_s22 }
   0x6   : > { %p165_p1 = scmp.eq.s32.totalorder %s164_s29, 0  ;;  %p178_p2 = scmp.eq.s32.totalorder %s4758_s25, 1 }
   0x7   : > { %p183_p3 = scmp.ne.s32.totalorder %s4669_s22, %s4665_s21  ;;  %p184_p4 = scmp.eq.s32.totalorder %s3924_s26, 1 }
   0x8   : > { %s4773_s30 = scalar_select %p165_p1, %s4673_s23, %s167_s28  }
   0x9   : > { %p4775_p5 = por %p178_p2, %p177_p0  ;;  %p4779_p6 = por %p184_p4, %p183_p3 }
   0xa   : > { %p3927_p7 = scmp.ge.s32.totalorder %s4677_s24, 1  ;;  %p232_p8 = scmp.lt.s32.totalorder %s4677_s24, 3 }
   0xc   : > { %p233_p9 = pnand %p3927_p7, %p232_p8 }
   0xd   : > { %s4680_s13 = smov (!%p233_p9), 32   ;;  %p269_p10 = scmp.lt.s32.totalorder (!%p233_p9), %s4758_s25, 1 }
   0xe   : > { %236 = sbr.rel (%p233_p9) target bundleno = 5807 (0x16af), region = 44  ;;  %s4683_s29 = smov (!%p233_p9), 96  }
   0xf   : > { %s4687_s18 = smov (!%p233_p9), 120   ;;  %s5941_s19 = smov (!%p233_p9), 112  }
  0x10   : > { %s5940_s26 = smov (!%p233_p9), 104   ;;  %s5939_s28 = smov (!%p233_p9), 80  }
  0x11   : > { %s5938_s10 = smov (!%p233_p9), 72   ;;  %s5937_s11 = smov (!%p233_p9), 56  }
  0x12   : > { %s5932_s15 = smov (!%p233_p9), 48  }
  0x13   : > { %v4788_v0 = vld [vmem:[%s5928_s3 + $0x58] sm:$0xff]  ;;  %v4793_v1 = vld [vmem:[%s5928_s3 + $0x48] sm:$0xff]  ;;  %v4679_v2 = vmov 0.0   ;;  %v4801_v3 = vld [vmem:[%s5928_s3 + $0x30] sm:$0xff]  ;;  %vm4681_vm0 = vmmov 0   ;;  %s4831_s9 = scalar_select %p269_p10, %s4758_s25, 1  ;;  %v323_v22 = vlaneseq }
  0x14   : > { %4165 = vmatprep.subr.mxu0 %v4679_v2  ;;  %415 = vrot.lane.b32.xlu0 %v4788_v0, %s4680_s13  ;;  %v4806_v4 = vld [vmem:[%s5928_s3 + $0x28] sm:$0xff]  ;;  %v4813_v5 = vld [vmem:[%s5928_s3 + $0x40] sm:$0xff]  ;;  %v4821_v6 = vld [vmem:[%s5928_s3 + $0x18] sm:$0xff]  ;;  %vm327_vm1 = vcmask 261120   ;;  %v4682_v25 = vmov 0   ;;  %vm553_vm2 = vcmask 64512  }
  0x15   : > { %4166 = vmatpush3.msra.mxu0 %v4793_v1  ;;  %411 = vrot.lane.b32.xlu1 %v4806_v4, %s4680_s13  ;;  %v4828_v7 = vld [vmem:[%s5928_s3 + $0x10] sm:$0xff]  ;;  %v4840_v8 = vld [vmem:[%s5928_s3] sm:$0xff]  ;;  %s3929_s12 = sshll.u32 %s4831_s9, 3  ;;  %s4022_s14 = sshll.u32 %s4831_s9, 6  ;;  %v4895_v23 = vshrl.u32 %v323_v22, 7  ;;  %v4685_v51 = vmov 1  }
  0x16   : > { %4167 = vmatprep.subr.mxu0 %v4679_v2  ;;  %4173 = vmatprep.mubr.msk.f32.mxu0 %vm4681_vm0, %v4679_v2  ;;  %s4850_s17 = scalar_lea.vmem %s5925_s0, %s3929_s12  ;;  %s4855_s20 = scalar_lea.vmem %s5926_s1, %s4022_s14  ;;  %v4905_v26 = vld [vmem:[%s5930_s5] sm:$0xff]  ;;  %v322_v32 = vld [vmem:[%s5930_s5 + $0x8] sm:$0xf]  ;;  %v662_v53 = vand.u32 127, %v323_v22  ;;  %vm695_vm3 = vcmask 1041409   ;;  %vm697_vm4 = vcmask 1042434  }
  0x17   : > { %4168 = vmatpush3.msra.mxu0 %v4801_v3  ;;  %v4859_v9 = vld [vmem:[%s4850_s17] sm:$0xff]  ;;  %v283_v15 = vld [vmem:[%s4855_s20 + $0x8] sm:$0xff]  ;;  %v284_v16 = vld [vmem:[%s4855_s20 + $0x10] sm:$0xff]  ;;  %v4898_v24 = vsub.s32 0, %v4895_v23  ;;  %4525 = vset.pattern.permute.xlu1 %v4682_v25  ;;  %v4914_v31 = vsub.s32 3, %v4895_v23  ;;  %s4684_s12 = smov 88   ;;  %s280_s16 = scalar_lea.vmem %s5927_s2, %s4831_s9 }
  0x18   : > { %413 = vrot.lane.b32.xlu0 %v4813_v5, %s4680_s13  ;;  %4169 = vmatprep.subr.mxu0 %v4679_v2  ;;  %v282_v10 = vld [vmem:[%s4855_s20] sm:$0xff]  ;;  %v285_v17 = vld [vmem:[%s4855_s20 + $0x18] sm:$0xff]  ;;  %v4879_v19 = vld [vmem:[%s4855_s20 + $0x28] sm:$0xff]  ;;  %v4955_v54 = vsub.s32 %v662_v53, %v4895_v23  ;;  %vm699_vm5 = vcmask 1043459   ;;  %vm701_vm6 = vcmask 1044484   ;;  %vm703_vm7 = vcmask 1045509  }
  0x19   : > { %4170 = vmatpush3.msra.mxu0 %v4821_v6  ;;  %409 = vrot.lane.b32.xlu1 %v4828_v7, %s4680_s13  ;;  %v286_v18 = vld [vmem:[%s4855_s20 + $0x20] sm:$0xff]  ;;  %v4882_v20 = vld [vmem:[%s4855_s20 + $0x30] sm:$0xff]  ;;  %v4889_v21 = vld [vmem:[%s4855_s20 + $0x38] sm:$0xff]  ;;  %v326_v27 = vrot.slane %v4905_v26, %v4898_v24  ;;  %v404_v33 = vrot.slane %v322_v32, %v4914_v31  ;;  %vm705_vm8 = vcmask 1046534   ;;  %vm707_vm9 = vcmask 1047559   ;;  %s4686_s9 = smov 64  }
  0x1a   : > { %4171 = vmatprep.subr.mxu0 %v4679_v2  ;;  %4184 = vmatprep.mubr.msk.f32.mxu1 %vm327_vm1, %v282_v10  ;;  %s5933_s14 = smov 40   ;;  %vm1514_vm10 = vcmask 130048   ;;  %vm1516_vm11 = vcmask 195584  }
  0x1b   : > { %4172 = vmatpush3.msra.mxu0 %v4840_v8  ;;  %4524 = vset.pattern.permute.xlu0 %v4682_v25 }
  0x1c   : > { %4174 = vmatmul.mubr.msk.f32.vlgmr.msra.gmra.mxu0 %vm327_vm1, %v4859_v9  ;;  %4196 = vmatprep.subr.mxu0 %v4679_v2 }
  0x1d   : > { %4198 = vmatprep.mubr.msk.f32.mxu0 %vm4681_vm0, %v4679_v2 }
  0x86   : > { %v416_v11 = vpop.permute.xlu0 %415 }
  0x87   : > { %4176 = vmatprep.subr.mxu1 %v416_v11  ;;  %v412_v12 = vpop.permute.xlu1 %411 }
  0x88   : > { %4177 = vmatpush3.msra.mxu1 %v416_v11 }
  0x8a   : > { %v414_v13 = vpop.permute.xlu0 %413 }
  0x8b   : > { %4178 = vmatprep.subr.mxu1 %v414_v13  ;;  %v410_v14 = vpop.permute.xlu1 %409 }
  0x8c   : > { %4179 = vmatpush3.msra.mxu1 %v414_v13 }
  0x8d   : > { %4180 = vmatprep.subr.mxu1 %v412_v12 }
  0x8e   : > { %4181 = vmatpush3.msra.mxu1 %v412_v12  ;;  %v290_v12 = vld [vmem:[%s280_s16] sm:$0x1]  ;;  %s5936_s16 = smov 8  }
  0x8f   : > { %4182 = vmatprep.subr.mxu1 %v410_v14 }
  0x90   : > { %4183 = vmatpush3.msra.mxu1 %v410_v14 }
  0x91   : > { %4185 = vmatmul.mubr.msk.f32.vlgmr.msra.gmra.mxu1 %vm327_vm1, %v283_v15  ;;  %4216 = vmatprep.subr.mxu1 %v4679_v2 }
  0x92   : > { %4187 = vmatprep.mubr.msk.f32.mxu1 %vm327_vm1, %v284_v16 }
  0x95   : > { %4188 = vmatmul.mubr.msk.f32.gmra.mxu1 %vm327_vm1, %v285_v17  ;;  %v291_v17 = vsub.f32 1.0, %v290_v12 }
  0x96   : > { %4190 = vmatprep.mubr.msk.f32.mxu1 %vm327_vm1, %v286_v18 }
  0x99   : > { %4191 = vmatmul.mubr.msk.f32.gmra.mxu1 %vm327_vm1, %v4879_v19 }
  0x9a   : > { %4193 = vmatprep.mubr.msk.f32.mxu1 %vm327_vm1, %v4882_v20 }
  0x9d   : > { %4194 = vmatmul.mubr.msk.f32.gmra.mxu1 %vm327_vm1, %v4889_v21 }
  0x9e   : > { %4218 = vmatprep.mubr.msk.f32.mxu1 %vm4681_vm0, %v4679_v2 }
  0xdc   : > { %v397_v28 = vpop.f32.mrf.mxu0 }
  0xdd   : > { %v4909_v29 = vadd.f32 %v397_v28, %v326_v27  ;;  %v292_v28 = vmul.f32 -1e+09, %v291_v17 }
  0xde   : > { %v4175_v30 = vpop.f32.mrf.mxu0 }
  0xdf   : > { %551 = vrot.lane.b32.xlu0 %v4909_v29, %s4683_s29 }
 0x151   : > { %v4186_v34 = vpop.f32.mrf.mxu1  ;;  %v552_v35 = vpop.permute.xlu0 %551 }
 0x152   : > { %v4920_v36 = vadd.f32 %v4186_v34, %v404_v33  ;;  %4197 = vmatpush3.xpose.msk.msra.mxu0 %vm553_vm2, %v552_v35  ;;  %v4976_v35 = vrot.slane %v292_v28, %v4898_v24 }
 0x153   : > { %v511_v37 = vpop.f32.mrf.mxu1  ;;  %4201 = vmatprep.subr.mxu0 %v4679_v2 }
 0x154   : > { %v4924_v38 = vadd.f32 %v511_v37, %v404_v33  ;;  %641 = vperm.xlu0 %4524, %v4920_v36  }
 0x155   : > { %4199 = vmatmul.mubr.msk.f32.vlgmr.msra.gmra.mxu0 %vm553_vm2, %v4909_v29  ;;  %v4189_v39 = vpop.f32.mrf.mxu1 }
 0x156   : > { %638 = vperm.xlu1 %4525, %v4924_v38   ;;  %v4930_v40 = vadd.f32 %v4189_v39, %v404_v33  ;;  %4203 = vmatprep.mubr.msk.f32.mxu0 %vm4681_vm0, %v4679_v2 }
 0x157   : > { %v521_v41 = vpop.f32.mrf.mxu1 }
 0x158   : > { %v4935_v43 = vadd.f32 %v521_v41, %v404_v33 }
 0x159   : > { %v4192_v42 = vpop.f32.mrf.mxu1 }
 0x15a   : > { %647 = vperm.xlu1 %4525, %v4930_v40   ;;  %v4940_v47 = vadd.f32 %v4192_v42, %v404_v33 }
 0x15b   : > { %v531_v44 = vpop.f32.mrf.mxu1 }
 0x15c   : > { %v4937_v45 = vadd.f32 %v531_v44, %v404_v33 }
 0x15d   : > { %v4195_v46 = vpop.f32.mrf.mxu1 }
 0x15e   : > { %644 = vperm.xlu1 %4525, %v4935_v43   ;;  %650 = vperm.xlu0 %4524, %v4937_v45   ;;  %v4946_v50 = vadd.f32 %v4195_v46, %v404_v33 }
 0x15f   : > { %v541_v48 = vpop.f32.mrf.mxu1 }
 0x160   : > { %v4943_v49 = vadd.f32 %v541_v48, %v404_v33  ;;  %v4690_v48 = vmov 2  }
 0x162   : > { %653 = vperm.xlu1 %4525, %v4940_v47   ;;  %656 = vperm.xlu0 %4524, %v4943_v49  }
 0x166   : > { %659 = vperm.xlu1 %4525, %v4946_v50   ;;  %4527 = vset.pattern.permute.xlu0 %v4685_v51 }
 0x16a   : > { %807 = vrot.lane.b32.xlu1 %v4909_v29, %s4684_s12 }
 0x16b   : > { %4526 = vset.pattern.permute.xlu1 %v4685_v51 }
 0x1cf   : > { %v642_v56 = vpop.permute.xlu0 %641 }
 0x1d0   : > { %v670_v58 = vrot.slane %v642_v56, %v4955_v54 }
 0x1d1   : > { %v639_v52 = vpop.permute.xlu1 %638 }
 0x1d2   : > { %v666_v57 = vrot.slane %v639_v52, %v4955_v54  ;;  %v4691_v52 = vmov 3  }
 0x1d4   : > { %v696_v61 = vsel %vm695_vm3, %v670_v58, %v666_v57 }
 0x1d5   : > { %v648_v55 = vpop.permute.xlu1 %647 }
 0x1d6   : > { %v678_v62 = vrot.slane %v648_v55, %v4955_v54 }
 0x1d9   : > { %v645_v59 = vpop.permute.xlu1 %644  ;;  %v651_v63 = vpop.permute.xlu0 %650 }
 0x1da   : > { %v674_v60 = vrot.slane %v645_v59, %v4955_v54  ;;  %v682_v11 = vrot.slane %v651_v63, %v4955_v54 }
 0x1dc   : > { %v698_v10 = vsel %vm697_vm4, %v674_v60, %v696_v61 }
 0x1dd   : > { %v700_v13 = vsel %vm699_vm5, %v678_v62, %v698_v10  ;;  %v654_v14 = vpop.permute.xlu1 %653  ;;  %v657_v16 = vpop.permute.xlu0 %656 }
 0x1de   : > { %v686_v15 = vrot.slane %v654_v14, %v4955_v54  ;;  %v702_v18 = vsel %vm701_vm6, %v682_v11, %v700_v13  ;;  %v690_v22 = vrot.slane %v657_v16, %v4955_v54 }
 0x1e0   : > { %v704_v27 = vsel %vm703_vm7, %v686_v15, %v702_v18 }
 0x1e1   : > { %v660_v30 = vpop.permute.xlu1 %659  ;;  %v706_v33 = vsel %vm705_vm8, %v690_v22, %v704_v27 }
 0x1e2   : > { %v694_v32 = vrot.slane %v660_v30, %v4955_v54 }
 0x1e4   : > { %v708_v39 = vsel %vm707_vm9, %v694_v32, %v706_v33 }
 0x215   : > { %v624_v34 = vpop.f32.mrf.mxu0 }
 0x216   : > { %v628_v37 = vmul.f32 0.35355338, %v624_v34 }
 0x217   : > { %v4200_v41 = vpop.f32.mrf.mxu0 }
 0x218   : > { %v710_v42 = vadd.f32 %v708_v39, %v628_v37 }
 0x21a   : > { %v717_v44 = vadd.f32 %v4976_v35, %v710_v42 }
 0x21c   : > { %v718_v46 = vsel %vm553_vm2, %v717_v44, -inf }
 0x21d   : > { %719 = vmax.xlane.f32.xlu0 %v718_v46 }
 0x233   : > { %729 = vrot.lane.b32.xlu0 %v4909_v29, %s4686_s9 }
 0x237   : > { %805 = vrot.lane.b32.xlu0 %v4909_v29, %s4687_s18 }
 0x23b   : > { %1037 = vrot.lane.b32.xlu0 %v4909_v29, %s5941_s19 }
 0x23f   : > { %1269 = vrot.lane.b32.xlu0 %v4909_v29, %s5940_s26  ;;  %s5945_s26 = smov 104  }
 0x243   : > { %888 = vperm.xlu0 %4527, %v4920_v36  }
 0x247   : > { %897 = vperm.xlu0 %4527, %v4937_v45  }
 0x24b   : > { %4528 = vset.pattern.permute.xlu0 %v4690_v48 }
 0x24c   : > { %1117 = vperm.xlu0 %4528, %v4924_v38  }
 0x250   : > { %1123 = vperm.xlu0 %4528, %v4935_v43  }
 0x254   : > { %1126 = vperm.xlu0 %4528, %v4930_v40  }
 0x258   : > { %1132 = vperm.xlu0 %4528, %v4940_v47  }
 0x25c   : > { %1138 = vperm.xlu0 %4528, %v4946_v50  }
 0x260   : > { %4535 = vset.pattern.permute.xlu0 %v4691_v52 }
 0x261   : > { %1352 = vperm.xlu0 %4535, %v4920_v36  }
 0x265   : > { %1364 = vperm.xlu0 %4535, %v4940_v47  }
 0x269   : > { %4536 = vset.pattern.permute.xlu0 %v4682_v25 }
 0x2a6   : > { %v720_v53 = vpop.xlane.xlu0 %719 }
 0x2a7   : > { %v721_v55 = vsub.f32 %v717_v44, %v720_v53 }
 0x2a9   : > { %v722_v56 = vmul.f32 1.442695, %v721_v55 }
 0x2aa   : > { %v730_v57 = vpop.permute.xlu0 %729 }
 0x2ab   : > { %4548 = vpow2.f32 %v722_v56  ;;  %4202 = vmatpush3.msra.mxu0 %v730_v57 }
 0x2ac   : > { %4206 = vmatprep.subr.mxu0 %v4679_v2 }
 0x2b8   : > { %v4549_v58 = vpop.eup %4548 }
 0x2b9   : > { %v724_v59 = vsel %vm553_vm2, %v4549_v58, 0.0 }
 0x2ba   : > { %725 = vadd.xlane.f32.xlu1 %v724_v59 }
 0x2cb   : > { %1039 = vrot.lane.b32.xlu1 %v4909_v29, %s5939_s28  ;;  %s5952_s28 = smov 16  }
 0x2cf   : > { %1271 = vrot.lane.b32.xlu1 %v4909_v29, %s5938_s10  ;;  %s5953_s10 = smov 24  }
 0x2d3   : > { %885 = vperm.xlu1 %4526, %v4924_v38  }
 0x2d7   : > { %891 = vperm.xlu1 %4526, %v4935_v43  }
 0x2db   : > { %894 = vperm.xlu1 %4526, %v4930_v40  }
 0x2df   : > { %900 = vperm.xlu1 %4526, %v4940_v47  }
 0x2e3   : > { %4529 = vset.pattern.permute.xlu1 %v4690_v48 }
 0x2e4   : > { %1120 = vperm.xlu1 %4529, %v4920_v36   ;;  %v808_v36 = vpop.permute.xlu1 %807 }
 0x2e8   : > { %4530 = vset.pattern.permute.xlu1 %v4685_v51 }
 0x2e9   : > { %903 = vperm.xlu1 %4530, %v4943_v49  }
 0x2ed   : > { %906 = vperm.xlu1 %4530, %v4946_v50  }
 0x2f1   : > { %4531 = vset.pattern.permute.xlu1 %v4690_v48 }
 0x2f2   : > { %1129 = vperm.xlu1 %4531, %v4937_v45  }
 0x2f6   : > { %4532 = vset.pattern.permute.xlu1 %v4691_v52 }
 0x2f7   : > { %1349 = vperm.xlu1 %4532, %v4924_v38   ;;  %v806_v38 = vpop.permute.xlu0 %805 }
 0x2fb   : > { %4533 = vset.pattern.permute.xlu1 %v4690_v48  ;;  %v1038_v61 = vpop.permute.xlu0 %1037 }
 0x2fc   : > { %1135 = vperm.xlu1 %4533, %v4943_v49  }
 0x300   : > { %4534 = vset.pattern.permute.xlu1 %v4691_v52 }
 0x301   : > { %1355 = vperm.xlu1 %4534, %v4935_v43  }
 0x305   : > { %1358 = vperm.xlu1 %4534, %v4930_v40  }
 0x309   : > { %1361 = vperm.xlu1 %4534, %v4937_v45  }
 0x30d   : > { %1367 = vperm.xlu1 %4534, %v4943_v49  }
 0x311   : > { %1370 = vperm.xlu1 %4534, %v4946_v50  }
 0x315   : > { %4537 = vset.pattern.permute.xlu1 %v4682_v25  ;;  %v1270_v25 = vpop.permute.xlu0 %1269 }
 0x319   : > { %v889_v12 = vpop.permute.xlu0 %888 }
 0x31d   : > { %v5053_v14 = vpop.permute.xlu0 %897 }
 0x321   : > { %v1118_v16 = vpop.permute.xlu0 %1117 }
 0x322   : > { %v1143_v32 = vrot.slane %v1118_v16, %v4955_v54  ;;  %v915_v16 = vrot.slane %v889_v12, %v4955_v54 }
 0x325   : > { %v1124_v18 = vpop.permute.xlu0 %1123 }
 0x326   : > { %v1151_v34 = vrot.slane %v1124_v18, %v4955_v54 }
 0x329   : > { %v1127_v27 = vpop.permute.xlu0 %1126 }
 0x32a   : > { %v1155_v44 = vrot.slane %v1127_v27, %v4955_v54 }
 0x32d   : > { %v1133_v37 = vpop.permute.xlu0 %1132 }
 0x32e   : > { %v1163_v57 = vrot.slane %v1133_v37, %v4955_v54 }
 0x331   : > { %v1139_v53 = vpop.permute.xlu0 %1138 }
 0x343   : > { %v726_v47 = vpop.xlane.xlu1 %725 }
 0x344   : > { %4550 = vrcp.f32 %v726_v47 }
 0x347   : > { %v1040_v60 = vpop.permute.xlu1 %1039 }
 0x348   : > { %4217 = vmatpush3.xpose.msk.msra.mxu1 %vm553_vm2, %v1040_v60  ;;  %v1353_v60 = vpop.permute.xlu0 %1352 }
 0x349   : > { %4226 = vmatprep.subr.mxu1 %v4679_v2 }
 0x34b   : > { %v1272_v43 = vpop.permute.xlu1 %1271  ;;  %4219 = vmatmul.mubr.msk.f32.vlgmr.msra.gmra.mxu1 %vm553_vm2, %v1038_v61 }
 0x34c   : > { %4227 = vmatpush3.xpose.msk.msra.mxu1 %vm553_vm2, %v1272_v43  ;;  %4228 = vmatprep.mubr.msk.f32.mxu1 %vm4681_vm0, %v4679_v2 }
 0x34d   : > { %4236 = vmatprep.subr.mxu1 %v4679_v2 }
 0x34f   : > { %4229 = vmatmul.mubr.msk.f32.vlgmr.msra.gmra.mxu1 %vm553_vm2, %v1270_v25  ;;  %v886_v49 = vpop.permute.xlu1 %885 }
 0x350   : > { %4244 = vmatprep.mubr.msk.f32.mxu1 %vm4681_vm0, %v4679_v2 }
 0x351   : > { %v4551_v40 = vpop.eup %4550 }
 0x352   : > { %v728_v45 = vmul.f32 %v4551_v40, %v4549_v58 }
 0x353   : > { %v892_v50 = vpop.permute.xlu1 %891 }
 0x354   : > { %4204 = vmatmul.mubr.msk.f32.vlgmr.msra.gmra.mxu0 %vm553_vm2, %v728_v45  ;;  %v911_v45 = vrot.slane %v886_v49, %v4955_v54  ;;  %v919_v18 = vrot.slane %v892_v50, %v4955_v54 }
 0x355   : > { %4207 = vmatpush3.xpose.msk.msra.mxu0 %vm553_vm2, %v808_v36  ;;  %4208 = vmatprep.mubr.msk.f32.mxu0 %vm4681_vm0, %v4679_v2 }
 0x356   : > { %4211 = vmatprep.subr.mxu0 %v4679_v2 }
 0x357   : > { %v895_v62 = vpop.permute.xlu1 %894 }
 0x358   : > { %4209 = vmatmul.mubr.msk.f32.vlgmr.msra.gmra.mxu0 %vm553_vm2, %v806_v38  ;;  %v1171_v38 = vrot.slane %v1139_v53, %v4955_v54 }
 0x359   : > { %4213 = vmatprep.mubr.msk.f32.mxu0 %vm4681_vm0, %v4679_v2 }
 0x35b   : > { %v5047_v63 = vpop.permute.xlu1 %900 }
 0x35f   : > { %v1121_v10 = vpop.permute.xlu1 %1120 }
 0x360   : > { %v1147_v28 = vrot.slane %v1121_v10, %v4955_v54 }
 0x362   : > { %v1172_v33 = vsel %vm695_vm3, %v1147_v28, %v1143_v32  ;;  %v1379_v28 = vrot.slane %v1353_v60, %v4955_v54  ;;  %v923_v32 = vrot.slane %v895_v62, %v4955_v54 }
 0x363   : > { %v1173_v41 = vsel %vm697_vm4, %v1151_v34, %v1172_v33 }
 0x364   : > { %v5049_v11 = vpop.permute.xlu1 %903  ;;  %v1174_v46 = vsel %vm699_vm5, %v1155_v44, %v1173_v41  ;;  %v1365_v41 = vpop.permute.xlu0 %1364 }
 0x368   : > { %v5051_v13 = vpop.permute.xlu1 %906 }
 0x36d   : > { %v1130_v15 = vpop.permute.xlu1 %1129 }
 0x36e   : > { %v1159_v42 = vrot.slane %v1130_v15, %v4955_v54 }
 0x370   : > { %v1175_v55 = vsel %vm701_vm6, %v1159_v42, %v1174_v46 }
 0x371   : > { %v1176_v59 = vsel %vm703_vm7, %v1163_v57, %v1175_v55  ;;  %v927_v55 = vrot.slane %v5053_v14, %v4955_v54 }
 0x372   : > { %v1350_v17 = vpop.permute.xlu1 %1349 }
 0x373   : > { %v1375_v10 = vrot.slane %v1350_v17, %v4955_v54  ;;  %v940_v17 = vsel %vm695_vm3, %v915_v16, %v911_v45 }
 0x375   : > { %v1404_v12 = vsel %vm695_vm3, %v1379_v28, %v1375_v10 }
 0x377   : > { %v1136_v22 = vpop.permute.xlu1 %1135 }
 0x378   : > { %v1167_v56 = vrot.slane %v1136_v22, %v4955_v54 }
 0x37a   : > { %v1177_v36 = vsel %vm705_vm8, %v1167_v56, %v1176_v59  ;;  %v935_v56 = vrot.slane %v5049_v11, %v4955_v54  ;;  %v1395_v59 = vrot.slane %v1365_v41, %v4955_v54 }
 0x37b   : > { %v1178_v25 = vsel %vm707_vm9, %v1171_v38, %v1177_v36  ;;  %v939_v36 = vrot.slane %v5051_v13, %v4955_v54 }
 0x37c   : > { %v1356_v30 = vpop.permute.xlu1 %1355 }
 0x37d   : > { %v1383_v22 = vrot.slane %v1356_v30, %v4955_v54  ;;  %v941_v30 = vsel %vm697_vm4, %v919_v18, %v940_v17 }
 0x37e   : > { %v942_v62 = vsel %vm699_vm5, %v923_v32, %v941_v30 }
 0x37f   : > { %v1405_v42 = vsel %vm697_vm4, %v1383_v22, %v1404_v12 }
 0x380   : > { %v1359_v39 = vpop.permute.xlu1 %1358 }
 0x381   : > { %v1387_v33 = vrot.slane %v1359_v39, %v4955_v54  ;;  %v931_v39 = vrot.slane %v5047_v63, %v4955_v54 }
 0x383   : > { %v1406_v46 = vsel %vm699_vm5, %v1387_v33, %v1405_v42 }
 0x384   : > { %v1362_v58 = vpop.permute.xlu1 %1361 }
 0x385   : > { %v1391_v49 = vrot.slane %v1362_v58, %v4955_v54 }
 0x387   : > { %v1407_v57 = vsel %vm701_vm6, %v1391_v49, %v1406_v46 }
 0x388   : > { %v1368_v43 = vpop.permute.xlu1 %1367 }
 0x389   : > { %v1399_v58 = vrot.slane %v1368_v43, %v4955_v54 }
 0x38c   : > { %v1371_v44 = vpop.permute.xlu1 %1370 }
 0x38d   : > { %v1403_v63 = vrot.slane %v1371_v44, %v4955_v54 }
 0x40b   : > { %v1111_v47 = vpop.f32.mrf.mxu1 }
 0x40c   : > { %v1115_v61 = vmul.f32 0.35355338, %v1111_v47  ;;  %v943_v47 = vsel %vm701_vm6, %v927_v55, %v942_v62 }
 0x40d   : > { %v4220_v40 = vpop.f32.mrf.mxu1  ;;  %v944_v14 = vsel %vm703_vm7, %v931_v39, %v943_v47 }
 0x40e   : > { %v1180_v15 = vadd.f32 %v1178_v25, %v1115_v61  ;;  %v1408_v61 = vsel %vm703_vm7, %v1395_v59, %v1407_v57  ;;  %v945_v43 = vsel %vm705_vm8, %v935_v56, %v944_v14 }
 0x40f   : > { %v1343_v27 = vpop.f32.mrf.mxu1  ;;  %v1409_v25 = vsel %vm705_vm8, %v1399_v58, %v1408_v61  ;;  %v946_v13 = vsel %vm707_vm9, %v939_v36, %v945_v43 }
 0x410   : > { %v1181_v34 = vadd.f32 %v1180_v15, %v4976_v35  ;;  %v1347_v60 = vmul.f32 0.35355338, %v1343_v27  ;;  %v1410_v45 = vsel %vm707_vm9, %v1403_v63, %v1409_v25 }
 0x411   : > { %v4230_v37 = vpop.f32.mrf.mxu1 }
 0x412   : > { %v1182_v50 = vsel %vm553_vm2, %v1181_v34, -inf  ;;  %v1412_v15 = vadd.f32 %v1410_v45, %v1347_v60 }
 0x413   : > { %1183 = vmax.xlane.f32.xlu1 %v1182_v50 }
 0x414   : > { %v5089_v53 = vpop.f32.mrf.mxu0  ;;  %v1413_v27 = vadd.f32 %v1412_v15, %v4976_v35 }
 0x416   : > { %v4205_v38 = vpop.f32.mrf.mxu0  ;;  %v1414_v28 = vsel %vm553_vm2, %v1413_v27, -inf }
 0x418   : > { %v879_v11 = vpop.f32.mrf.mxu0 }
 0x419   : > { %v883_v40 = vmul.f32 0.35355338, %v879_v11 }
 0x41a   : > { %v4210_v10 = vpop.f32.mrf.mxu0 }
 0x41b   : > { %v948_v16 = vadd.f32 %v946_v13, %v883_v40 }
 0x41d   : > { %v949_v18 = vadd.f32 %v948_v16, %v4976_v35 }
 0x41f   : > { %v950_v22 = vsel %vm553_vm2, %v949_v18, -inf }
 0x420   : > { %951 = vmax.xlane.f32.xlu0 %v950_v22 }
 0x424   : > { %1415 = vmax.xlane.f32.xlu0 %v1414_v28 }
 0x49c   : > { %v1184_v32 = vpop.xlane.xlu1 %1183 }
 0x49d   : > { %v1185_v33 = vsub.f32 %v1181_v34, %v1184_v32 }
 0x49f   : > { %v1186_v49 = vmul.f32 1.442695, %v1185_v33 }
 0x4a1   : > { %4552 = vpow2.f32 %v1186_v49 }
 0x4a9   : > { %v952_v37 = vpop.xlane.xlu0 %951 }
 0x4aa   : > { %v953_v17 = vsub.f32 %v949_v18, %v952_v37 }
 0x4ac   : > { %v954_v42 = vmul.f32 1.442695, %v953_v17 }
 0x4ad   : > { %v1416_v12 = vpop.xlane.xlu0 %1415 }
 0x4ae   : > { %v4553_v50 = vpop.eup %4552  ;;  %v1417_v41 = vsub.f32 %v1413_v27, %v1416_v12 }
 0x4af   : > { %v1188_v30 = vsel %vm553_vm2, %v4553_v50, 0.0 }
 0x4b0   : > { %v1418_v44 = vmul.f32 1.442695, %v1417_v41  ;;  %1189 = vadd.xlane.f32.xlu1 %v1188_v30 }
 0x4b2   : > { %4554 = vpow2.f32 %v1418_v44  ;;  %v297_v44 = vld [vmem:[%s5928_s3 + $0x20] sm:$0xff] }
 0x4b3   : > { %4556 = vpow2.f32 %v954_v42  ;;  %v300_v42 = vld [vmem:[%s5928_s3 + $0x38] sm:$0xff] }
 0x4bf   : > { %v4555_v62 = vpop.eup %4554 }
 0x4c0   : > { %v1420_v39 = vsel %vm553_vm2, %v4555_v62, 0.0  ;;  %v4557_v46 = vpop.eup %4556 }
 0x4c1   : > { %961 = vrot.lane.b32.xlu1 %v4909_v29, %s5937_s11  ;;  %1421 = vadd.xlane.f32.xlu0 %v1420_v39  ;;  %v956_v34 = vsel %vm553_vm2, %v4557_v46, 0.0  ;;  %v319_v39 = vld [vmem:[%s5929_s4 + $0x70] sm:$0xff]  ;;  %s5950_s11 = smov 48  }
 0x4c5   : > { %1425 = vrot.lane.b32.xlu1 %v4909_v29, %s5933_s14  ;;  %957 = vadd.xlane.f32.xlu0 %v956_v34  ;;  %s5934_s14 = smov 24   ;;  %v317_v34 = vld [vmem:[%s5929_s4 + $0x60] sm:$0xff] }
 0x4c9   : > { %1532 = vrot.lane.b32.xlu1 %v4793_v1, %s4680_s13 }
 0x4db   : > { %1193 = vrot.lane.b32.xlu0 %v4909_v29, %s5932_s15  ;;  %s5935_s15 = smov 16  }
 0x4df   : > { %1530 = vrot.lane.b32.xlu0 %v4801_v3, %s4680_s13 }
 0x4e3   : > { %1528 = vrot.lane.b32.xlu0 %v4821_v6, %s4680_s13 }
 0x539   : > { %v1190_v55 = vpop.xlane.xlu1 %1189 }
 0x53d   : > { %v962_v56 = vpop.permute.xlu1 %961 }
 0x53e   : > { %4212 = vmatpush3.msra.mxu0 %v962_v56  ;;  %v315_v56 = vld [vmem:[%s5929_s4 + $0x50] sm:$0xff] }
 0x53f   : > { %4221 = vmatprep.subr.mxu0 %v4679_v2 }
 0x541   : > { %v1426_v63 = vpop.permute.xlu1 %1425 }
 0x545   : > { %v1533_v47 = vpop.permute.xlu1 %1532 }
 0x546   : > { %4237 = vmatpush3.msra.mxu1 %v1533_v47 }
 0x547   : > { %4238 = vmatprep.subr.mxu1 %v4679_v2 }
 0x54a   : > { %v1422_v57 = vpop.xlane.xlu0 %1421 }
 0x54e   : > { %v958_v58 = vpop.xlane.xlu0 %957 }
 0x54f   : > { %4558 = vrcp.f32 %v958_v58  ;;  %v313_v58 = vld [vmem:[%s5929_s4 + $0x40] sm:$0xff] }
 0x550   : > { %4560 = vrcp.f32 %v1190_v55  ;;  %v316_v55 = vld [vmem:[%s5929_s4 + $0x58] sm:$0xff] }
 0x551   : > { %4562 = vrcp.f32 %v1422_v57  ;;  %v314_v57 = vld [vmem:[%s5929_s4 + $0x48] sm:$0xff] }
 0x552   : > { %v1194_v29 = vpop.permute.xlu0 %1193 }
 0x556   : > { %v1531_v60 = vpop.permute.xlu0 %1530 }
 0x557   : > { %4239 = vmatpush3.msra.mxu1 %v1531_v60  ;;  %v1628_v60 = vsub.s32 4, %v4895_v23 }
 0x558   : > { %4240 = vmatprep.subr.mxu1 %v4679_v2 }
 0x55a   : > { %v1529_v14 = vpop.permute.xlu0 %1528 }
 0x55b   : > { %4241 = vmatpush3.msra.mxu1 %v1529_v14  ;;  %v1633_v14 = vsub.s32 5, %v4895_v23 }
 0x55c   : > { %v4559_v1 = vpop.eup %4558  ;;  %4242 = vmatprep.subr.mxu1 %v4679_v2 }
 0x55d   : > { %v960_v59 = vmul.f32 %v4559_v1, %v4557_v46  ;;  %v4561_v36 = vpop.eup %4560  ;;  %v318_v46 = vld [vmem:[%s5929_s4 + $0x68] sm:$0xff]  ;;  %v312_v1 = vld [vmem:[%s5929_s4 + $0x38] sm:$0xff] }
 0x55e   : > { %v1192_v3 = vmul.f32 %v4561_v36, %v4553_v50  ;;  %v4563_v6 = vpop.eup %4562  ;;  %v310_v36 = vld [vmem:[%s5929_s4 + $0x28] sm:$0xff] }
 0x55f   : > { %4214 = vmatmul.mubr.msk.f32.vlgmr.msra.gmra.mxu0 %vm553_vm2, %v960_v59  ;;  %v1424_v38 = vmul.f32 %v4563_v6, %v4555_v62  ;;  %v320_v62 = vld [vmem:[%s5929_s4 + $0x78] sm:$0xff]  ;;  %v311_v59 = vld [vmem:[%s5929_s4 + $0x30] sm:$0xff] }
 0x560   : > { %4222 = vmatpush3.msra.mxu0 %v1194_v29  ;;  %4223 = vmatprep.mubr.msk.f32.mxu0 %vm4681_vm0, %v4679_v2  ;;  %v309_v29 = vld [vmem:[%s5929_s4 + $0x20] sm:$0xff]  ;;  %v307_v6 = vld [vmem:[%s5929_s4 + $0x10] sm:$0xff] }
 0x561   : > { %4231 = vmatprep.subr.mxu0 %v4679_v2 }
 0x563   : > { %4224 = vmatmul.mubr.msk.f32.vlgmr.msra.gmra.mxu0 %vm553_vm2, %v1192_v3  ;;  %v308_v3 = vld [vmem:[%s5929_s4 + $0x18] sm:$0xff] }
 0x564   : > { %4232 = vmatpush3.msra.mxu0 %v1426_v63  ;;  %4233 = vmatprep.mubr.msk.f32.mxu0 %vm4681_vm0, %v4679_v2 }
 0x565   : > { %4247 = vmatprep.subr.mxu0 %v4679_v2 }
 0x567   : > { %4234 = vmatmul.mubr.msk.f32.vlgmr.msra.gmra.mxu0 %vm553_vm2, %v1424_v38 }
 0x568   : > { %4255 = vmatprep.mubr.msk.f32.mxu0 %vm4681_vm0, %v4679_v2 }
 0x61f   : > { %v1033_v61 = vpop.f32.mrf.mxu0 }
 0x620   : > { %1502 = vrot.lane.b32.xlu1 %v1033_v61, %s5936_s16  ;;  %v1629_v61 = vrot.slane %v4905_v26, %v1628_v60 }
 0x621   : > { %v4215_v11 = vpop.f32.mrf.mxu0 }
 0x623   : > { %v1265_v25 = vpop.f32.mrf.mxu0 }
 0x624   : > { %1506 = vrot.lane.b32.xlu1 %v1265_v25, %s5935_s15  ;;  %s5951_s15 = smov 8  }
 0x625   : > { %v4225_v40 = vpop.f32.mrf.mxu0 }
 0x626   : > { %v1634_v40 = vrot.slane %v4905_v26, %v1633_v14 }
 0x627   : > { %v1497_v43 = vpop.f32.mrf.mxu0 }
 0x628   : > { %1526 = vrot.lane.b32.xlu1 %v4840_v8, %s4680_s13  ;;  %1510 = vrot.lane.b32.xlu0 %v1497_v43, %s5934_s14  ;;  %v5156_v8 = vsub.s32 1, %v4895_v23  ;;  %s5949_s14 = smov 40  }
 0x629   : > { %v4235_v45 = vpop.f32.mrf.mxu0 }
 0x692   : > { %v1503_v13 = vpop.permute.xlu1 %1502 }
 0x693   : > { %v1513_v15 = vsel %vm553_vm2, %v5089_v53, %v1503_v13  ;;  %v1521_v53 = vrot.slane %v4905_v26, %v5156_v8  ;;  %v4604_v13 = vld [vmem:[%s5928_s3 + $0x58] sm:$0xff] }
 0x696   : > { %v1507_v10 = vpop.permute.xlu1 %1506 }
 0x697   : > { %v1515_v16 = vsel %vm1514_vm10, %v1513_v15, %v1507_v10  ;;  %v4605_v10 = vld [vmem:[%s5928_s3 + $0x28] sm:$0xff] }
 0x698   : > { %v306_v15 = vld [vmem:[%s5929_s4 + $0x8] sm:$0xff] }
 0x69a   : > { %v1527_v18 = vpop.permute.xlu1 %1526  ;;  %v1511_v22 = vpop.permute.xlu0 %1510 }
 0x69b   : > { %v1517_v27 = vsel %vm1516_vm11, %v1515_v16, %v1511_v22  ;;  %4243 = vmatpush3.msra.mxu1 %v1527_v18 }
 0x69c   : > { %4245 = vmatmul.mubr.msk.f32.vlgmr.msra.gmra.mxu1 %vm327_vm1, %v1517_v27  ;;  %4258 = vmatprep.subr.mxu1 %v4679_v2 }
 0x69d   : > { %4290 = vmatprep.mubr.msk.f32.mxu1 %vm4681_vm0, %v4679_v2  ;;  %4259 = vmatpush3.msra.mxu1 %v320_v62  ;;  %v4700_v62 = vmov 1966171168  }
 0x69e   : > { %4260 = vmatprep.subr.mxu1 %v4679_v2 }
 0x69f   : > { %4261 = vmatpush3.msra.mxu1 %v319_v39  ;;  %v1967_v39 = vunpack.c.l.s4 %v4700_v62 }
 0x6a0   : > { %4262 = vmatprep.subr.mxu1 %v4679_v2 }
 0x6a1   : > { %4263 = vmatpush3.msra.mxu1 %v318_v46  ;;  %v1968_v46 = vunpack.c.0.s8 %v1967_v39 }
 0x6a2   : > { %4264 = vmatprep.subr.mxu1 %v4679_v2 }
 0x6a3   : > { %4265 = vmatpush3.msra.mxu1 %v317_v34 }
 0x6a4   : > { %4266 = vmatprep.subr.mxu1 %v4679_v2 }
 0x6a5   : > { %4267 = vmatpush3.msra.mxu1 %v316_v55 }
 0x6a6   : > { %4268 = vmatprep.subr.mxu1 %v4679_v2 }
 0x6a7   : > { %4269 = vmatpush3.msra.mxu1 %v315_v56 }
 0x6a8   : > { %4270 = vmatprep.subr.mxu1 %v4679_v2 }
 0x6a9   : > { %4271 = vmatpush3.msra.mxu1 %v314_v57 }
 0x6aa   : > { %4272 = vmatprep.subr.mxu1 %v4679_v2 }
 0x6ab   : > { %4273 = vmatpush3.msra.mxu1 %v313_v58 }
 0x6ac   : > { %4274 = vmatprep.subr.mxu1 %v4679_v2 }
 0x6ad   : > { %4275 = vmatpush3.msra.mxu1 %v312_v1 }
 0x6ae   : > { %4276 = vmatprep.subr.mxu1 %v4679_v2 }
 0x6af   : > { %4277 = vmatpush3.msra.mxu1 %v311_v59 }
 0x6b0   : > { %4278 = vmatprep.subr.mxu1 %v4679_v2 }
 0x6b1   : > { %4279 = vmatpush3.msra.mxu1 %v310_v36 }
 0x6b2   : > { %4280 = vmatprep.subr.mxu1 %v4679_v2 }
 0x6b3   : > { %4281 = vmatpush3.msra.mxu1 %v309_v29 }
 0x6b4   : > { %4282 = vmatprep.subr.mxu1 %v4679_v2 }
 0x6b5   : > { %4283 = vmatpush3.msra.mxu1 %v308_v3 }
 0x6b6   : > { %4284 = vmatprep.subr.mxu1 %v4679_v2 }
 0x6b7   : > { %4285 = vmatpush3.msra.mxu1 %v307_v6 }
 0x6b8   : > { %4286 = vmatprep.subr.mxu1 %v4679_v2 }
 0x6b9   : > { %4287 = vmatpush3.msra.mxu1 %v306_v15 }
 0x6ba   : > { %4288 = vmatprep.subr.mxu1 %v4679_v2 }
 0x75c   : > { %v1607_v28 = vpop.f32.mrf.mxu1 }
 0x75d   : > { %v1608_v32 = vadd.f32 %v1607_v28, %v1521_v53 }
 0x75e   : > { %v4246_v33 = vpop.f32.mrf.mxu1 }
 0x75f   : > { %v1611_v49 = vadd.f32 %v1608_v32, %v4859_v9  ;;  %v4606_v32 = vld [vmem:[%s4850_s17] sm:$0xff]  ;;  %v5299_v33 = vsub.s32 2, %v4895_v23 }
 0x761   : > { %v1612_v37 = vsel %vm327_vm1, %v1611_v49, 0.0 }
 0x762   : > { %1613 = vadd.xlane.f32.xlu0 %v1612_v37 }
 0x778   : > { %2060 = vrot.lane.b32.xlu0 %v4788_v0, %s4686_s9 }
 0x77c   : > { %2056 = vrot.lane.b32.xlu0 %v4806_v4, %s4686_s9 }
 0x780   : > { %2054 = vrot.lane.b32.xlu0 %v4828_v7, %s4686_s9 }
 0x784   : > { %1884 = vrot.lane.b32.xlu0 %v4806_v4, %s4683_s29  ;;  %v303_v4 = vld [vmem:[%s5928_s3 + $0x50] sm:$0xff] }
 0x785   : > { %4248 = vmatpush3.msra.mxu0 %v303_v4  ;;  %v5320_v4 = vld [vmem:[%s4855_s20 + $0x18] sm:$0xff] }
 0x786   : > { %4249 = vmatprep.subr.mxu0 %v4679_v2 }
 0x787   : > { %4250 = vmatpush3.msra.mxu0 %v300_v42  ;;  %v5325_v42 = vld [vmem:[%s4855_s20 + $0x20] sm:$0xff] }
 0x788   : > { %4251 = vmatprep.subr.mxu0 %v4679_v2 }
 0x789   : > { %4252 = vmatpush3.msra.mxu0 %v297_v44 }
 0x78a   : > { %4253 = vmatprep.subr.mxu0 %v4679_v2 }
 0x7eb   : > { %v1614_v17 = vpop.xlane.xlu0 %1613 }
 0x7ec   : > { %v1616_v12 = vmul.f32 0.03125, %v1614_v17 }
 0x7ee   : > { %v5170_v50 = vsub.f32 %v1611_v49, %v1616_v12  ;;  %v1639_v49 = vrot.slane %v4905_v26, %v5299_v33  ;;  %v5309_v26 = vld [vmem:[%s4855_s20 + $0x8] sm:$0xff] }
 0x7f0   : > { %v1618_v41 = vmul.f32 %v5170_v50, %v5170_v50 }
 0x7f2   : > { %v1619_v30 = vsel %vm327_vm1, %v1618_v41, 0.0  ;;  %v5304_v41 = vld [vmem:[%s4855_s20] sm:$0xff] }
 0x7f3   : > { %1620 = vadd.xlane.f32.xlu1 %v1619_v30  ;;  %v5315_v30 = vld [vmem:[%s4855_s20 + $0x10] sm:$0xff] }
 0x804   : > { %2058 = vrot.lane.b32.xlu1 %v4813_v5, %s4686_s9 }
 0x808   : > { %1888 = vrot.lane.b32.xlu1 %v4788_v0, %s4683_s29  ;;  %v294_v0 = vld [vmem:[%s5928_s3 + $0x8] sm:$0xff] }
 0x809   : > { %4254 = vmatpush3.msra.mxu0 %v294_v0 }
 0x80a   : > { %4293 = vmatprep.subr.mxu0 %v4679_v2 }
 0x80c   : > { %1886 = vrot.lane.b32.xlu1 %v4813_v5, %s4683_s29 }
 0x810   : > { %1882 = vrot.lane.b32.xlu1 %v4828_v7, %s4683_s29 }
 0x87c   : > { %v1621_v63 = vpop.xlane.xlu1 %1620 }
 0x87d   : > { %v1622_v38 = vmul.f32 0.03125, %v1621_v63 }
 0x87f   : > { %v1623_v47 = vadd.f32 1e-05, %v1622_v38 }
 0x880   : > { %v2059_v16 = vpop.permute.xlu1 %2058 }
 0x881   : > { %4564 = vrsqrt.f32 %v1623_v47 }
 0x884   : > { %v1889_v18 = vpop.permute.xlu1 %1888 }
 0x888   : > { %v1887_v27 = vpop.permute.xlu1 %1886 }
 0x88c   : > { %v1883_v28 = vpop.permute.xlu1 %1882 }
 0x88e   : > { %v4565_v11 = vpop.eup %4564 }
 0x88f   : > { %v1625_v25 = vmul.f32 %v4565_v11, %v5170_v50 }
 0x891   : > { %v1630_v43 = vmul.f32 %v1629_v61, %v1625_v25 }
 0x893   : > { %v5264_v45 = vadd.f32 %v1634_v40, %v1630_v43 }
 0x895   : > { %4256 = vmatmul.mubr.msk.f32.vlgmr.msra.gmra.mxu0 %vm327_vm1, %v5264_v45 }
 0x896   : > { %4294 = vmatpush3.msra.mxu0 %v4604_v13  ;;  %4301 = vmatprep.mubr.msk.f32.mxu0 %vm4681_vm0, %v4679_v2 }
 0x897   : > { %4295 = vmatprep.subr.mxu0 %v4679_v2 }
 0x898   : > { %4296 = vmatpush3.msra.mxu0 %v4813_v5  ;;  %v2061_v5 = vpop.permute.xlu0 %2060 }
 0x899   : > { %4297 = vmatprep.subr.mxu0 %v4679_v2 }
 0x89a   : > { %4298 = vmatpush3.msra.mxu0 %v4605_v10 }
 0x89b   : > { %4299 = vmatprep.subr.mxu0 %v4679_v2 }
 0x89c   : > { %4300 = vmatpush3.msra.mxu0 %v4828_v7  ;;  %v305_v7 = vld [vmem:[%s5929_s4] sm:$0xff] }
 0x89d   : > { %4302 = vmatmul.mubr.msk.f32.vlgmr.msra.gmra.mxu0 %vm327_vm1, %v4859_v9  ;;  %4304 = vmatprep.subr.mxu0 %v4679_v2  ;;  %v2057_v9 = vpop.permute.xlu0 %2056 }
 0x89e   : > { %4312 = vmatprep.mubr.msk.f32.mxu0 %vm4681_vm0, %v4679_v2  ;;  %4289 = vmatpush3.msra.mxu1 %v305_v7 }
 0x89f   : > { %4315 = vmatprep.subr.mxu1 %v2061_v5  ;;  %4305 = vmatpush3.msra.mxu0 %v1889_v18 }
 0x8a0   : > { %4306 = vmatprep.subr.mxu0 %v4679_v2 }
 0x8a1   : > { %v2055_v22 = vpop.permute.xlu0 %2054  ;;  %4307 = vmatpush3.msra.mxu0 %v1887_v27 }
 0x8a2   : > { %4308 = vmatprep.subr.mxu0 %v4679_v2 }
 0x8a5   : > { %v1885_v53 = vpop.permute.xlu0 %1884 }
 0x8a6   : > { %4309 = vmatpush3.msra.mxu0 %v1885_v53 }
 0x8a7   : > { %4310 = vmatprep.subr.mxu0 %v4679_v2 }
 0x8a8   : > { %4311 = vmatpush3.msra.mxu0 %v1883_v28 }
 0x8a9   : > { %4313 = vmatmul.mubr.msk.f32.vlgmr.msra.gmra.mxu0 %vm327_vm1, %v4606_v32 }
 0x955   : > { %v1709_v37 = vpop.f32.mrf.mxu0 }
 0x956   : > { %v1710_v17 = vadd.f32 %v1709_v37, %v1639_v49 }
 0x957   : > { %v4257_v12 = vpop.f32.mrf.mxu0 }
 0x958   : > { %v1713_v50 = vmax.f32 %v1710_v17, 0.0 }
 0x95a   : > { %4291 = vmatmul.mubr.f32.vlgmr.msra.gmra.mxu1 %v1713_v50 }
 0x95b   : > { %4316 = vmatpush3.msra.mxu1 %v2061_v5  ;;  %4323 = vmatprep.mubr.msk.f32.mxu1 %vm327_vm1, %v5304_v41 }
 0x95c   : > { %4317 = vmatprep.subr.mxu1 %v2059_v16 }
 0x95d   : > { %4318 = vmatpush3.msra.mxu1 %v2059_v16  ;;  %v1878_v44 = vpop.f32.mrf.mxu0 }
 0x95e   : > { %4319 = vmatprep.subr.mxu1 %v2057_v9  ;;  %v1965_v55 = vcombine.high %v1878_v44, %v1878_v44 }
 0x95f   : > { %4320 = vmatpush3.msra.mxu1 %v2057_v9  ;;  %v4303_v0 = vpop.f32.mrf.mxu0  ;;  %v5359_v9 = vld [vmem:[%s5930_s5 + $0x8] sm:$0xf] }
 0x960   : > { %4321 = vmatprep.subr.mxu1 %v2055_v22  ;;  %v2182_v18 = vrot.slane %v5359_v9, %v4898_v24 }
 0x961   : > { %4322 = vmatpush3.msra.mxu1 %v2055_v22 }
 0x962   : > { %4324 = vmatmul.mubr.msk.f32.vlgmr.msra.gmra.mxu1 %vm327_vm1, %v5309_v26  ;;  %4335 = vmatprep.subr.mxu1 %v4679_v2 }
 0x963   : > { %4326 = vmatprep.mubr.msk.f32.mxu1 %vm327_vm1, %v5315_v30 }
 0x966   : > { %4327 = vmatmul.mubr.msk.f32.gmra.mxu1 %vm327_vm1, %v5320_v4 }
 0x967   : > { %4329 = vmatprep.mubr.msk.f32.mxu1 %vm327_vm1, %v5325_v42 }
 0x969   : > { %v5337_v34 = vpop.f32.mrf.mxu0 }
 0x96a   : > { %4330 = vmatmul.mubr.msk.f32.gmra.mxu1 %vm327_vm1, %v4879_v19  ;;  %v1971_v19 = vsub.s32 %v1968_v46, %v4895_v23 }
 0x96b   : > { %4332 = vmatprep.mubr.msk.f32.mxu1 %vm327_vm1, %v4882_v20  ;;  %v4314_v56 = vpop.f32.mrf.mxu0 }
 0x96c   : > { %v1979_v57 = vrot.slane %v1965_v55, %v1971_v19  ;;  %v1972_v20 = vrot.slane %v1878_v44, %v1971_v19 }
 0x96e   : > { %4333 = vmatmul.mubr.msk.f32.gmra.mxu1 %vm327_vm1, %v4889_v21  ;;  %v1995_v58 = vrot.slane %v1979_v57, %v1971_v19  ;;  %v5343_v21 = vld [vmem:[%s5930_s5] sm:$0xff]  ;;  %v1980_v59 = vcombine.high %v1972_v20, %v1972_v20  ;;  %v1988_v63 = vrot.slane %v1972_v20, %v1971_v19  ;;  %v1981_v47 = vcombine.high %v1979_v57, %v1979_v57 }
 0x96f   : > { %4343 = vmatprep.mubr.msk.f32.mxu1 %vm4681_vm0, %v4679_v2  ;;  %v1717_v1 = vrot.slane %v5343_v21, %v4914_v31 }
 0x970   : > { %v2002_v3 = vrot.slane %v1980_v59, %v1971_v19  ;;  %v2017_v40 = vrot.slane %v1988_v63, %v4898_v24  ;;  %v2010_v43 = vcombine.high %v1988_v63, %v1988_v63  ;;  %v2009_v10 = vrot.slane %v1981_v47, %v1971_v19 }
 0x971   : > { %v2011_v12 = vcombine.high %v1995_v58, %v1995_v58  ;;  %v2033_v62 = vrot.slane %v1995_v58, %v4898_v24 }
 0x972   : > { %v2021_v11 = vrot.slane %v2002_v3, %v4898_v24  ;;  %v2012_v25 = vcombine.high %v2002_v3, %v2002_v3  ;;  %v2037_v53 = vrot.slane %v2009_v10, %v4898_v24  ;;  %v2013_v37 = vcombine.high %v2009_v10, %v2009_v10  ;;  %v4614_v10 = vld [vmem:[%s4855_s20 + $0x28] sm:$0xff] }
 0x973   : > { %v2041_v59 = vrot.slane %v2011_v12, %v4898_v24 }
 0x974   : > { %v2029_v15 = vrot.slane %v2012_v25, %v4898_v24  ;;  %v2045_v57 = vrot.slane %v2013_v37, %v4898_v24 }
 0xa1a   : > { %v1784_v36 = vpop.f32.mrf.mxu1 }
 0xa1b   : > { %v1785_v29 = vadd.f32 %v1784_v36, %v1717_v1 }
 0xa1c   : > { %v4292_v6 = vpop.f32.mrf.mxu1 }
 0xa1d   : > { %v5348_v38 = vadd.f32 %v1785_v29, %v5264_v45  ;;  %v2025_v45 = vrot.slane %v2010_v43, %v4898_v24 }
 0xa1f   : > { %v1789_v61 = vsel %vm327_vm1, %v5348_v38, 0.0 }
 0xa20   : > { %1790 = vadd.xlane.f32.xlu0 %v1789_v61 }
 0xa22   : > { %v4325_v13 = vpop.f32.mrf.mxu1 }
 0xa23   : > { %v2138_v5 = vadd.f32 %v4325_v13, %v2021_v11 }
 0xa24   : > { %v2132_v16 = vpop.f32.mrf.mxu1 }
 0xa25   : > { %v2133_v7 = vadd.f32 %v2132_v16, %v2017_v40  ;;  %v2172_v22 = vadd.f32 %v2138_v5, %v5337_v34 }
 0xa26   : > { %v4328_v27 = vpop.f32.mrf.mxu1 }
 0xa27   : > { %v2148_v28 = vadd.f32 %v4328_v27, %v2029_v15  ;;  %v2171_v32 = vadd.f32 %v2133_v7, %v5337_v34  ;;  %v2184_v49 = vadd.f32 %v2182_v18, %v2172_v22  ;;  %v4615_v22 = vld [vmem:[%s4855_s20 + $0x38] sm:$0xff] }
 0xa28   : > { %v2142_v17 = vpop.f32.mrf.mxu1 }
 0xa29   : > { %v2174_v50 = vadd.f32 %v2148_v28, %v5337_v34  ;;  %v2143_v44 = vadd.f32 %v2142_v17, %v2025_v45  ;;  %v2183_v0 = vadd.f32 %v2182_v18, %v2171_v32  ;;  %v2192_v46 = vadd.f32 %v5309_v26, %v2184_v49 }
 0xa2a   : > { %v4331_v39 = vpop.f32.mrf.mxu1 }
 0xa2b   : > { %v2173_v55 = vadd.f32 %v2143_v44, %v5337_v34  ;;  %v5371_v56 = vadd.f32 %v5304_v41, %v2183_v0  ;;  %v2158_v19 = vadd.f32 %v4331_v39, %v2037_v53  ;;  %v2186_v1 = vadd.f32 %v2182_v18, %v2174_v50  ;;  %v4616_v50 = vld [vmem:[%s4855_s20 + $0x30] sm:$0xff]  ;;  %s5948_s20 = smov 56  }
 0xa2c   : > { %v2152_v20 = vpop.f32.mrf.mxu1  ;;  %v2202_v3 = vsel %vm327_vm1, %v2192_v46, 0.0 }
 0xa2d   : > { %v2199_v36 = vsel %vm327_vm1, %v5371_v56, 0.0  ;;  %v2176_v58 = vadd.f32 %v2158_v19, %v5337_v34  ;;  %v2153_v29 = vadd.f32 %v2152_v20, %v2033_v62  ;;  %v2185_v26 = vadd.f32 %v2182_v18, %v2173_v55 }
 0xa2e   : > { %2200 = vadd.xlane.f32.xlu0 %v2199_v36  ;;  %v4334_v41 = vpop.f32.mrf.mxu1  ;;  %v2194_v47 = vadd.f32 %v5320_v4, %v2186_v1 }
 0xa2f   : > { %v2175_v6 = vadd.f32 %v2153_v29, %v5337_v34  ;;  %v2168_v63 = vadd.f32 %v4334_v41, %v2045_v57  ;;  %v2188_v61 = vadd.f32 %v2182_v18, %v2176_v58 }
 0xa30   : > { %v2162_v11 = vpop.f32.mrf.mxu1  ;;  %v2208_v13 = vsel %vm327_vm1, %v2194_v47, 0.0 }
 0xa31   : > { %v2178_v25 = vadd.f32 %v2168_v63, %v5337_v34  ;;  %v2163_v40 = vadd.f32 %v2162_v11, %v2041_v59  ;;  %v2187_v43 = vadd.f32 %v2182_v18, %v2175_v6  ;;  %v2196_v5 = vadd.f32 %v4614_v10, %v2188_v61  ;;  %v3976_v63 = vld [vmem:[%s5928_s3 + $0xb8] sm:$0xff]  ;;  %v5434_v61 = vld [vmem:[%s5928_s3 + $0xa8] sm:$0xff] }
 0xa32   : > { %2203 = vadd.xlane.f32.xlu0 %v2202_v3  ;;  %4336 = vmatpush3.msra.mxu1 %v5434_v61 }
 0xa33   : > { %v2190_v15 = vadd.f32 %v2182_v18, %v2178_v25  ;;  %v2177_v16 = vadd.f32 %v2163_v40, %v5337_v34  ;;  %v2214_v45 = vsel %vm327_vm1, %v2196_v5, 0.0  ;;  %v5400_v17 = vadd.f32 %v5325_v42, %v2187_v43  ;;  %4337 = vmatprep.subr.mxu1 %v4679_v2  ;;  %v5443_v25 = vld [vmem:[%s5928_s3 + $0x90] sm:$0xff]  ;;  %v5450_v40 = vld [vmem:[%s5928_s3 + $0x78] sm:$0xff]  ;;  %v5457_v43 = vld [vmem:[%s5928_s3 + $0x60] sm:$0xff] }
 0xa34   : > { %4338 = vmatpush3.msra.mxu1 %v5443_v25 }
 0xa35   : > { %v2189_v7 = vadd.f32 %v2182_v18, %v2177_v16  ;;  %v2198_v4 = vadd.f32 %v4615_v22, %v2190_v15  ;;  %v5395_v18 = vadd.f32 %v5315_v30, %v2185_v26  ;;  %4339 = vmatprep.subr.mxu1 %v4679_v2 }
 0xa36   : > { %2209 = vadd.xlane.f32.xlu0 %v2208_v13  ;;  %4340 = vmatpush3.msra.mxu1 %v5450_v40  ;;  %v3973_v13 = vld [vmem:[%s5928_s3 + $0xa0] sm:$0xff] }
 0xa37   : > { %v2220_v27 = vsel %vm327_vm1, %v2198_v4, 0.0  ;;  %v2205_v37 = vsel %vm327_vm1, %v5395_v18, 0.0  ;;  %v5405_v44 = vadd.f32 %v4616_v50, %v2189_v7  ;;  %4341 = vmatprep.subr.mxu1 %v4679_v2 }
 0xa38   : > { %4342 = vmatpush3.msra.mxu1 %v5457_v43 }
 0xa39   : > { %v2217_v30 = vsel %vm327_vm1, %v5405_v44, 0.0  ;;  %4366 = vmatprep.subr.mxu1 %v4679_v2 }
 0xa3a   : > { %2215 = vadd.xlane.f32.xlu0 %v2214_v45 }
 0xa3e   : > { %2221 = vadd.xlane.f32.xlu0 %v2220_v27 }
 0xaa9   : > { %v1791_v53 = vpop.xlane.xlu0 %1790 }
 0xaaa   : > { %v1792_v28 = vmul.f32 0.03125, %v1791_v53 }
 0xaac   : > { %v5389_v32 = vsub.f32 %v5348_v38, %v1792_v28  ;;  %v2211_v38 = vsel %vm327_vm1, %v5400_v17, 0.0 }
 0xaae   : > { %v1794_v49 = vmul.f32 %v5389_v32, %v5389_v32 }
 0xab0   : > { %v1795_v34 = vsel %vm327_vm1, %v1794_v49, 0.0 }
 0xab1   : > { %1796 = vadd.xlane.f32.xlu1 %v1795_v34 }
 0xab5   : > { %2206 = vadd.xlane.f32.xlu1 %v2205_v37 }
 0xab7   : > { %v2201_v12 = vpop.xlane.xlu0 %2200 }
 0xab8   : > { %v2223_v10 = vmul.f32 0.03125, %v2201_v12 }
 0xab9   : > { %2212 = vadd.xlane.f32.xlu1 %v2211_v38  ;;  %v1804_v38 = vsub.s32 6, %v4895_v23 }
 0xabb   : > { %v2204_v0 = vpop.xlane.xlu0 %2203 }
 0xabc   : > { %v2224_v62 = vmul.f32 0.03125, %v2204_v0  ;;  %v1809_v0 = vsub.s32 7, %v4895_v23 }
 0xabd   : > { %2218 = vadd.xlane.f32.xlu1 %v2217_v30 }
 0xabe   : > { %v5409_v39 = vsub.f32 %v2192_v46, %v2224_v62 }
 0xabf   : > { %v2210_v55 = vpop.xlane.xlu0 %2209 }
 0xac0   : > { %v2226_v42 = vmul.f32 0.03125, %v2210_v55  ;;  %v2240_v19 = vmul.f32 %v5409_v39, %v5409_v39 }
 0xac2   : > { %v5413_v57 = vsub.f32 %v2194_v47, %v2226_v42  ;;  %v2250_v20 = vsel %vm327_vm1, %v2240_v19, 0.0  ;;  %v1810_v19 = vrot.slane %v5343_v21, %v1809_v0 }
 0xac3   : > { %2251 = vadd.xlane.f32.xlu0 %v2250_v20  ;;  %v2216_v1 = vpop.xlane.xlu0 %2215 }
 0xac4   : > { %v2228_v59 = vmul.f32 0.03125, %v2216_v1  ;;  %v2242_v36 = vmul.f32 %v5413_v57, %v5413_v57 }
 0xac6   : > { %v5418_v58 = vsub.f32 %v2196_v5, %v2228_v59  ;;  %v2256_v46 = vsel %vm327_vm1, %v2242_v36, 0.0  ;;  %v2231_v5 = vsub.f32 %v5371_v56, %v2223_v10  ;;  %v3967_v10 = vld [vmem:[%s5928_s3 + $0x70] sm:$0xff] }
 0xac7   : > { %2257 = vadd.xlane.f32.xlu0 %v2256_v46  ;;  %v2222_v29 = vpop.xlane.xlu0 %2221 }
 0xac8   : > { %v2230_v26 = vmul.f32 0.03125, %v2222_v29  ;;  %v2244_v3 = vmul.f32 %v5418_v58, %v5418_v58  ;;  %v2239_v15 = vmul.f32 %v2231_v5, %v2231_v5 }
 0xaca   : > { %v5423_v41 = vsub.f32 %v2198_v4, %v2230_v26  ;;  %v2262_v6 = vsel %vm327_vm1, %v2244_v3, 0.0  ;;  %v2247_v16 = vsel %vm327_vm1, %v2239_v15, 0.0  ;;  %v5509_v15 = vrot.slane %v5359_v9, %v5156_v8 }
 0xacb   : > { %2263 = vadd.xlane.f32.xlu0 %v2262_v6 }
 0xacc   : > { %v2246_v47 = vmul.f32 %v5423_v41, %v5423_v41 }
 0xace   : > { %2451 = vrot.lane.b32.xlu1 %v3976_v63, %s4680_s13  ;;  %v2268_v11 = vsel %vm327_vm1, %v2246_v47, 0.0 }
 0xacf   : > { %2269 = vadd.xlane.f32.xlu0 %v2268_v11 }
 0xae5   : > { %2449 = vrot.lane.b32.xlu0 %v3973_v13, %s4680_s13 }
 0xaf2   : > { %2248 = vadd.xlane.f32.xlu1 %v2247_v16  ;;  %v5513_v16 = vrot.slane %v5359_v9, %v5299_v33 }
 0xb3a   : > { %v1797_v7 = vpop.xlane.xlu1 %1796 }
 0xb3b   : > { %v1798_v45 = vmul.f32 0.03125, %v1797_v7 }
 0xb3d   : > { %v1799_v22 = vadd.f32 1e-05, %v1798_v45 }
 0xb3e   : > { %v2207_v4 = vpop.xlane.xlu1 %2206 }
 0xb3f   : > { %4566 = vrsqrt.f32 %v1799_v22  ;;  %v2225_v27 = vmul.f32 0.03125, %v2207_v4 }
 0xb41   : > { %v5468_v53 = vsub.f32 %v5395_v18, %v2225_v27 }
 0xb42   : > { %v2213_v28 = vpop.xlane.xlu1 %2212 }
 0xb43   : > { %v2227_v49 = vmul.f32 0.03125, %v2213_v28  ;;  %v2241_v34 = vmul.f32 %v5468_v53, %v5468_v53 }
 0xb45   : > { %v5473_v56 = vsub.f32 %v5400_v17, %v2227_v49  ;;  %v2253_v37 = vsel %vm327_vm1, %v2241_v34, 0.0  ;;  %v1805_v17 = vrot.slane %v5343_v21, %v1804_v38 }
 0xb46   : > { %v2219_v12 = vpop.xlane.xlu1 %2218  ;;  %2254 = vadd.xlane.f32.xlu1 %v2253_v37 }
 0xb47   : > { %v2243_v50 = vmul.f32 %v5473_v56, %v5473_v56  ;;  %v2229_v21 = vmul.f32 0.03125, %v2219_v12 }
 0xb49   : > { %v2259_v18 = vsel %vm327_vm1, %v2243_v50, 0.0  ;;  %v5499_v26 = vsub.f32 %v5405_v44, %v2229_v21 }
 0xb4a   : > { %2260 = vadd.xlane.f32.xlu1 %v2259_v18  ;;  %v2452_v62 = vpop.permute.xlu1 %2451 }
 0xb4b   : > { %4346 = vmatprep.subr.mxu0 %v2452_v62  ;;  %v2245_v3 = vmul.f32 %v5499_v26, %v5499_v26 }
 0xb4c   : > { %v4567_v30 = vpop.eup %4566  ;;  %v2252_v55 = vpop.xlane.xlu0 %2251  ;;  %4347 = vmatpush3.msra.mxu0 %v2452_v62 }
 0xb4d   : > { %v1801_v42 = vmul.f32 %v4567_v30, %v5389_v32  ;;  %v3970_v32 = vld [vmem:[%s5928_s3 + $0x88] sm:$0xff]  ;;  %v2265_v11 = vsel %vm327_vm1, %v2245_v3, 0.0  ;;  %v2272_v28 = vmul.f32 0.03125, %v2252_v55 }
 0xb4f   : > { %v1806_v20 = vmul.f32 %v1805_v17, %v1801_v42 }
 0xb50   : > { %v2258_v1 = vpop.xlane.xlu0 %2257 }
 0xb51   : > { %v5488_v59 = vadd.f32 %v1810_v19, %v1806_v20  ;;  %v2274_v34 = vmul.f32 0.03125, %v2258_v1 }
 0xb53   : > { %4344 = vmatmul.mubr.msk.f32.vlgmr.msra.gmra.mxu1 %vm327_vm1, %v5488_v59  ;;  %v2282_v12 = vadd.f32 1e-05, %v2274_v34 }
 0xb54   : > { %v2264_v36 = vpop.xlane.xlu0 %2263  ;;  %4368 = vmatprep.mubr.msk.f32.mxu1 %vm4681_vm0, %v4679_v2 }
 0xb55   : > { %v2276_v50 = vmul.f32 0.03125, %v2264_v36 }
 0xb57   : > { %v2284_v62 = vadd.f32 1e-05, %v2276_v50 }
 0xb58   : > { %v2270_v46 = vpop.xlane.xlu0 %2269 }
 0xb59   : > { %v2278_v17 = vmul.f32 0.03125, %v2270_v46 }
 0xb5b   : > { %2447 = vrot.lane.b32.xlu1 %v3970_v32, %s4680_s13  ;;  %v2286_v19 = vadd.f32 1e-05, %v2278_v17 }
 0xb5c   : > { %v2450_v29 = vpop.permute.xlu0 %2449 }
 0xb5d   : > { %4348 = vmatprep.subr.mxu0 %v2450_v29 }
 0xb5e   : > { %4349 = vmatpush3.msra.mxu0 %v2450_v29 }
 0xb7b   : > { %v2249_v6 = vpop.xlane.xlu1 %2248 }
 0xb7c   : > { %v2271_v63 = vmul.f32 0.03125, %v2249_v6 }
 0xb7e   : > { %v2279_v47 = vadd.f32 1e-05, %v2271_v63 }
 0xb7f   : > { %2266 = vadd.xlane.f32.xlu1 %v2265_v11 }
 0xb80   : > { %4568 = vrsqrt.f32 %v2279_v47 }
 0xb8d   : > { %v4569_v13 = vpop.eup %4568 }
 0xb8e   : > { %v2295_v44 = vmul.f32 %v4569_v13, %v2231_v5  ;;  %v2280_v5 = vadd.f32 1e-05, %v2272_v28 }
 0xb90   : > { %v2307_v7 = vmul.f32 %v5509_v15, %v2295_v44  ;;  %2445 = vrot.lane.b32.xlu1 %v3967_v10, %s4680_s13  ;;  %4570 = vrsqrt.f32 %v2280_v5 }
 0xb92   : > { %v2319_v45 = vadd.f32 %v5513_v16, %v2307_v7 }
 0xb94   : > { %4354 = vmatprep.mubr.msk.f32.mxu0 %vm327_vm1, %v2319_v45 }
 0xb9d   : > { %v4571_v30 = vpop.eup %4570 }
 0xb9e   : > { %v2296_v55 = vmul.f32 %v4571_v30, %v5409_v39 }
 0xba0   : > { %v2308_v36 = vmul.f32 %v5509_v15, %v2296_v55 }
 0xba2   : > { %v2320_v39 = vadd.f32 %v5513_v16, %v2308_v36 }
 0xbcf   : > { %v2255_v22 = vpop.xlane.xlu1 %2254 }
 0xbd0   : > { %v2273_v49 = vmul.f32 0.03125, %v2255_v22 }
 0xbd2   : > { %v2281_v37 = vadd.f32 1e-05, %v2273_v49 }
 0xbd3   : > { %v2261_v4 = vpop.xlane.xlu1 %2260 }
 0xbd4   : > { %v2275_v9 = vmul.f32 0.03125, %v2261_v4  ;;  %4572 = vrsqrt.f32 %v2281_v37 }
 0xbd5   : > { %4574 = vrsqrt.f32 %v2282_v12 }
 0xbd6   : > { %v2283_v18 = vadd.f32 1e-05, %v2275_v9 }
 0xbd7   : > { %v2448_v27 = vpop.permute.xlu1 %2447 }
 0xbd8   : > { %4350 = vmatprep.subr.mxu0 %v2448_v27  ;;  %4576 = vrsqrt.f32 %v2283_v18 }
 0xbd9   : > { %4351 = vmatpush3.msra.mxu0 %v2448_v27  ;;  %4578 = vrsqrt.f32 %v2284_v62 }
 0xbda   : > { %4580 = vrsqrt.f32 %v2286_v19 }
 0xbe1   : > { %v4573_v42 = vpop.eup %4572 }
 0xbe2   : > { %v4575_v20 = vpop.eup %4574  ;;  %v2297_v1 = vmul.f32 %v4573_v42, %v5468_v53  ;;  %v5529_v53 = vld [vmem:[%s5930_s5 + $0x10] sm:$0xff] }
 0xbe3   : > { %v2298_v3 = vmul.f32 %v4575_v20, %v5413_v57  ;;  %v2363_v44 = vrot.slane %v5529_v53, %v4898_v24 }
 0xbe4   : > { %v2309_v63 = vmul.f32 %v5509_v15, %v2297_v1 }
 0xbe5   : > { %v4577_v32 = vpop.eup %4576  ;;  %v2310_v13 = vmul.f32 %v5509_v15, %v2298_v3 }
 0xbe6   : > { %v4579_v6 = vpop.eup %4578  ;;  %v2299_v46 = vmul.f32 %v4577_v32, %v5473_v56  ;;  %v2321_v10 = vadd.f32 %v5513_v16, %v2309_v63 }
 0xbe7   : > { %v2300_v57 = vmul.f32 %v4579_v6, %v5418_v58  ;;  %v2322_v7 = vadd.f32 %v5513_v16, %v2310_v13  ;;  %v4581_v27 = vpop.eup %4580 }
 0xbe8   : > { %v2311_v56 = vmul.f32 %v5509_v15, %v2299_v46  ;;  %v2302_v24 = vmul.f32 %v4581_v27, %v5423_v41  ;;  %v3994_v41 = vld [vmem:[%s5930_s5 + $0x18] sm:$0xf] }
 0xbe9   : > { %v2312_v45 = vmul.f32 %v5509_v15, %v2300_v57 }
 0xbea   : > { %v2323_v58 = vadd.f32 %v5513_v16, %v2311_v56  ;;  %v2314_v37 = vmul.f32 %v5509_v15, %v2302_v24 }
 0xbeb   : > { %v2324_v49 = vadd.f32 %v5513_v16, %v2312_v45 }
 0xbec   : > { %v2326_v50 = vadd.f32 %v5513_v16, %v2314_v37 }
 0xc08   : > { %v2267_v29 = vpop.xlane.xlu1 %2266 }
 0xc09   : > { %v2277_v21 = vmul.f32 0.03125, %v2267_v29 }
 0xc0b   : > { %v2285_v47 = vadd.f32 1e-05, %v2277_v21 }
 0xc0c   : > { %v2446_v11 = vpop.permute.xlu1 %2445 }
 0xc0d   : > { %4582 = vrsqrt.f32 %v2285_v47  ;;  %4352 = vmatprep.subr.mxu0 %v2446_v11 }
 0xc0e   : > { %4353 = vmatpush3.msra.mxu0 %v2446_v11 }
 0xc0f   : > { %4355 = vmatmul.mubr.msk.f32.vlgmr.msra.gmra.mxu0 %vm327_vm1, %v2320_v39  ;;  %4386 = vmatprep.subr.mxu0 %v4679_v2 }
 0xc10   : > { %4357 = vmatprep.mubr.msk.f32.mxu0 %vm327_vm1, %v2321_v10 }
 0xc13   : > { %v2433_v22 = vpop.f32.mrf.mxu1  ;;  %4358 = vmatmul.mubr.msk.f32.gmra.mxu0 %vm327_vm1, %v2322_v7 }
 0xc14   : > { %v5544_v4 = vadd.f32 %v2433_v22, %v2363_v44  ;;  %4360 = vmatprep.mubr.msk.f32.mxu0 %vm327_vm1, %v2323_v58 }
 0xc15   : > { %v4345_v28 = vpop.f32.mrf.mxu1 }
 0xc16   : > { %2587 = vrot.lane.b32.xlu0 %v5544_v4, %s4683_s29 }
 0xc17   : > { %4361 = vmatmul.mubr.msk.f32.gmra.mxu0 %vm327_vm1, %v2324_v49 }
 0xc1a   : > { %v4583_v5 = vpop.eup %4582 }
 0xc1b   : > { %v2301_v34 = vmul.f32 %v4583_v5, %v5499_v26  ;;  %v2440_v26 = vrot.slane %v3994_v41, %v4914_v31 }
 0xc1d   : > { %v2313_v9 = vmul.f32 %v5509_v15, %v2301_v34 }
 0xc1f   : > { %v2325_v12 = vadd.f32 %v5513_v16, %v2313_v9 }
 0xc21   : > { %4363 = vmatprep.mubr.msk.f32.mxu0 %vm327_vm1, %v2325_v12 }
 0xc22   : > { %4364 = vmatmul.mubr.msk.f32.gmra.mxu0 %vm327_vm1, %v2326_v50 }
 0xc23   : > { %4388 = vmatprep.mubr.msk.f32.mxu0 %vm4681_vm0, %v4679_v2 }
 0xc88   : > { %v2588_v18 = vpop.permute.xlu0 %2587 }
 0xc89   : > { %4367 = vmatpush3.xpose.msk.msra.mxu1 %vm553_vm2, %v2588_v18 }
 0xc8a   : > { %4371 = vmatprep.subr.mxu1 %v4679_v2 }
 0xc8c   : > { %4369 = vmatmul.mubr.msk.f32.vlgmr.msra.gmra.mxu1 %vm553_vm2, %v5544_v4 }
 0xc8d   : > { %4373 = vmatprep.mubr.msk.f32.mxu1 %vm4681_vm0, %v4679_v2 }
 0xccf   : > { %v4356_v15 = vpop.f32.mrf.mxu0 }
 0xcd0   : > { %v5571_v16 = vadd.f32 %v4356_v15, %v2440_v26 }
 0xcd1   : > { %v2547_v62 = vpop.f32.mrf.mxu0 }
 0xcd2   : > { %v5573_v17 = vadd.f32 %v2547_v62, %v2440_v26  ;;  %2676 = vperm.xlu0 %4536, %v5571_v16  }
 0xcd3   : > { %v4359_v30 = vpop.f32.mrf.mxu0 }
 0xcd4   : > { %2673 = vperm.xlu1 %4537, %v5573_v17   ;;  %v5577_v19 = vadd.f32 %v4359_v30, %v2440_v26 }
 0xcd5   : > { %v2557_v42 = vpop.f32.mrf.mxu0 }
 0xcd6   : > { %v5580_v1 = vadd.f32 %v2557_v42, %v2440_v26 }
 0xcd7   : > { %v4362_v55 = vpop.f32.mrf.mxu0 }
 0xcd8   : > { %2682 = vperm.xlu1 %4537, %v5577_v19   ;;  %v5586_v29 = vadd.f32 %v4362_v55, %v2440_v26 }
 0xcd9   : > { %v2567_v20 = vpop.f32.mrf.mxu0 }
 0xcda   : > { %v5582_v32 = vadd.f32 %v2567_v20, %v2440_v26 }
 0xcdc   : > { %2685 = vperm.xlu0 %4536, %v5582_v32   ;;  %2679 = vperm.xlu1 %4537, %v5580_v1  }
 0xce0   : > { %2688 = vperm.xlu1 %4537, %v5586_v29  }
 0xce2   : > { %v4365_v21 = vpop.f32.mrf.mxu0 }
 0xce3   : > { %v5589_v36 = vadd.f32 %v4365_v21, %v2440_v26 }
 0xce4   : > { %v2577_v3 = vpop.f32.mrf.mxu0 }
 0xce5   : > { %v5591_v6 = vadd.f32 %v2577_v3, %v2440_v26  ;;  %2694 = vperm.xlu1 %4537, %v5589_v36  }
 0xce7   : > { %2691 = vperm.xlu0 %4536, %v5591_v6  }
 0xce9   : > { %2827 = vrot.lane.b32.xlu1 %v5544_v4, %s4684_s12  ;;  %s5944_s12 = smov 112  }
 0xcea   : > { %4538 = vset.pattern.permute.xlu1 %v4685_v51 }
 0xceb   : > { %4539 = vset.pattern.permute.xlu0 %v4685_v51 }
 0xd4c   : > { %v2659_v63 = vpop.f32.mrf.mxu1 }
 0xd4d   : > { %v2677_v39 = vpop.permute.xlu0 %2676  ;;  %v2663_v50 = vmul.f32 0.35355338, %v2659_v63 }
 0xd4e   : > { %v4370_v46 = vpop.f32.mrf.mxu1  ;;  %v2703_v10 = vrot.slane %v2677_v39, %v4955_v54 }
 0xd4f   : > { %v2674_v47 = vpop.permute.xlu1 %2673 }
 0xd50   : > { %v2699_v13 = vrot.slane %v2674_v47, %v4955_v54 }
 0xd52   : > { %v2728_v44 = vsel %vm695_vm3, %v2703_v10, %v2699_v13 }
 0xd53   : > { %v2683_v11 = vpop.permute.xlu1 %2682 }
 0xd54   : > { %v2711_v58 = vrot.slane %v2683_v11, %v4955_v54 }
 0xd57   : > { %v2680_v57 = vpop.permute.xlu1 %2679  ;;  %v2686_v22 = vpop.permute.xlu0 %2685 }
 0xd58   : > { %v2707_v56 = vrot.slane %v2680_v57, %v4955_v54  ;;  %v2715_v28 = vrot.slane %v2686_v22, %v4955_v54 }
 0xd5a   : > { %v2729_v7 = vsel %vm697_vm4, %v2707_v56, %v2728_v44 }
 0xd5b   : > { %v2689_v45 = vpop.permute.xlu1 %2688  ;;  %v2730_v27 = vsel %vm699_vm5, %v2711_v58, %v2729_v7 }
 0xd5c   : > { %v2719_v49 = vrot.slane %v2689_v45, %v4955_v54  ;;  %v2731_v24 = vsel %vm701_vm6, %v2715_v28, %v2730_v27 }
 0xd5e   : > { %v2732_v9 = vsel %vm703_vm7, %v2719_v49, %v2731_v24 }
 0xd60   : > { %v2695_v5 = vpop.permute.xlu1 %2694 }
 0xd61   : > { %v2727_v12 = vrot.slane %v2695_v5, %v4955_v54 }
 0xd62   : > { %v2692_v34 = vpop.permute.xlu0 %2691 }
 0xd63   : > { %v2723_v37 = vrot.slane %v2692_v34, %v4955_v54 }
 0xd65   : > { %v2733_v18 = vsel %vm705_vm8, %v2723_v37, %v2732_v9 }
 0xd66   : > { %v2734_v41 = vsel %vm707_vm9, %v2727_v12, %v2733_v18 }
 0xd67   : > { %v2736_v26 = vadd.f32 %v2734_v41, %v2663_v50 }
 0xd69   : > { %v2737_v15 = vadd.f32 %v2736_v26, %v4976_v35 }
 0xd6b   : > { %v2738_v62 = vsel %vm553_vm2, %v2737_v15, -inf }
 0xd6c   : > { %2739 = vmax.xlane.f32.xlu0 %v2738_v62 }
 0xd82   : > { %2749 = vrot.lane.b32.xlu0 %v5544_v4, %s4686_s9  ;;  %s5946_s9 = smov 80  }
 0xd86   : > { %2825 = vrot.lane.b32.xlu0 %v5544_v4, %s4687_s18  ;;  %s5947_s18 = smov 72  }
 0xd8a   : > { %3057 = vrot.lane.b32.xlu0 %v5544_v4, %s5944_s12  ;;  %s4701_s12 = smov [#allocation2]  }
 0xd8e   : > { %3289 = vrot.lane.b32.xlu0 %v5544_v4, %s5945_s26  ;;  %s4621_s26 = sshll.u32 %s4701_s12, 4  ;;  %s4622_s26 = int_to_ptr.vmem [resolvable:$false] %s4621_s26 }
 0xd92   : > { %2908 = vperm.xlu0 %4539, %v5571_v16  }
 0xd96   : > { %2917 = vperm.xlu0 %4539, %v5582_v32  }
 0xd9a   : > { %4540 = vset.pattern.permute.xlu0 %v4690_v48 }
 0xd9b   : > { %3137 = vperm.xlu0 %4540, %v5573_v17  }
 0xd9f   : > { %3143 = vperm.xlu0 %4540, %v5580_v1  }
 0xda3   : > { %3146 = vperm.xlu0 %4540, %v5577_v19  }
 0xda7   : > { %3152 = vperm.xlu0 %4540, %v5586_v29  }
 0xdab   : > { %3158 = vperm.xlu0 %4540, %v5589_v36  }
 0xdaf   : > { %4547 = vset.pattern.permute.xlu0 %v4691_v52 }
 0xdb0   : > { %3372 = vperm.xlu0 %4547, %v5571_v16  }
 0xdb4   : > { %3384 = vperm.xlu0 %4547, %v5586_v29  }
 0xdf5   : > { %v2740_v30 = vpop.xlane.xlu0 %2739 }
 0xdf6   : > { %v2741_v42 = vsub.f32 %v2737_v15, %v2740_v30 }
 0xdf8   : > { %v2742_v55 = vmul.f32 1.442695, %v2741_v42 }
 0xdf9   : > { %v2750_v20 = vpop.permute.xlu0 %2749 }
 0xdfa   : > { %4584 = vpow2.f32 %v2742_v55  ;;  %4372 = vmatpush3.msra.mxu1 %v2750_v20 }
 0xdfb   : > { %4376 = vmatprep.subr.mxu1 %v4679_v2 }
 0xe07   : > { %v4585_v21 = vpop.eup %4584 }
 0xe08   : > { %v2744_v3 = vsel %vm553_vm2, %v4585_v21, 0.0 }
 0xe09   : > { %2745 = vadd.xlane.f32.xlu1 %v2744_v3 }
 0xe1a   : > { %3059 = vrot.lane.b32.xlu1 %v5544_v4, %s5946_s9 }
 0xe1e   : > { %3291 = vrot.lane.b32.xlu1 %v5544_v4, %s5947_s18 }
 0xe22   : > { %2905 = vperm.xlu1 %4538, %v5573_v17  }
 0xe26   : > { %2911 = vperm.xlu1 %4538, %v5580_v1  }
 0xe2a   : > { %2914 = vperm.xlu1 %4538, %v5577_v19  }
 0xe2e   : > { %2920 = vperm.xlu1 %4538, %v5586_v29  }
 0xe32   : > { %4541 = vset.pattern.permute.xlu1 %v4690_v48 }
 0xe33   : > { %3140 = vperm.xlu1 %4541, %v5571_v16   ;;  %v2826_v16 = vpop.permute.xlu0 %2825 }
 0xe37   : > { %4542 = vset.pattern.permute.xlu1 %v4685_v51  ;;  %v2828_v51 = vpop.permute.xlu1 %2827 }
 0xe38   : > { %2923 = vperm.xlu1 %4542, %v5591_v6  }
 0xe3c   : > { %2926 = vperm.xlu1 %4542, %v5589_v36  }
 0xe40   : > { %4543 = vset.pattern.permute.xlu1 %v4690_v48 }
 0xe41   : > { %3149 = vperm.xlu1 %4543, %v5582_v32  }
 0xe45   : > { %4544 = vset.pattern.permute.xlu1 %v4691_v52 }
 0xe46   : > { %3369 = vperm.xlu1 %4544, %v5573_v17  }
 0xe4a   : > { %4545 = vset.pattern.permute.xlu1 %v4690_v48  ;;  %v3058_v48 = vpop.permute.xlu0 %3057 }
 0xe4b   : > { %3155 = vperm.xlu1 %4545, %v5591_v6  }
 0xe4f   : > { %4546 = vset.pattern.permute.xlu1 %v4691_v52 }
 0xe50   : > { %3375 = vperm.xlu1 %4546, %v5580_v1  }
 0xe54   : > { %3378 = vperm.xlu1 %4546, %v5577_v19   ;;  %v3290_v19 = vpop.permute.xlu0 %3289 }
 0xe58   : > { %3381 = vperm.xlu1 %4546, %v5582_v32   ;;  %v2909_v39 = vpop.permute.xlu0 %2908 }
 0xe5c   : > { %3387 = vperm.xlu1 %4546, %v5591_v6   ;;  %v5686_v57 = vpop.permute.xlu0 %2917 }
 0xe60   : > { %3390 = vperm.xlu1 %4546, %v5589_v36   ;;  %v3138_v56 = vpop.permute.xlu0 %3137 }
 0xe61   : > { %v3163_v28 = vrot.slane %v3138_v56, %v4955_v54 }
 0xe64   : > { %v3144_v7 = vpop.permute.xlu0 %3143 }
 0xe65   : > { %v3171_v24 = vrot.slane %v3144_v7, %v4955_v54 }
 0xe68   : > { %v3147_v58 = vpop.permute.xlu0 %3146 }
 0xe69   : > { %v3175_v12 = vrot.slane %v3147_v58, %v4955_v54 }
 0xe6c   : > { %v3153_v5 = vpop.permute.xlu0 %3152 }
 0xe6d   : > { %v3183_v15 = vrot.slane %v3153_v5, %v4955_v54 }
 0xe70   : > { %v3159_v18 = vpop.permute.xlu0 %3158 }
 0xe71   : > { %v3191_v55 = vrot.slane %v3159_v18, %v4955_v54 }
 0xe92   : > { %v2746_v29 = vpop.xlane.xlu1 %2745 }
 0xe93   : > { %4586 = vrcp.f32 %v2746_v29 }
 0xe96   : > { %v3060_v17 = vpop.permute.xlu1 %3059 }
 0xe97   : > { %4387 = vmatpush3.xpose.msk.msra.mxu0 %vm553_vm2, %v3060_v17 }
 0xe98   : > { %4396 = vmatprep.subr.mxu0 %v4679_v2 }
 0xe9a   : > { %4389 = vmatmul.mubr.msk.f32.vlgmr.msra.gmra.mxu0 %vm553_vm2, %v3058_v48  ;;  %v3292_v52 = vpop.permute.xlu1 %3291 }
 0xe9b   : > { %4397 = vmatpush3.xpose.msk.msra.mxu0 %vm553_vm2, %v3292_v52  ;;  %4398 = vmatprep.mubr.msk.f32.mxu0 %vm4681_vm0, %v4679_v2 }
 0xe9c   : > { %4406 = vmatprep.subr.mxu0 %v4679_v2 }
 0xe9e   : > { %4399 = vmatmul.mubr.msk.f32.vlgmr.msra.gmra.mxu0 %vm553_vm2, %v3290_v19  ;;  %v2906_v36 = vpop.permute.xlu1 %2905  ;;  %v2935_v19 = vrot.slane %v2909_v39, %v4955_v54 }
 0xe9f   : > { %4414 = vmatprep.mubr.msk.f32.mxu0 %vm4681_vm0, %v4679_v2  ;;  %v2931_v17 = vrot.slane %v2906_v36, %v4955_v54 }
 0xea0   : > { %v4587_v1 = vpop.eup %4586 }
 0xea1   : > { %v2748_v32 = vmul.f32 %v4587_v1, %v4585_v21  ;;  %v3373_v21 = vpop.permute.xlu0 %3372 }
 0xea2   : > { %v2912_v6 = vpop.permute.xlu1 %2911 }
 0xea3   : > { %4374 = vmatmul.mubr.msk.f32.vlgmr.msra.gmra.mxu1 %vm553_vm2, %v2748_v32  ;;  %v2939_v1 = vrot.slane %v2912_v6, %v4955_v54 }
 0xea4   : > { %4377 = vmatpush3.xpose.msk.msra.mxu1 %vm553_vm2, %v2828_v51  ;;  %4378 = vmatprep.mubr.msk.f32.mxu1 %vm4681_vm0, %v4679_v2 }
 0xea5   : > { %4381 = vmatprep.subr.mxu1 %v4679_v2 }
 0xea6   : > { %v2915_v63 = vpop.permute.xlu1 %2914 }
 0xea7   : > { %4379 = vmatmul.mubr.msk.f32.vlgmr.msra.gmra.mxu1 %vm553_vm2, %v2826_v16  ;;  %v2943_v56 = vrot.slane %v2915_v63, %v4955_v54 }
 0xea8   : > { %4383 = vmatprep.mubr.msk.f32.mxu1 %vm4681_vm0, %v4679_v2 }
 0xeaa   : > { %v5680_v46 = vpop.permute.xlu1 %2920 }
 0xeae   : > { %v3141_v47 = vpop.permute.xlu1 %3140 }
 0xeaf   : > { %v3167_v22 = vrot.slane %v3141_v47, %v4955_v54 }
 0xeb1   : > { %v3192_v49 = vsel %vm695_vm3, %v3167_v22, %v3163_v28  ;;  %v3385_v22 = vpop.permute.xlu0 %3384 }
 0xeb2   : > { %v3193_v37 = vsel %vm697_vm4, %v3171_v24, %v3192_v49  ;;  %v2951_v24 = vrot.slane %v5680_v46, %v4955_v54  ;;  %v3415_v18 = vrot.slane %v3385_v22, %v4955_v54 }
 0xeb3   : > { %v5682_v11 = vpop.permute.xlu1 %2923  ;;  %v3194_v50 = vsel %vm699_vm5, %v3175_v12, %v3193_v37  ;;  %v2947_v37 = vrot.slane %v5686_v57, %v4955_v54 }
 0xeb7   : > { %v5684_v13 = vpop.permute.xlu1 %2926 }
 0xebc   : > { %v3150_v10 = vpop.permute.xlu1 %3149 }
 0xebd   : > { %v3179_v9 = vrot.slane %v3150_v10, %v4955_v54  ;;  %v3399_v10 = vrot.slane %v3373_v21, %v4955_v54 }
 0xebf   : > { %v3195_v41 = vsel %vm701_vm6, %v3179_v9, %v3194_v50  ;;  %v2955_v9 = vrot.slane %v5682_v11, %v4955_v54 }
 0xec0   : > { %v3196_v30 = vsel %vm703_vm7, %v3183_v15, %v3195_v41  ;;  %v2959_v41 = vrot.slane %v5684_v13, %v4955_v54 }
 0xec1   : > { %v3370_v44 = vpop.permute.xlu1 %3369 }
 0xec2   : > { %v3395_v48 = vrot.slane %v3370_v44, %v4955_v54  ;;  %v2960_v44 = vsel %vm695_vm3, %v2935_v19, %v2931_v17 }
 0xec4   : > { %v3424_v39 = vsel %vm695_vm3, %v3399_v10, %v3395_v48 }
 0xec6   : > { %v3156_v45 = vpop.permute.xlu1 %3155 }
 0xec7   : > { %v3187_v26 = vrot.slane %v3156_v45, %v4955_v54 }
 0xec9   : > { %v3197_v42 = vsel %vm705_vm8, %v3187_v26, %v3196_v30 }
 0xeca   : > { %v3198_v16 = vsel %vm707_vm9, %v3191_v55, %v3197_v42 }
 0xecb   : > { %v3376_v27 = vpop.permute.xlu1 %3375 }
 0xecc   : > { %v3403_v32 = vrot.slane %v3376_v27, %v4955_v54  ;;  %v2961_v27 = vsel %vm697_vm4, %v2939_v1, %v2960_v44 }
 0xecd   : > { %v2962_v63 = vsel %vm699_vm5, %v2943_v56, %v2961_v27 }
 0xece   : > { %v3425_v28 = vsel %vm697_vm4, %v3403_v32, %v3424_v39  ;;  %v2963_v15 = vsel %vm701_vm6, %v2947_v37, %v2962_v63 }
 0xecf   : > { %v3379_v34 = vpop.permute.xlu1 %3378  ;;  %v2964_v57 = vsel %vm703_vm7, %v2951_v24, %v2963_v15 }
 0xed0   : > { %v3407_v7 = vrot.slane %v3379_v34, %v4955_v54  ;;  %v2965_v42 = vsel %vm705_vm8, %v2955_v9, %v2964_v57 }
 0xed1   : > { %v2966_v13 = vsel %vm707_vm9, %v2959_v41, %v2965_v42 }
 0xed2   : > { %v3426_v5 = vsel %vm699_vm5, %v3407_v7, %v3425_v28 }
 0xed3   : > { %v3382_v62 = vpop.permute.xlu1 %3381 }
 0xed4   : > { %v3411_v36 = vrot.slane %v3382_v62, %v4955_v54 }
 0xed6   : > { %v3427_v12 = vsel %vm701_vm6, %v3411_v36, %v3426_v5 }
 0xed7   : > { %v3388_v51 = vpop.permute.xlu1 %3387  ;;  %v3428_v30 = vsel %vm703_vm7, %v3415_v18, %v3427_v12 }
 0xed8   : > { %v3419_v50 = vrot.slane %v3388_v51, %v4955_v54 }
 0xeda   : > { %v3429_v55 = vsel %vm705_vm8, %v3419_v50, %v3428_v30 }
 0xedb   : > { %v3391_v49 = vpop.permute.xlu1 %3390 }
 0xedc   : > { %v3423_v46 = vrot.slane %v3391_v49, %v4955_v54 }
 0xede   : > { %v3430_v21 = vsel %vm707_vm9, %v3423_v46, %v3429_v55 }
 0xf5a   : > { %v3131_v20 = vpop.f32.mrf.mxu0 }
 0xf5b   : > { %v3135_v3 = vmul.f32 0.35355338, %v3131_v20 }
 0xf5c   : > { %v4390_v29 = vpop.f32.mrf.mxu0 }
 0xf5d   : > { %v3200_v52 = vadd.f32 %v3198_v16, %v3135_v3 }
 0xf5e   : > { %v3363_v47 = vpop.f32.mrf.mxu0 }
 0xf5f   : > { %v3201_v45 = vadd.f32 %v3200_v52, %v4976_v35  ;;  %v3367_v62 = vmul.f32 0.35355338, %v3363_v47 }
 0xf60   : > { %v4400_v58 = vpop.f32.mrf.mxu0 }
 0xf61   : > { %v3202_v6 = vsel %vm553_vm2, %v3201_v45, -inf  ;;  %v3432_v54 = vadd.f32 %v3430_v21, %v3367_v62 }
 0xf62   : > { %3203 = vmax.xlane.f32.xlu1 %v3202_v6 }
 0xf63   : > { %v5722_v34 = vpop.f32.mrf.mxu1  ;;  %v3433_v17 = vadd.f32 %v3432_v54, %v4976_v35 }
 0xf65   : > { %v4375_v26 = vpop.f32.mrf.mxu1  ;;  %v3434_v48 = vsel %vm553_vm2, %v3433_v17, -inf }
 0xf67   : > { %v2899_v11 = vpop.f32.mrf.mxu1 }
 0xf68   : > { %v2903_v20 = vmul.f32 0.35355338, %v2899_v11 }
 0xf69   : > { %v4380_v3 = vpop.f32.mrf.mxu1 }
 0xf6a   : > { %v2968_v51 = vadd.f32 %v2966_v13, %v2903_v20 }
 0xf6c   : > { %v2969_v16 = vadd.f32 %v2968_v51, %v4976_v35 }
 0xf6e   : > { %v2970_v29 = vsel %vm553_vm2, %v2969_v16, -inf }
 0xf6f   : > { %2971 = vmax.xlane.f32.xlu0 %v2970_v29 }
 0xf73   : > { %3435 = vmax.xlane.f32.xlu0 %v3434_v48 }
 0xfeb   : > { %v3204_v52 = vpop.xlane.xlu1 %3203 }
 0xfec   : > { %v3205_v19 = vsub.f32 %v3201_v45, %v3204_v52 }
 0xfee   : > { %v3206_v1 = vmul.f32 1.442695, %v3205_v19  ;;  %v3975_v19 = vld [vmem:[%s5928_s3 + $0xb0] sm:$0xff] }
 0xff0   : > { %4588 = vpow2.f32 %v3206_v1  ;;  %v3966_v1 = vld [vmem:[%s5928_s3 + $0x68] sm:$0xff] }
 0xff8   : > { %v2972_v32 = vpop.xlane.xlu0 %2971 }
 0xff9   : > { %v2973_v47 = vsub.f32 %v2969_v16, %v2972_v32  ;;  %v3992_v32 = vld [vmem:[%s5929_s4 + $0xf8] sm:$0xff] }
 0xffb   : > { %v2974_v58 = vmul.f32 1.442695, %v2973_v47  ;;  %v3991_v47 = vld [vmem:[%s5929_s4 + $0xf0] sm:$0xff] }
 0xffc   : > { %v3436_v10 = vpop.xlane.xlu0 %3435 }
 0xffd   : > { %v4589_v56 = vpop.eup %4588  ;;  %v3437_v7 = vsub.f32 %v3433_v17, %v3436_v10  ;;  %v3990_v10 = vld [vmem:[%s5929_s4 + $0xe8] sm:$0xff] }
 0xffe   : > { %v3208_v36 = vsel %vm553_vm2, %v4589_v56, 0.0 }
 0xfff   : > { %v3438_v44 = vmul.f32 1.442695, %v3437_v7  ;;  %3209 = vadd.xlane.f32.xlu1 %v3208_v36  ;;  %v3988_v7 = vld [vmem:[%s5929_s4 + $0xd8] sm:$0xff]  ;;  %v3987_v36 = vld [vmem:[%s5929_s4 + $0xd0] sm:$0xff] }
0x1001   : > { %4590 = vpow2.f32 %v3438_v44  ;;  %v3985_v44 = vld [vmem:[%s5929_s4 + $0xc0] sm:$0xff] }
0x1002   : > { %4592 = vpow2.f32 %v2974_v58  ;;  %v3986_v58 = vld [vmem:[%s5929_s4 + $0xc8] sm:$0xff] }
0x100e   : > { %v4591_v35 = vpop.eup %4590 }
0x100f   : > { %v3440_v39 = vsel %vm553_vm2, %v4591_v35, 0.0  ;;  %v4593_v6 = vpop.eup %4592 }
0x1010   : > { %3441 = vadd.xlane.f32.xlu0 %v3440_v39  ;;  %2981 = vrot.lane.b32.xlu1 %v5544_v4, %s5948_s20  ;;  %v2976_v45 = vsel %vm553_vm2, %v4593_v6, 0.0  ;;  %v3983_v39 = vld [vmem:[%s5929_s4 + $0xb0] sm:$0xff] }
0x1014   : > { %2977 = vadd.xlane.f32.xlu0 %v2976_v45  ;;  %3445 = vrot.lane.b32.xlu1 %v5544_v4, %s5949_s14  ;;  %v3981_v45 = vld [vmem:[%s5929_s4 + $0xa0] sm:$0xff]  ;;  %s266_s14 = sand.u32 1, %s4669_s22  }
0x1015   : > { %s3831_s29 = scalar_lea.sflag [#allocation3], %s266_s14 }
0x1018   : > { %3550 = vrot.lane.b32.xlu1 %v5434_v61, %s4680_s13 }
0x102a   : > { %3213 = vrot.lane.b32.xlu0 %v5544_v4, %s5950_s11  ;;  %s3928_s11 = sshll.u32 %s266_s14, 3 }
0x102e   : > { %3548 = vrot.lane.b32.xlu0 %v5443_v25, %s4680_s13 }
0x1032   : > { %3546 = vrot.lane.b32.xlu0 %v5450_v40, %s4680_s13 }
0x1088   : > { %v3210_v22 = vpop.xlane.xlu1 %3209 }
0x108c   : > { %v2982_v27 = vpop.permute.xlu1 %2981 }
0x108d   : > { %4382 = vmatpush3.msra.mxu1 %v2982_v27 }
0x108e   : > { %4391 = vmatprep.subr.mxu1 %v4679_v2 }
0x1090   : > { %v3446_v5 = vpop.permute.xlu1 %3445 }
0x1094   : > { %v3551_v9 = vpop.permute.xlu1 %3550 }
0x1095   : > { %4407 = vmatpush3.msra.mxu0 %v3551_v9 }
0x1096   : > { %4408 = vmatprep.subr.mxu0 %v4679_v2 }
0x1099   : > { %v3442_v28 = vpop.xlane.xlu0 %3441 }
0x109d   : > { %v2978_v49 = vpop.xlane.xlu0 %2977 }
0x109e   : > { %4594 = vrcp.f32 %v2978_v49 }
0x109f   : > { %4596 = vrcp.f32 %v3210_v22  ;;  %v3980_v22 = vld [vmem:[%s5929_s4 + $0x98] sm:$0xff] }
0x10a0   : > { %4598 = vrcp.f32 %v3442_v28 }
0x10a1   : > { %v3214_v4 = vpop.permute.xlu0 %3213 }
0x10a5   : > { %v3549_v12 = vpop.permute.xlu0 %3548 }
0x10a6   : > { %4409 = vmatpush3.msra.mxu0 %v3549_v12 }
0x10a7   : > { %4410 = vmatprep.subr.mxu0 %v4679_v2 }
0x10a9   : > { %v3547_v50 = vpop.permute.xlu0 %3546 }
0x10aa   : > { %4411 = vmatpush3.msra.mxu0 %v3547_v50 }
0x10ab   : > { %v4595_v61 = vpop.eup %4594  ;;  %4412 = vmatprep.subr.mxu0 %v4679_v2 }
0x10ac   : > { %v2980_v63 = vmul.f32 %v4595_v61, %v4593_v6  ;;  %v4597_v24 = vpop.eup %4596  ;;  %v3982_v6 = vld [vmem:[%s5929_s4 + $0xa8] sm:$0xff]  ;;  %v3646_v61 = vrot.slane %v5529_v53, %v1628_v60 }
0x10ad   : > { %v3212_v25 = vmul.f32 %v4597_v24, %v4589_v56  ;;  %v4599_v40 = vpop.eup %4598  ;;  %v3989_v56 = vld [vmem:[%s5929_s4 + $0xe0] sm:$0xff]  ;;  %v3978_v60 = vld [vmem:[%s5929_s4 + $0x88] sm:$0xff] }
0x10ae   : > { %4384 = vmatmul.mubr.msk.f32.vlgmr.msra.gmra.mxu1 %vm553_vm2, %v2980_v63  ;;  %v3444_v37 = vmul.f32 %v4599_v40, %v4591_v35  ;;  %v3984_v35 = vld [vmem:[%s5929_s4 + $0xb8] sm:$0xff] }
0x10af   : > { %4392 = vmatpush3.msra.mxu1 %v3214_v4  ;;  %4393 = vmatprep.mubr.msk.f32.mxu1 %vm4681_vm0, %v4679_v2  ;;  %v3651_v4 = vrot.slane %v5529_v53, %v1633_v14  ;;  %v3977_v14 = vld [vmem:[%s5929_s4 + $0x80] sm:$0xff] }
0x10b0   : > { %4401 = vmatprep.subr.mxu1 %v4679_v2 }
0x10b2   : > { %4394 = vmatmul.mubr.msk.f32.vlgmr.msra.gmra.mxu1 %vm553_vm2, %v3212_v25 }
0x10b3   : > { %4402 = vmatpush3.msra.mxu1 %v3446_v5  ;;  %4403 = vmatprep.mubr.msk.f32.mxu1 %vm4681_vm0, %v4679_v2  ;;  %v3979_v5 = vld [vmem:[%s5929_s4 + $0x90] sm:$0xff] }
0x10b4   : > { %4417 = vmatprep.subr.mxu1 %v4679_v2 }
0x10b6   : > { %4404 = vmatmul.mubr.msk.f32.vlgmr.msra.gmra.mxu1 %vm553_vm2, %v3444_v37  ;;  %v3656_v37 = vrot.slane %v5529_v53, %v5299_v33 }
0x10b7   : > { %4425 = vmatprep.mubr.msk.f32.mxu1 %vm4681_vm0, %v4679_v2  ;;  %4418 = vmatpush3.msra.mxu1 %v3975_v19 }
0x10b8   : > { %4419 = vmatprep.subr.mxu1 %v4679_v2 }
0x116e   : > { %v3053_v18 = vpop.f32.mrf.mxu1 }
0x116f   : > { %3522 = vrot.lane.b32.xlu1 %v3053_v18, %s5951_s15  ;;  %s4019_s15 = sshll.u32 %s4758_s25, 7  ;;  %s4623_s25 = scalar_lea.vmem %s4622_s26, 256 }
0x1170   : > { %v4385_v41 = vpop.f32.mrf.mxu1  ;;  %s3842_s16 = scalar_lea.hbm %s5931_s6, %s4019_s15 }
0x1171   : > { %v3734_v41 = vrot.slane %v5529_v53, %v4914_v31  ;;  %v3822_v31 = vrot.slane %v5529_v53, %v1804_v38 }
0x1172   : > { %v3285_v46 = vpop.f32.mrf.mxu1 }
0x1173   : > { %3526 = vrot.lane.b32.xlu1 %v3285_v46, %s5952_s28  ;;  %s268_s28 = scalar_lea.vmem [#allocation2], %s3928_s11 }
0x1174   : > { %v4395_v26 = vpop.f32.mrf.mxu1 }
0x1176   : > { %v3517_v15 = vpop.f32.mrf.mxu1 }
0x1177   : > { %3544 = vrot.lane.b32.xlu1 %v5457_v43, %s4680_s13  ;;  %3530 = vrot.lane.b32.xlu0 %v3517_v15, %s5953_s10  ;;  %v3539_v43 = vrot.slane %v5529_v53, %v5156_v8  ;;  %v3972_v8 = vld [vmem:[%s5928_s3 + $0x98] sm:$0xff]  ;;  %s3844_s10 = sshll.u32 %s268_s28, 4  ;;  %s3845_s10 = int_to_ptr.vmem [resolvable:$true] %s3844_s10 }
0x1178   : > { %v4405_v62 = vpop.f32.mrf.mxu1  ;;  %4420 = vmatpush3.msra.mxu1 %v3972_v8  ;;  %s4617_s19 = scalar_lea.vmem %s3845_s10, 128  ;;  %p4624_p0 = scmp.lt.s32.totalorder %s3845_s10, %s4622_s26 }
0x1179   : > { %4421 = vmatprep.subr.mxu1 %v4679_v2  ;;  %p4618_p11 = scmp.ne.s32.totalorder %s3845_s10, %s4617_s19  ;;  %p4625_p1 = scmp.lt.s32.totalorder %s4623_s25, %s4617_s19 }
0x117b   : > { %p4619_p12 = pnand %p4618_p11, %p4775_p5  ;;  %p4626_p2 = por %p4625_p1, %p4624_p0 }
0x117d   : > { %p4620_p13 = pneg %p4619_p12 }
0x117f   : > { %p4627_p3 = pnand %p4626_p2, %p4620_p13 }
0x11e1   : > { %v3523_v57 = vpop.permute.xlu1 %3522 }
0x11e2   : > { %v3533_v11 = vsel %vm553_vm2, %v5722_v34, %v3523_v57 }
0x11e5   : > { %v3527_v30 = vpop.permute.xlu1 %3526 }
0x11e6   : > { %v3534_v42 = vsel %vm1514_vm10, %v3533_v11, %v3527_v30 }
0x11e9   : > { %v3531_v55 = vpop.permute.xlu0 %3530  ;;  %v3545_v20 = vpop.permute.xlu1 %3544 }
0x11ea   : > { %v3535_v21 = vsel %vm1516_vm11, %v3534_v42, %v3531_v55  ;;  %4413 = vmatpush3.msra.mxu0 %v3545_v20 }
0x11eb   : > { %4415 = vmatmul.mubr.msk.f32.vlgmr.msra.gmra.mxu0 %vm327_vm1, %v3535_v21  ;;  %4428 = vmatprep.subr.mxu0 %v4679_v2 }
0x11ec   : > { %4460 = vmatprep.mubr.msk.f32.mxu0 %vm4681_vm0, %v4679_v2  ;;  %4429 = vmatpush3.msra.mxu0 %v3992_v32 }
0x11ed   : > { %4430 = vmatprep.subr.mxu0 %v4679_v2 }
0x11ee   : > { %4431 = vmatpush3.msra.mxu0 %v3991_v47 }
0x11ef   : > { %4432 = vmatprep.subr.mxu0 %v4679_v2 }
0x11f0   : > { %4433 = vmatpush3.msra.mxu0 %v3990_v10 }
0x11f1   : > { %4434 = vmatprep.subr.mxu0 %v4679_v2 }
0x11f2   : > { %4435 = vmatpush3.msra.mxu0 %v3989_v56 }
0x11f3   : > { %4436 = vmatprep.subr.mxu0 %v4679_v2 }
0x11f4   : > { %4437 = vmatpush3.msra.mxu0 %v3988_v7 }
0x11f5   : > { %4438 = vmatprep.subr.mxu0 %v4679_v2 }
0x11f6   : > { %4439 = vmatpush3.msra.mxu0 %v3987_v36 }
0x11f7   : > { %4440 = vmatprep.subr.mxu0 %v4679_v2 }
0x11f8   : > { %4441 = vmatpush3.msra.mxu0 %v3986_v58 }
0x11f9   : > { %4442 = vmatprep.subr.mxu0 %v4679_v2 }
0x11fa   : > { %4443 = vmatpush3.msra.mxu0 %v3985_v44 }
0x11fb   : > { %4444 = vmatprep.subr.mxu0 %v4679_v2 }
0x11fc   : > { %4445 = vmatpush3.msra.mxu0 %v3984_v35 }
0x11fd   : > { %4446 = vmatprep.subr.mxu0 %v4679_v2 }
0x11fe   : > { %4447 = vmatpush3.msra.mxu0 %v3983_v39 }
0x11ff   : > { %4448 = vmatprep.subr.mxu0 %v4679_v2 }
0x1200   : > { %4449 = vmatpush3.msra.mxu0 %v3982_v6 }
0x1201   : > { %4450 = vmatprep.subr.mxu0 %v4679_v2 }
0x1202   : > { %4451 = vmatpush3.msra.mxu0 %v3981_v45 }
0x1203   : > { %4452 = vmatprep.subr.mxu0 %v4679_v2 }
0x1204   : > { %4453 = vmatpush3.msra.mxu0 %v3980_v22 }
0x1205   : > { %4454 = vmatprep.subr.mxu0 %v4679_v2 }
0x1206   : > { %4455 = vmatpush3.msra.mxu0 %v3979_v5 }
0x1207   : > { %4456 = vmatprep.subr.mxu0 %v4679_v2 }
0x1208   : > { %4457 = vmatpush3.msra.mxu0 %v3978_v60 }
0x1209   : > { %4458 = vmatprep.subr.mxu0 %v4679_v2 }
0x120a   : > { %4459 = vmatpush3.msra.mxu0 %v3977_v14 }
0x12ab   : > { %v3625_v13 = vpop.f32.mrf.mxu0 }
0x12ac   : > { %v3626_v3 = vadd.f32 %v3625_v13, %v3539_v43 }
0x12ad   : > { %v4416_v34 = vpop.f32.mrf.mxu0 }
0x12ae   : > { %v3629_v54 = vadd.f32 %v3626_v3, %v5488_v59  ;;  %v3969_v59 = vld [vmem:[%s5928_s3 + $0x80] sm:$0xff]  ;;  %v3827_v3 = vrot.slane %v5529_v53, %v1809_v0 }
0x12af   : > { %4422 = vmatpush3.msra.mxu1 %v3969_v59 }
0x12b0   : > { %v3630_v51 = vsel %vm327_vm1, %v3629_v54, 0.0  ;;  %4423 = vmatprep.subr.mxu1 %v4679_v2 }
0x12b1   : > { %3631 = vadd.xlane.f32.xlu0 %v3630_v51  ;;  %4424 = vmatpush3.msra.mxu1 %v3966_v1 }
0x133a   : > { %v3632_v16 = vpop.xlane.xlu0 %3631 }
0x133b   : > { %v3633_v29 = vmul.f32 0.03125, %v3632_v16 }
0x133d   : > { %v3634_v17 = vsub.f32 %v3629_v54, %v3633_v29 }
0x133f   : > { %v3635_v48 = vmul.f32 %v3634_v17, %v3634_v17 }
0x1341   : > { %v3636_v52 = vsel %vm327_vm1, %v3635_v48, 0.0 }
0x1342   : > { %3637 = vadd.xlane.f32.xlu1 %v3636_v52 }
0x13cb   : > { %v3638_v27 = vpop.xlane.xlu1 %3637 }
0x13cc   : > { %v3639_v28 = vmul.f32 0.03125, %v3638_v27 }
0x13ce   : > { %v3640_v49 = vadd.f32 1e-05, %v3639_v28 }
0x13d0   : > { %4600 = vrsqrt.f32 %v3640_v49 }
0x13dd   : > { %v4601_v63 = vpop.eup %4600 }
0x13de   : > { %v3642_v24 = vmul.f32 %v4601_v63, %v3634_v17 }
0x13e0   : > { %v3647_v25 = vmul.f32 %v3646_v61, %v3642_v24 }
0x13e2   : > { %v3652_v40 = vadd.f32 %v3651_v4, %v3647_v25 }
0x13e4   : > { %4426 = vmatmul.mubr.msk.f32.vlgmr.msra.gmra.mxu1 %vm327_vm1, %v3652_v40 }
0x14a4   : > { %v3726_v9 = vpop.f32.mrf.mxu1 }
0x14a5   : > { %v3727_v12 = vadd.f32 %v3726_v9, %v3656_v37 }
0x14a6   : > { %v4427_v50 = vpop.f32.mrf.mxu1 }
0x14a7   : > { %v3730_v18 = vmax.f32 %v3727_v12, 0.0 }
0x14a9   : > { %4461 = vmatmul.mubr.f32.vlgmr.msra.gmra.mxu0 %v3730_v18 }
0x1569   : > { %v3801_v46 = vpop.f32.mrf.mxu0 }
0x156a   : > { %v3802_v26 = vadd.f32 %v3801_v46, %v3734_v41 }
0x156b   : > { %v4462_v15 = vpop.f32.mrf.mxu0 }
0x156c   : > { %v3805_v62 = vadd.f32 %v3802_v26, %v3652_v40 }
0x156e   : > { %v3806_v57 = vsel %vm327_vm1, %v3805_v62, 0.0 }
0x156f   : > { %3807 = vadd.xlane.f32.xlu0 %v3806_v57 }
0x15f8   : > { %v3808_v2 = vpop.xlane.xlu0 %3807 }
0x15f9   : > { %v3809_v30 = vmul.f32 0.03125, %v3808_v2 }
0x15fb   : > { %v3810_v33 = vsub.f32 %v3805_v62, %v3809_v30 }
0x15fd   : > { %v3811_v11 = vmul.f32 %v3810_v33, %v3810_v33 }
0x15ff   : > { %v3812_v42 = vsel %vm327_vm1, %v3811_v11, 0.0 }
0x1600   : > { %3813 = vadd.xlane.f32.xlu0 %v3812_v42 }
0x1689   : > { %v3814_v55 = vpop.xlane.xlu0 %3813 }
0x168a   : > { %v3815_v20 = vmul.f32 0.03125, %v3814_v55 }
0x168c   : > { %v3816_v21 = vadd.f32 1e-05, %v3815_v20 }
0x168e   : > { %4602 = vrsqrt.f32 %v3816_v21 }
0x169b   : > { %v4603_v43 = vpop.eup %4602 }
0x169c   : > { %v3818_v13 = vmul.f32 %v4603_v43, %v3810_v33 }
0x169e   : > { %v3823_v34 = vmul.f32 %v3822_v31, %v3818_v13 }
0x16a0   : > { %v3828_v54 = vadd.f32 %v3827_v3, %v3823_v34 }
0x16a2   : > { %3829 = vst.msk [vmem:[%s268_s28] sm:$0xff] %vm327_vm1, %v3828_v54 }
0x16a3   : > { %4630 = shalt.err (!%p4627_p3)
}
0x16a4   : > { %s4631_s9 = scalar_lea.hbm %s3842_s16, 128  ;;  %s4635_s14 = scalar_lea.hbm %s5931_s6, 256 }
0x16a5   : > { %p4632_p4 = scmp.ne.s32.totalorder %s3842_s16, %s4631_s9  ;;  %p4636_p9 = scmp.lt.s32.totalorder %s3842_s16, %s5931_s6 }
0x16a6   : > { %p4637_p10 = scmp.lt.s32.totalorder %s4635_s14, %s4631_s9 }
0x16a7   : > { %p4633_p7 = pnand %p4632_p4, %p4775_p5 }
0x16a8   : > { %p4638_p11 = por %p4637_p10, %p4636_p9 }
0x16a9   : > { %p4634_p8 = pneg %p4633_p7 }
0x16ab   : > { %p4639_p12 = pnand %p4638_p11, %p4634_p8 }
0x16ad   : > { %4642 = shalt.err (!%p4639_p12)
}
0x16ae   : > { %4463 = dma.vmem_to_hbm [thread:$0]  (%p4775_p5), %s3845_s10, 128, %s3842_s16, %s3831_s29  }
0x16af PF: > { %p4469_p13 = scmp.ge.s32.totalorder %s4677_s24, 2  ;;  %s3856_s28 = sand.u32 1, %s4665_s21  }
0x16b0   : > { %s3857_s13 = scalar_lea.sflag [#allocation3], %s3856_s28 }
0x16b1   : > { %p4466_p0 = pnand %p4469_p13, %p4779_p6 }
0x16b3   : > { %p4467_p1 = pneg %p4466_p0 }
0x16b5   : > { %4660 = dma.done.wait (%p4467_p1), %s3857_s13, 128  }
0x16b6   : > { %4662 = vsyncadd (%p4467_p1), %s3857_s13, 4294967168  ;;  %p16_p2 = scmp.ge.s32.totalorder %s4762_s27, 4   ;;  %s5954_s21 = smov %s4669_s22 }
0x16b7   : > { %s5955_s22 = smov %s4673_s23  ;;  %s5956_s23 = smov %s4773_s30 }
0x16b8   : > { %s5957_s24 = smov %s4762_s27  ;;  %18 = sbr.rel (!%p16_p2) target bundleno = 3 (0x3), region = 88 }
0x16bd   :  { %3862 = vsyncpa [#allocation3], 1 }
0x16be   :  { %3864 = vsyncpa [#allocation3 + $0x1], 1 }

</bundles_post_ra>
